<compile_context>
chip_gen: v7x
topology: tpu7x:2x2x1
jax: 0.10.0
libtpu: 0.0.40
codegen_flags: <defaults>
</compile_context>

<pallas_src>
import math
import functools

import jax
import jax.numpy as jnp
from jax.experimental import pallas as pl
from jax.experimental.pallas import tpu as pltpu


# ----------------------------------------------------------------------------
# Helpers
# ----------------------------------------------------------------------------
def _ln(y, gamma, beta, eps=1e-5):
    mu = jnp.mean(y, axis=-1, keepdims=True)
    var = jnp.mean((y - mu) ** 2, axis=-1, keepdims=True)
    return (y - mu) * jax.lax.rsqrt(var + eps) * gamma + beta


def _pick_batch_block(B, bytes_per_elem, *, target_bytes=4 << 20, cap=64):
    """Batch block: big enough to amortize the ~0.35us/step pipeline overhead,
    small enough to stay well inside v7x's 64 MiB VMEM, and (for B>=2) giving
    at least two grid steps so both v7x TensorCores get work."""
    bb = max(1, min(cap, target_bytes // max(1, bytes_per_elem)))
    bb = min(bb, B)
    if B >= 2:
        bb = min(bb, B // 2)
    bb = max(1, bb)
    while B % bb:          # exact blocks only (no ragged tail)
        bb -= 1
    return bb


# ----------------------------------------------------------------------------
# Kernel 1: fused [input embedding + PE + pad mask + reciprocal attention
#                  + residual + LayerNorm], tiled over the batch
# ----------------------------------------------------------------------------
def _fused_recip_attn_kernel(num_heads,
                             tcr_raw_ref, epi_raw_ref,
                             wte_ref, bte_ref, wee_ref, bee_ref,
                             tpe_ref, epe_ref,
                             wtq_ref, btq_ref, weq_ref, beq_ref,
                             wop_ref, bop_ref, wot_ref, bot_ref,
                             gp_ref, bp_ref, gt_ref, bt_ref,
                             out_ref):
    tcr_raw = tcr_raw_ref[...]          # (Bb, Lt, K) f32
    epi_raw = epi_raw_ref[...]          # (Bb, Le, K) f32
    Bb, Lt, K = tcr_raw.shape
    Le = epi_raw.shape[1]
    D = wte_ref.shape[1]
    H = num_heads
    hd = D // H
    scale = 1.0 / math.sqrt(hd)

    # --- key-padding masks from the raw f32 rows (fused; no extra HBM pass) ---
    # TODO(synk): row-sum==0 follows the reference; an explicit pad flag would be safer.
    tcr_madd = jnp.where(jnp.sum(tcr_raw, axis=-1) == 0.0, -1e9, 0.0)[:, None, :]
    epi_madd = jnp.where(jnp.sum(epi_raw, axis=-1) == 0.0, -1e9, 0.0)[:, None, :]

    # --- input embedding projection + positional encoding (bf16 MXU, f32 acc) ---
    def embed(raw, L, w_ref, b_ref, pe_ref):
        x2 = raw.reshape(Bb * L, K).astype(jnp.bfloat16)
        e = jnp.dot(x2, w_ref[...], preferred_element_type=jnp.float32) + b_ref[...]
        return e.reshape(Bb, L, D) + pe_ref[...]            # broadcast (1,L,D)

    tcr_emb = embed(tcr_raw, Lt, wte_ref, bte_ref, tpe_ref)   # (Bb, Lt, D) f32
    epi_emb = embed(epi_raw, Le, wee_ref, bee_ref, epe_ref)   # (Bb, Le, D) f32

    # --- fused (D, 3D) QKV projections: one MXU call per input tensor ---
    # tcr rows supply Q for tcr->pep and K/V for pep->tcr;
    # epitope rows supply Q for pep->tcr and K/V for tcr->pep.
    def qkv(emb, L, w_ref, b_ref):
        y = jnp.dot(emb.reshape(Bb * L, D).astype(jnp.bfloat16), w_ref[...],
                    preferred_element_type=jnp.float32) + b_ref[...]
        y = y.reshape(Bb, L, 3 * D)
        return y[..., :D], y[..., D:2 * D], y[..., 2 * D:]

    q_t2p, k_p2t, v_p2t = qkv(tcr_emb, Lt, wtq_ref, btq_ref)
    q_p2t, k_t2p, v_t2p = qkv(epi_emb, Le, weq_ref, beq_ref)

    def mha(q, k, v, madd):
        # Per-head static lane slices (hd lanes) instead of full-width masks:
        # no mask construction, no masked full-(Bb,L,D) multiplies, no
        # full-width f32 context accumulate.  Denominator divide goes to the
        # EUP via pl.reciprocal(approx=True).
        kb = k.astype(jnp.bfloat16)
        vb = v.astype(jnp.bfloat16)
        heads = []
        for h in range(H):                       # small static unroll (num_heads)
            sl = slice(h * hd, (h + 1) * hd)
            s = jnp.einsum('bqd,bkd->bqk',
                           q[..., sl].astype(jnp.bfloat16), kb[..., sl],
                           preferred_element_type=jnp.float32)
            s = s * scale + madd
            s = s - jnp.max(s, axis=-1, keepdims=True)
            p = jnp.exp(s)
            p = p * pl.reciprocal(jnp.sum(p, axis=-1, keepdims=True), approx=True)
            heads.append(jnp.einsum('bqk,bkd->bqd',
                                    p.astype(jnp.bfloat16), vb[..., sl],
                                    preferred_element_type=jnp.float32))
        return jnp.concatenate(heads, axis=-1)   # (Bb, Lq, D)

    ctx_p2t = mha(q_p2t, k_p2t, v_p2t, tcr_madd)   # queries=epitope, keys=tcr
    ctx_t2p = mha(q_t2p, k_t2p, v_t2p, epi_madd)   # queries=tcr, keys=epitope

    def out_res_ln(ctx, emb, L, wo_ref, bo_ref, g_ref, be_ref):
        a = jnp.dot(ctx.reshape(Bb * L, D).astype(jnp.bfloat16), wo_ref[...],
                    preferred_element_type=jnp.float32) + bo_ref[...]
        y = emb.reshape(Bb * L, D) + a             # dropout == identity (eval)
        return _ln(y, g_ref[...], be_ref[...]).reshape(Bb, L, D)

    pep_out = out_res_ln(ctx_p2t, epi_emb, Le, wop_ref, bop_ref, gp_ref, bp_ref)
    tcr_out = out_res_ln(ctx_t2p, tcr_emb, Lt, wot_ref, bot_ref, gt_ref, bt_ref)

    # Concatenated slab [tcr_out | peptide_out] (== torch.cat(..., dim=1)),
    # emitted directly in bf16 (the classifier consumes bf16).
    out_ref[:, :Lt, :] = tcr_out.astype(out_ref.dtype)
    out_ref[:, Lt:, :] = pep_out.astype(out_ref.dtype)


def fused_embed_recip_attn(tcr_raw, epi_raw, params, num_heads):
    """tcr_raw: [B, Lt, 1024] f32, epi_raw: [B, Le, 1024] f32 -> bf16 [B, Lt+Le, D]."""
    B, Lt, K = tcr_raw.shape
    Le = epi_raw.shape[1]
    D = params["tcr_emb_w"].shape[1]
    ap = params["attn"]

    # cap=32 keeps double-buffered raw blocks far below v7x's 64 MiB VMEM.
    Bb = _pick_batch_block(B, (Lt + Le) * K * 4, cap=32)

    bf = lambda a: a.astype(jnp.bfloat16)
    w2 = lambda shape: pl.BlockSpec(shape, lambda i: (0, 0))       # resident 2-D
    w3 = lambda shape: pl.BlockSpec(shape, lambda i: (0, 0, 0))    # resident 3-D

    flops = (2 * B * (Lt + Le) * K * D            # input embedding projections
             + 2 * B * (Lt + Le) * D * 3 * D      # fused QKV projections
             + 8 * B * Lt * Le * D                # scores + context, both dirs
             + 2 * B * (Lt + Le) * D * D)         # output projections
    cost = pl.CostEstimate(
        flops=int(flops),
        transcendentals=int(2 * B * num_heads * Lt * Le),
        bytes_accessed=int(4 * B * (Lt + Le) * K          # raw f32 in
                           + 2 * B * (Lt + Le) * D        # bf16 out
                           + 2 * (2 * K * D + 2 * D * 3 * D + 2 * D * D)),
    )

    kernel = functools.partial(_fused_recip_attn_kernel, num_heads)
    return pl.pallas_call(
        kernel,
        out_shape=jax.ShapeDtypeStruct((B, Lt + Le, D), jnp.bfloat16),
        grid=(pl.cdiv(B, Bb),),
        in_specs=[
            pl.BlockSpec((Bb, Lt, K), lambda i: (i, 0, 0)),
            pl.BlockSpec((Bb, Le, K), lambda i: (i, 0, 0)),
            w2((K, D)), w2((1, D)), w2((K, D)), w2((1, D)),
            w3((1, Lt, D)), w3((1, Le, D)),
            w2((D, 3 * D)), w2((1, 3 * D)), w2((D, 3 * D)), w2((1, 3 * D)),
            w2((D, D)), w2((1, D)), w2((D, D)), w2((1, D)),
            w2((1, D)), w2((1, D)), w2((1, D)), w2((1, D)),
        ],
        out_specs=pl.BlockSpec((Bb, Lt + Le, D), lambda i: (i, 0, 0)),
        compiler_params=pltpu.CompilerParams(
            dimension_semantics=("parallel",),
            vmem_limit_bytes=64 * 1024 * 1024,
        ),
        cost_estimate=cost,
    )(tcr_raw, epi_raw,
      bf(params["tcr_emb_w"]), params["tcr_emb_b"],
      bf(params["epi_emb_w"]), params["epi_emb_b"],
      params["tcr_pe"][:, :Lt, :], params["epi_pe"][:, :Le, :],
      bf(ap["w_tcr_qkv"]), ap["b_tcr_qkv"],
      bf(ap["w_epi_qkv"]), ap["b_epi_qkv"],
      bf(ap["wo_p2t"]), ap["bo_p2t"],
      bf(ap["wo_t2p"]), ap["bo_t2p"],
      ap["ln_pep_g"], ap["ln_pep_b"],
      ap["ln_tcr_g"], ap["ln_tcr_b"])


# ----------------------------------------------------------------------------
# Kernel 2: classifier MLP, tiled over the batch
#   Linear -> LN -> ReLU -> [Dropout=id] -> ResidualBlock -> Linear(->1)
#   ResidualBlock: x + Linear(ReLU(LN(Linear(ReLU(LN(x))))))
# ----------------------------------------------------------------------------
def _classifier_kernel(x_ref,
                       w1_ref, b1_ref, g1_ref, be1_ref,
                       rg1_ref, rb1_ref, rw1_ref, rbi1_ref,
                       rg2_ref, rb2_ref, rw2_ref, rbi2_ref,
                       wo_ref, bo_ref, o_ref):
    xb = x_ref[...]                      # (Bb, 1, F) bf16
    Bb = xb.shape[0]
    x = xb[:, 0, :]                      # (Bb, F) bf16
    h = jnp.dot(x, w1_ref[...], preferred_element_type=jnp.float32) + b1_ref[...]
    h = _ln(h, g1_ref[...], be1_ref[...])
    h = jnp.maximum(h, 0.0)
    # ResidualBlock (bf16 operands on the MXU, f32 accumulation)
    z = _ln(h, rg1_ref[...], rb1_ref[...])
    z = jnp.maximum(z, 0.0)
    z = jnp.dot(z.astype(jnp.bfloat16), rw1_ref[...],
                preferred_element_type=jnp.float32) + rbi1_ref[...]
    z = _ln(z, rg2_ref[...], rb2_ref[...])
    z = jnp.maximum(z, 0.0)
    z = jnp.dot(z.astype(jnp.bfloat16), rw2_ref[...],
                preferred_element_type=jnp.float32) + rbi2_ref[...]
    h = h + z
    # Final (H -> 1) projection as a VPU multiply + lane reduce (N=1 matmul
    # would waste the whole MXU lane dimension).
    logit = jnp.sum(h * wo_ref[...], axis=-1, keepdims=True) + bo_ref[...]
    o_ref[...] = logit.reshape(Bb, 1, 1)


def classifier_pallas(x, cp):
    """x: [B, F] bf16 -> f32 [B]."""
    B, F = x.shape
    Hd = cp["w1"].shape[1]
    Bb = _pick_batch_block(B, F * 2, cap=1024)
    bf = lambda a: a.astype(jnp.bfloat16)
    w = lambda shape: pl.BlockSpec(shape, lambda i: (0, 0))
    x3 = x.reshape(B, 1, F)              # metadata reshape; keeps batch block of 1 legal
    out = pl.pallas_call(
        _classifier_kernel,
        out_shape=jax.ShapeDtypeStruct((B, 1, 1), jnp.float32),
        grid=(pl.cdiv(B, Bb),),
        in_specs=[
            pl.BlockSpec((Bb, 1, F), lambda i: (i, 0, 0)),
            w((F, Hd)), w((1, Hd)), w((1, Hd)), w((1, Hd)),
            w((1, Hd)), w((1, Hd)), w((Hd, Hd)), w((1, Hd)),
            w((1, Hd)), w((1, Hd)), w((Hd, Hd)), w((1, Hd)),
            w((1, Hd)), w((1, 1)),
        ],
        out_specs=pl.BlockSpec((Bb, 1, 1), lambda i: (i, 0, 0)),
        compiler_params=pltpu.CompilerParams(
            dimension_semantics=("parallel",),
            vmem_limit_bytes=32 * 1024 * 1024,
        ),
    )(x3,
      bf(cp["w1"]), cp["b1"], cp["g1"], cp["be1"],
      cp["rg1"], cp["rb1"], bf(cp["rw1"]), cp["rbi1"],
      cp["rg2"], cp["rb2"], bf(cp["rw2"]), cp["rbi2"],
      cp["wo"].reshape(1, Hd), cp["bo"])
    return out[:, 0, 0]


# ----------------------------------------------------------------------------
# Parameter init (deterministic, synthetic)
# ----------------------------------------------------------------------------
def init_params(key, *, embed_dim, num_heads, max_tcr_len, max_epi_len,
                physchem_dim, classifier_hidden_dim,
                trbv_vocab, trbj_vocab, mhc_vocab):
    D = embed_dim
    ks = iter(jax.random.split(key, 64))

    def dense(fan_in, fan_out):
        return jax.random.normal(next(ks), (fan_in, fan_out), jnp.float32) * (
            1.0 / math.sqrt(fan_in))

    def embedding(vocab):
        w = jax.random.normal(next(ks), (vocab, D), jnp.float32) * 0.1
        # padding_idx=-1 -> last row zeroed (PyTorch zeroes the padding row)
        return w.at[vocab - 1].set(0.0)

    Hc = classifier_hidden_dim
    F = D * (max_tcr_len + max_epi_len) + 2 * (2 * physchem_dim) + 3 * D

    attn = {
        # Fused per-input QKV weights:
        #   tcr rows  -> [Wq_t2p | Wk_p2t | Wv_p2t]
        #   epi rows  -> [Wq_p2t | Wk_t2p | Wv_t2p]
        # (real checkpoints must be re-split/transposed into this layout)
        "w_tcr_qkv": dense(D, 3 * D),
        "b_tcr_qkv": jnp.zeros((1, 3 * D), jnp.float32),
        "w_epi_qkv": dense(D, 3 * D),
        "b_epi_qkv": jnp.zeros((1, 3 * D), jnp.float32),
        "wo_p2t": dense(D, D), "bo_p2t": jnp.zeros((1, D), jnp.float32),
        "wo_t2p": dense(D, D), "bo_t2p": jnp.zeros((1, D), jnp.float32),
        "ln_pep_g": jnp.ones((1, D), jnp.float32),
        "ln_pep_b": jnp.zeros((1, D), jnp.float32),
        "ln_tcr_g": jnp.ones((1, D), jnp.float32),
        "ln_tcr_b": jnp.zeros((1, D), jnp.float32),
    }

    params = {
        "tcr_emb_w": dense(1024, D), "tcr_emb_b": jnp.zeros((1, D), jnp.float32),
        "epi_emb_w": dense(1024, D), "epi_emb_b": jnp.zeros((1, D), jnp.float32),
        "tcr_pe": jax.random.normal(next(ks), (1, max_tcr_len, D), jnp.float32) * 0.1,
        "epi_pe": jax.random.normal(next(ks), (1, max_epi_len, D), jnp.float32) * 0.1,
        "attn": attn,
        "trbv_emb": embedding(trbv_vocab),
        "trbj_emb": embedding(trbj_vocab),
        "mhc_emb": embedding(mhc_vocab),
        "clf": {
            "w1": dense(F, Hc), "b1": jnp.zeros((1, Hc), jnp.float32),
            "g1": jnp.ones((1, Hc), jnp.float32), "be1": jnp.zeros((1, Hc), jnp.float32),
            "rg1": jnp.ones((1, Hc), jnp.float32), "rb1": jnp.zeros((1, Hc), jnp.float32),
            "rw1": dense(Hc, Hc), "rbi1": jnp.zeros((1, Hc), jnp.float32),
            "rg2": jnp.ones((1, Hc), jnp.float32), "rb2": jnp.zeros((1, Hc), jnp.float32),
            "rw2": dense(Hc, Hc), "rbi2": jnp.zeros((1, Hc), jnp.float32),
            "wo": dense(Hc, 1), "bo": jnp.zeros((1, 1), jnp.float32),
        },
        "classifier_input_dim": F,
    }
    return params


# ----------------------------------------------------------------------------
# Full forward pass (glue in JAX, heavy compute in Pallas kernels)
# ----------------------------------------------------------------------------
def forward(params, tcr, epitope, tcr_physchem, epi_physchem, trbv, trbj, mhc,
            *, num_heads, physchem_dim):
    B = tcr.shape[0]

    # --- fused embedding + PE + mask + reciprocal attention + residual + LN ---
    combined = fused_embed_recip_attn(tcr, epitope, params, num_heads)  # [B, Lt+Le, D] bf16
    flattened = combined.reshape(B, -1)        # row-major flatten: free bitcast

    # --- periodic (sin/cos) physchem embeddings (tiny elementwise; plain JAX) ---
    div_term = jnp.exp(jnp.arange(physchem_dim, dtype=jnp.float32)
                       * -(math.log(10000.0) / physchem_dim))
    tcr_pc = jnp.concatenate([jnp.sin(tcr_physchem * div_term),
                              jnp.cos(tcr_physchem * div_term)], axis=-1)
    epi_pc = jnp.concatenate([jnp.sin(epi_physchem * div_term),
                              jnp.cos(epi_physchem * div_term)], axis=-1)

    # --- categorical embeddings (gather; plain JAX glue) ---
    trbv_emb = params["trbv_emb"][trbv]
    trbj_emb = params["trbj_emb"][trbj]
    mhc_emb = params["mhc_emb"][mhc]

    # Classifier consumes bf16 directly (attention already emitted bf16; the
    # remaining feature tensors are tiny) -> no full-tensor convert pass.
    full_input = jnp.concatenate(
        [flattened,
         tcr_pc.astype(jnp.bfloat16), epi_pc.astype(jnp.bfloat16),
         trbv_emb.astype(jnp.bfloat16), trbj_emb.astype(jnp.bfloat16),
         mhc_emb.astype(jnp.bfloat16)], axis=1)

    # --- classifier MLP (single Pallas kernel, tiled over batch) ---
    return classifier_pallas(full_input, params["clf"])   # [B]  (== .squeeze(1))


# ----------------------------------------------------------------------------
# Demo
# ----------------------------------------------------------------------------
if __name__ == "__main__":
    B = 2
    MAX_TCR_LEN = 8
    MAX_EPI_LEN = 8
    EMBED_DIM = 32
    NUM_HEADS = 4
    PHYSCHEM_DIM = 10
    CLF_HIDDEN = 64
    TRBV_VOCAB, TRBJ_VOCAB, MHC_VOCAB = 5, 5, 7

    key = jax.random.PRNGKey(0)
    kp, kx = jax.random.split(key)
    params = init_params(
        kp, embed_dim=EMBED_DIM, num_heads=NUM_HEADS,
        max_tcr_len=MAX_TCR_LEN, max_epi_len=MAX_EPI_LEN,
        physchem_dim=PHYSCHEM_DIM, classifier_hidden_dim=CLF_HIDDEN,
        trbv_vocab=TRBV_VOCAB, trbj_vocab=TRBJ_VOCAB, mhc_vocab=MHC_VOCAB)

    k1, k2, k3, k4, k5, k6, k7 = jax.random.split(kx, 7)
    tcr = jax.random.normal(k1, (B, MAX_TCR_LEN, 1024), jnp.float32)
    epitope = jax.random.normal(k2, (B, MAX_EPI_LEN, 1024), jnp.float32)
    tcr_physchem = jax.random.normal(k3, (B, PHYSCHEM_DIM), jnp.float32)
    epi_physchem = jax.random.normal(k4, (B, PHYSCHEM_DIM), jnp.float32)
    trbv = jax.random.randint(k5, (B,), 0, TRBV_VOCAB)
    trbj = jax.random.randint(k6, (B,), 0, TRBJ_VOCAB)
    mhc = jax.random.randint(k7, (B,), 0, MHC_VOCAB)

    fwd = jax.jit(functools.partial(forward, num_heads=NUM_HEADS,
                                    physchem_dim=PHYSCHEM_DIM))
    out = fwd(params, tcr, epitope, tcr_physchem, epi_physchem, trbv, trbj, mhc)
    out = jax.block_until_ready(out)
    assert out.shape == (B,)
    assert bool(jnp.all(jnp.isfinite(out)))
    print("KERNEL_OK")
</pallas_src>

<mosaic_0001>
module attributes {stable_mosaic.version = 11 : i64} {
  func.func @_fused_recip_attn_kernel(%arg0: i32, %arg1: memref<1x8x1024xf32, #tpu.memory_space<vmem>>, %arg2: memref<1x8x1024xf32, #tpu.memory_space<vmem>>, %arg3: memref<1024x32xbf16, #tpu.memory_space<vmem>>, %arg4: memref<1x32xf32, #tpu.memory_space<vmem>>, %arg5: memref<1024x32xbf16, #tpu.memory_space<vmem>>, %arg6: memref<1x32xf32, #tpu.memory_space<vmem>>, %arg7: memref<1x8x32xf32, #tpu.memory_space<vmem>>, %arg8: memref<1x8x32xf32, #tpu.memory_space<vmem>>, %arg9: memref<32x96xbf16, #tpu.memory_space<vmem>>, %arg10: memref<1x96xf32, #tpu.memory_space<vmem>>, %arg11: memref<32x96xbf16, #tpu.memory_space<vmem>>, %arg12: memref<1x96xf32, #tpu.memory_space<vmem>>, %arg13: memref<32x32xbf16, #tpu.memory_space<vmem>>, %arg14: memref<1x32xf32, #tpu.memory_space<vmem>>, %arg15: memref<32x32xbf16, #tpu.memory_space<vmem>>, %arg16: memref<1x32xf32, #tpu.memory_space<vmem>>, %arg17: memref<1x32xf32, #tpu.memory_space<vmem>>, %arg18: memref<1x32xf32, #tpu.memory_space<vmem>>, %arg19: memref<1x32xf32, #tpu.memory_space<vmem>>, %arg20: memref<1x32xf32, #tpu.memory_space<vmem>>, %arg21: memref<1x16x32xbf16, #tpu.memory_space<vmem>>) attributes {dimension_semantics = [#tpu.dimension_semantics<parallel>], iteration_bounds = array<i64: 2>, scalar_prefetch = 0 : i64, scratch_operands = 0 : i64, tpu.core_type = #tpu.core_type<tc>, window_params = [{transform_indices = @transform_0, window_bounds = array<i64: 1, 8, 1024>}, {transform_indices = @transform_1, window_bounds = array<i64: 1, 8, 1024>}, {pipeline_mode = #tpu.pipeline_mode<synchronous>, transform_indices = @transform_2, window_bounds = array<i64: 1024, 32>}, {pipeline_mode = #tpu.pipeline_mode<synchronous>, transform_indices = @transform_3, window_bounds = array<i64: 1, 32>}, {pipeline_mode = #tpu.pipeline_mode<synchronous>, transform_indices = @transform_4, window_bounds = array<i64: 1024, 32>}, {pipeline_mode = #tpu.pipeline_mode<synchronous>, transform_indices = @transform_5, window_bounds = array<i64: 1, 32>}, {pipeline_mode = #tpu.pipeline_mode<synchronous>, transform_indices = @transform_6, window_bounds = array<i64: 1, 8, 32>}, {pipeline_mode = #tpu.pipeline_mode<synchronous>, transform_indices = @transform_7, window_bounds = array<i64: 1, 8, 32>}, {pipeline_mode = #tpu.pipeline_mode<synchronous>, transform_indices = @transform_8, window_bounds = array<i64: 32, 96>}, {pipeline_mode = #tpu.pipeline_mode<synchronous>, transform_indices = @transform_9, window_bounds = array<i64: 1, 96>}, {pipeline_mode = #tpu.pipeline_mode<synchronous>, transform_indices = @transform_10, window_bounds = array<i64: 32, 96>}, {pipeline_mode = #tpu.pipeline_mode<synchronous>, transform_indices = @transform_11, window_bounds = array<i64: 1, 96>}, {pipeline_mode = #tpu.pipeline_mode<synchronous>, transform_indices = @transform_12, window_bounds = array<i64: 32, 32>}, {pipeline_mode = #tpu.pipeline_mode<synchronous>, transform_indices = @transform_13, window_bounds = array<i64: 1, 32>}, {pipeline_mode = #tpu.pipeline_mode<synchronous>, transform_indices = @transform_14, window_bounds = array<i64: 32, 32>}, {pipeline_mode = #tpu.pipeline_mode<synchronous>, transform_indices = @transform_15, window_bounds = array<i64: 1, 32>}, {pipeline_mode = #tpu.pipeline_mode<synchronous>, transform_indices = @transform_16, window_bounds = array<i64: 1, 32>}, {pipeline_mode = #tpu.pipeline_mode<synchronous>, transform_indices = @transform_17, window_bounds = array<i64: 1, 32>}, {pipeline_mode = #tpu.pipeline_mode<synchronous>, transform_indices = @transform_18, window_bounds = array<i64: 1, 32>}, {pipeline_mode = #tpu.pipeline_mode<synchronous>, transform_indices = @transform_19, window_bounds = array<i64: 1, 32>}, {transform_indices = @transform_20, window_bounds = array<i64: 1, 16, 32>}]} {
    %c0 = arith.constant 0 : index
    %c0_0 = arith.constant 0 : index
    %c0_1 = arith.constant 0 : index
    %0 = vector.load %arg1[%c0, %c0_0, %c0_1] : memref<1x8x1024xf32, #tpu.memory_space<vmem>>, vector<1x8x1024xf32>
    %c0_2 = arith.constant 0 : index
    %c0_3 = arith.constant 0 : index
    %c0_4 = arith.constant 0 : index
    %1 = vector.load %arg2[%c0_2, %c0_3, %c0_4] : memref<1x8x1024xf32, #tpu.memory_space<vmem>>, vector<1x8x1024xf32>
    %cst = arith.constant dense<0.000000e+00> : vector<1x8xf32>
    %2 = vector.multi_reduction <add>, %0, %cst [2] : vector<1x8x1024xf32> to vector<1x8xf32>
    %cst_5 = arith.constant 0.000000e+00 : f32
    %3 = vector.broadcast %cst_5 : f32 to vector<1x8xf32>
    %4 = arith.cmpf oeq, %2, %3 : vector<1x8xf32>
    %cst_6 = arith.constant -1.000000e+09 : f32
    %cst_7 = arith.constant 0.000000e+00 : f32
    %5 = vector.broadcast %cst_6 : f32 to vector<1x8xf32>
    %6 = vector.broadcast %cst_7 : f32 to vector<1x8xf32>
    %7 = arith.select %4, %5, %6 : vector<1x8xi1>, vector<1x8xf32>
    %8 = vector.shape_cast %7 : vector<1x8xf32> to vector<1x1x8xf32>
    %cst_8 = arith.constant dense<0.000000e+00> : vector<1x8xf32>
    %9 = vector.multi_reduction <add>, %1, %cst_8 [2] : vector<1x8x1024xf32> to vector<1x8xf32>
    %cst_9 = arith.constant 0.000000e+00 : f32
    %10 = vector.broadcast %cst_9 : f32 to vector<1x8xf32>
    %11 = arith.cmpf oeq, %9, %10 : vector<1x8xf32>
    %cst_10 = arith.constant -1.000000e+09 : f32
    %cst_11 = arith.constant 0.000000e+00 : f32
    %12 = vector.broadcast %cst_10 : f32 to vector<1x8xf32>
    %13 = vector.broadcast %cst_11 : f32 to vector<1x8xf32>
    %14 = arith.select %11, %12, %13 : vector<1x8xi1>, vector<1x8xf32>
    %15 = vector.shape_cast %14 : vector<1x8xf32> to vector<1x1x8xf32>
    %16 = vector.shape_cast %0 : vector<1x8x1024xf32> to vector<8x1024xf32>
    %17 = arith.truncf %16 : vector<8x1024xf32> to vector<8x1024xbf16>
    %c0_12 = arith.constant 0 : index
    %c0_13 = arith.constant 0 : index
    %18 = vector.load %arg3[%c0_12, %c0_13] : memref<1024x32xbf16, #tpu.memory_space<vmem>>, vector<1024x32xbf16>
    %cst_14 = arith.constant dense<0.000000e+00> : vector<8x32xf32>
    %19 = tpu.matmul %17, %18, %cst_14 {dimension_numbers = #tpu.dot_dimension_numbers<[1], [0], [0], [1], [0, 0, 1, 1], [], []>} : vector<8x1024xbf16>, vector<1024x32xbf16>, vector<8x32xf32> -> vector<8x32xf32>
    %c0_15 = arith.constant 0 : index
    %c0_16 = arith.constant 0 : index
    %20 = vector.load %arg4[%c0_15, %c0_16] : memref<1x32xf32, #tpu.memory_space<vmem>>, vector<1x32xf32>
    %21 = vector.broadcast %20 : vector<1x32xf32> to vector<8x32xf32>
    %22 = arith.addf %19, %21 : vector<8x32xf32>
    %23 = vector.shape_cast %22 : vector<8x32xf32> to vector<1x8x32xf32>
    %c0_17 = arith.constant 0 : index
    %c0_18 = arith.constant 0 : index
    %c0_19 = arith.constant 0 : index
    %24 = vector.load %arg7[%c0_17, %c0_18, %c0_19] : memref<1x8x32xf32, #tpu.memory_space<vmem>>, vector<1x8x32xf32>
    %25 = arith.addf %23, %24 : vector<1x8x32xf32>
    %26 = vector.shape_cast %1 : vector<1x8x1024xf32> to vector<8x1024xf32>
    %27 = arith.truncf %26 : vector<8x1024xf32> to vector<8x1024xbf16>
    %c0_20 = arith.constant 0 : index
    %c0_21 = arith.constant 0 : index
    %28 = vector.load %arg5[%c0_20, %c0_21] : memref<1024x32xbf16, #tpu.memory_space<vmem>>, vector<1024x32xbf16>
    %cst_22 = arith.constant dense<0.000000e+00> : vector<8x32xf32>
    %29 = tpu.matmul %27, %28, %cst_22 {dimension_numbers = #tpu.dot_dimension_numbers<[1], [0], [0], [1], [0, 0, 1, 1], [], []>} : vector<8x1024xbf16>, vector<1024x32xbf16>, vector<8x32xf32> -> vector<8x32xf32>
    %c0_23 = arith.constant 0 : index
    %c0_24 = arith.constant 0 : index
    %30 = vector.load %arg6[%c0_23, %c0_24] : memref<1x32xf32, #tpu.memory_space<vmem>>, vector<1x32xf32>
    %31 = vector.broadcast %30 : vector<1x32xf32> to vector<8x32xf32>
    %32 = arith.addf %29, %31 : vector<8x32xf32>
    %33 = vector.shape_cast %32 : vector<8x32xf32> to vector<1x8x32xf32>
    %c0_25 = arith.constant 0 : index
    %c0_26 = arith.constant 0 : index
    %c0_27 = arith.constant 0 : index
    %34 = vector.load %arg8[%c0_25, %c0_26, %c0_27] : memref<1x8x32xf32, #tpu.memory_space<vmem>>, vector<1x8x32xf32>
    %35 = arith.addf %33, %34 : vector<1x8x32xf32>
    %36 = vector.shape_cast %25 : vector<1x8x32xf32> to vector<8x32xf32>
    %37 = arith.truncf %36 : vector<8x32xf32> to vector<8x32xbf16>
    %c0_28 = arith.constant 0 : index
    %c0_29 = arith.constant 0 : index
    %38 = vector.load %arg9[%c0_28, %c0_29] : memref<32x96xbf16, #tpu.memory_space<vmem>>, vector<32x96xbf16>
    %cst_30 = arith.constant dense<0.000000e+00> : vector<8x96xf32>
    %39 = tpu.matmul %37, %38, %cst_30 {dimension_numbers = #tpu.dot_dimension_numbers<[1], [0], [0], [1], [0, 0, 1, 1], [], []>} : vector<8x32xbf16>, vector<32x96xbf16>, vector<8x96xf32> -> vector<8x96xf32>
    %c0_31 = arith.constant 0 : index
    %c0_32 = arith.constant 0 : index
    %40 = vector.load %arg10[%c0_31, %c0_32] : memref<1x96xf32, #tpu.memory_space<vmem>>, vector<1x96xf32>
    %41 = vector.broadcast %40 : vector<1x96xf32> to vector<8x96xf32>
    %42 = arith.addf %39, %41 : vector<8x96xf32>
    %43 = vector.shape_cast %42 : vector<8x96xf32> to vector<1x8x96xf32>
    %44 = vector.extract_strided_slice %43 {offsets = [0, 0, 0], sizes = [1, 8, 32], strides = [1, 1, 1]} : vector<1x8x96xf32> to vector<1x8x32xf32>
    %45 = vector.extract_strided_slice %43 {offsets = [0, 0, 32], sizes = [1, 8, 32], strides = [1, 1, 1]} : vector<1x8x96xf32> to vector<1x8x32xf32>
    %46 = vector.extract_strided_slice %43 {offsets = [0, 0, 64], sizes = [1, 8, 32], strides = [1, 1, 1]} : vector<1x8x96xf32> to vector<1x8x32xf32>
    %47 = vector.shape_cast %35 : vector<1x8x32xf32> to vector<8x32xf32>
    %48 = arith.truncf %47 : vector<8x32xf32> to vector<8x32xbf16>
    %c0_33 = arith.constant 0 : index
    %c0_34 = arith.constant 0 : index
    %49 = vector.load %arg11[%c0_33, %c0_34] : memref<32x96xbf16, #tpu.memory_space<vmem>>, vector<32x96xbf16>
    %cst_35 = arith.constant dense<0.000000e+00> : vector<8x96xf32>
    %50 = tpu.matmul %48, %49, %cst_35 {dimension_numbers = #tpu.dot_dimension_numbers<[1], [0], [0], [1], [0, 0, 1, 1], [], []>} : vector<8x32xbf16>, vector<32x96xbf16>, vector<8x96xf32> -> vector<8x96xf32>
    %c0_36 = arith.constant 0 : index
    %c0_37 = arith.constant 0 : index
    %51 = vector.load %arg12[%c0_36, %c0_37] : memref<1x96xf32, #tpu.memory_space<vmem>>, vector<1x96xf32>
    %52 = vector.broadcast %51 : vector<1x96xf32> to vector<8x96xf32>
    %53 = arith.addf %50, %52 : vector<8x96xf32>
    %54 = vector.shape_cast %53 : vector<8x96xf32> to vector<1x8x96xf32>
    %55 = vector.extract_strided_slice %54 {offsets = [0, 0, 0], sizes = [1, 8, 32], strides = [1, 1, 1]} : vector<1x8x96xf32> to vector<1x8x32xf32>
    %56 = vector.extract_strided_slice %54 {offsets = [0, 0, 32], sizes = [1, 8, 32], strides = [1, 1, 1]} : vector<1x8x96xf32> to vector<1x8x32xf32>
    %57 = vector.extract_strided_slice %54 {offsets = [0, 0, 64], sizes = [1, 8, 32], strides = [1, 1, 1]} : vector<1x8x96xf32> to vector<1x8x32xf32>
    %58 = arith.truncf %45 : vector<1x8x32xf32> to vector<1x8x32xbf16>
    %59 = arith.truncf %46 : vector<1x8x32xf32> to vector<1x8x32xbf16>
    %60 = vector.extract_strided_slice %55 {offsets = [0, 0, 0], sizes = [1, 8, 8], strides = [1, 1, 1]} : vector<1x8x32xf32> to vector<1x8x8xf32>
    %61 = arith.truncf %60 : vector<1x8x8xf32> to vector<1x8x8xbf16>
    %62 = vector.extract_strided_slice %58 {offsets = [0, 0, 0], sizes = [1, 8, 8], strides = [1, 1, 1]} : vector<1x8x32xbf16> to vector<1x8x8xbf16>
    "tpu.trace_start"() <{level = 10 : i32, message = "bqd,bkd->bqk"}> : () -> ()
    %cst_38 = arith.constant dense<0.000000e+00> : vector<1x8x8xf32>
    %63 = tpu.matmul %61, %62, %cst_38 {dimension_numbers = #tpu.dot_dimension_numbers<[2], [2], [1], [1], [0, 0, 0, 1, 1, 1], [0], [0]>} : vector<1x8x8xbf16>, vector<1x8x8xbf16>, vector<1x8x8xf32> -> vector<1x8x8xf32>
    "tpu.trace_stop"() : () -> ()
    %cst_39 = arith.constant 0.353553385 : f32
    %64 = vector.broadcast %cst_39 : f32 to vector<1x8x8xf32>
    %65 = arith.mulf %63, %64 : vector<1x8x8xf32>
    %66 = vector.broadcast %8 : vector<1x1x8xf32> to vector<1x8x8xf32>
    %67 = arith.addf %65, %66 : vector<1x8x8xf32>
    %cst_40 = arith.constant dense<0xFF800000> : vector<1x8xf32>
    %68 = vector.multi_reduction <maximumf>, %67, %cst_40 [2] : vector<1x8x8xf32> to vector<1x8xf32>
    %69 = vector.shape_cast %68 : vector<1x8xf32> to vector<1x8x1xf32>
    %70 = vector.broadcast %69 : vector<1x8x1xf32> to vector<1x8x8xf32>
    %71 = arith.subf %67, %70 : vector<1x8x8xf32>
    %72 = math.exp %71 : vector<1x8x8xf32>
    %cst_41 = arith.constant dense<0.000000e+00> : vector<1x8xf32>
    %73 = vector.multi_reduction <add>, %72, %cst_41 [2] : vector<1x8x8xf32> to vector<1x8xf32>
    %74 = vector.shape_cast %73 : vector<1x8xf32> to vector<1x8x1xf32>
    %75 = tpu.reciprocal %74 {approx = true} : vector<1x8x1xf32> -> vector<1x8x1xf32>
    %76 = vector.broadcast %75 : vector<1x8x1xf32> to vector<1x8x8xf32>
    %77 = arith.mulf %72, %76 : vector<1x8x8xf32>
    %78 = arith.truncf %77 : vector<1x8x8xf32> to vector<1x8x8xbf16>
    %79 = vector.extract_strided_slice %59 {offsets = [0, 0, 0], sizes = [1, 8, 8], strides = [1, 1, 1]} : vector<1x8x32xbf16> to vector<1x8x8xbf16>
    "tpu.trace_start"() <{level = 10 : i32, message = "bqk,bkd->bqd"}> : () -> ()
    %cst_42 = arith.constant dense<0.000000e+00> : vector<1x8x8xf32>
    %80 = tpu.matmul %78, %79, %cst_42 {dimension_numbers = #tpu.dot_dimension_numbers<[2], [1], [1], [2], [0, 0, 0, 1, 1, 2], [0], [0]>} : vector<1x8x8xbf16>, vector<1x8x8xbf16>, vector<1x8x8xf32> -> vector<1x8x8xf32>
    "tpu.trace_stop"() : () -> ()
    %81 = vector.extract_strided_slice %55 {offsets = [0, 0, 8], sizes = [1, 8, 8], strides = [1, 1, 1]} : vector<1x8x32xf32> to vector<1x8x8xf32>
    %82 = arith.truncf %81 : vector<1x8x8xf32> to vector<1x8x8xbf16>
    %83 = vector.extract_strided_slice %58 {offsets = [0, 0, 8], sizes = [1, 8, 8], strides = [1, 1, 1]} : vector<1x8x32xbf16> to vector<1x8x8xbf16>
    "tpu.trace_start"() <{level = 10 : i32, message = "bqd,bkd->bqk"}> : () -> ()
    %cst_43 = arith.constant dense<0.000000e+00> : vector<1x8x8xf32>
    %84 = tpu.matmul %82, %83, %cst_43 {dimension_numbers = #tpu.dot_dimension_numbers<[2], [2], [1], [1], [0, 0, 0, 1, 1, 1], [0], [0]>} : vector<1x8x8xbf16>, vector<1x8x8xbf16>, vector<1x8x8xf32> -> vector<1x8x8xf32>
    "tpu.trace_stop"() : () -> ()
    %cst_44 = arith.constant 0.353553385 : f32
    %85 = vector.broadcast %cst_44 : f32 to vector<1x8x8xf32>
    %86 = arith.mulf %84, %85 : vector<1x8x8xf32>
    %87 = vector.broadcast %8 : vector<1x1x8xf32> to vector<1x8x8xf32>
    %88 = arith.addf %86, %87 : vector<1x8x8xf32>
    %cst_45 = arith.constant dense<0xFF800000> : vector<1x8xf32>
    %89 = vector.multi_reduction <maximumf>, %88, %cst_45 [2] : vector<1x8x8xf32> to vector<1x8xf32>
    %90 = vector.shape_cast %89 : vector<1x8xf32> to vector<1x8x1xf32>
    %91 = vector.broadcast %90 : vector<1x8x1xf32> to vector<1x8x8xf32>
    %92 = arith.subf %88, %91 : vector<1x8x8xf32>
    %93 = math.exp %92 : vector<1x8x8xf32>
    %cst_46 = arith.constant dense<0.000000e+00> : vector<1x8xf32>
    %94 = vector.multi_reduction <add>, %93, %cst_46 [2] : vector<1x8x8xf32> to vector<1x8xf32>
    %95 = vector.shape_cast %94 : vector<1x8xf32> to vector<1x8x1xf32>
    %96 = tpu.reciprocal %95 {approx = true} : vector<1x8x1xf32> -> vector<1x8x1xf32>
    %97 = vector.broadcast %96 : vector<1x8x1xf32> to vector<1x8x8xf32>
    %98 = arith.mulf %93, %97 : vector<1x8x8xf32>
    %99 = arith.truncf %98 : vector<1x8x8xf32> to vector<1x8x8xbf16>
    %100 = vector.extract_strided_slice %59 {offsets = [0, 0, 8], sizes = [1, 8, 8], strides = [1, 1, 1]} : vector<1x8x32xbf16> to vector<1x8x8xbf16>
    "tpu.trace_start"() <{level = 10 : i32, message = "bqk,bkd->bqd"}> : () -> ()
    %cst_47 = arith.constant dense<0.000000e+00> : vector<1x8x8xf32>
    %101 = tpu.matmul %99, %100, %cst_47 {dimension_numbers = #tpu.dot_dimension_numbers<[2], [1], [1], [2], [0, 0, 0, 1, 1, 2], [0], [0]>} : vector<1x8x8xbf16>, vector<1x8x8xbf16>, vector<1x8x8xf32> -> vector<1x8x8xf32>
    "tpu.trace_stop"() : () -> ()
    %102 = vector.extract_strided_slice %55 {offsets = [0, 0, 16], sizes = [1, 8, 8], strides = [1, 1, 1]} : vector<1x8x32xf32> to vector<1x8x8xf32>
    %103 = arith.truncf %102 : vector<1x8x8xf32> to vector<1x8x8xbf16>
    %104 = vector.extract_strided_slice %58 {offsets = [0, 0, 16], sizes = [1, 8, 8], strides = [1, 1, 1]} : vector<1x8x32xbf16> to vector<1x8x8xbf16>
    "tpu.trace_start"() <{level = 10 : i32, message = "bqd,bkd->bqk"}> : () -> ()
    %cst_48 = arith.constant dense<0.000000e+00> : vector<1x8x8xf32>
    %105 = tpu.matmul %103, %104, %cst_48 {dimension_numbers = #tpu.dot_dimension_numbers<[2], [2], [1], [1], [0, 0, 0, 1, 1, 1], [0], [0]>} : vector<1x8x8xbf16>, vector<1x8x8xbf16>, vector<1x8x8xf32> -> vector<1x8x8xf32>
    "tpu.trace_stop"() : () -> ()
    %cst_49 = arith.constant 0.353553385 : f32
    %106 = vector.broadcast %cst_49 : f32 to vector<1x8x8xf32>
    %107 = arith.mulf %105, %106 : vector<1x8x8xf32>
    %108 = vector.broadcast %8 : vector<1x1x8xf32> to vector<1x8x8xf32>
    %109 = arith.addf %107, %108 : vector<1x8x8xf32>
    %cst_50 = arith.constant dense<0xFF800000> : vector<1x8xf32>
    %110 = vector.multi_reduction <maximumf>, %109, %cst_50 [2] : vector<1x8x8xf32> to vector<1x8xf32>
    %111 = vector.shape_cast %110 : vector<1x8xf32> to vector<1x8x1xf32>
    %112 = vector.broadcast %111 : vector<1x8x1xf32> to vector<1x8x8xf32>
    %113 = arith.subf %109, %112 : vector<1x8x8xf32>
    %114 = math.exp %113 : vector<1x8x8xf32>
    %cst_51 = arith.constant dense<0.000000e+00> : vector<1x8xf32>
    %115 = vector.multi_reduction <add>, %114, %cst_51 [2] : vector<1x8x8xf32> to vector<1x8xf32>
    %116 = vector.shape_cast %115 : vector<1x8xf32> to vector<1x8x1xf32>
    %117 = tpu.reciprocal %116 {approx = true} : vector<1x8x1xf32> -> vector<1x8x1xf32>
    %118 = vector.broadcast %117 : vector<1x8x1xf32> to vector<1x8x8xf32>
    %119 = arith.mulf %114, %118 : vector<1x8x8xf32>
    %120 = arith.truncf %119 : vector<1x8x8xf32> to vector<1x8x8xbf16>
    %121 = vector.extract_strided_slice %59 {offsets = [0, 0, 16], sizes = [1, 8, 8], strides = [1, 1, 1]} : vector<1x8x32xbf16> to vector<1x8x8xbf16>
    "tpu.trace_start"() <{level = 10 : i32, message = "bqk,bkd->bqd"}> : () -> ()
    %cst_52 = arith.constant dense<0.000000e+00> : vector<1x8x8xf32>
    %122 = tpu.matmul %120, %121, %cst_52 {dimension_numbers = #tpu.dot_dimension_numbers<[2], [1], [1], [2], [0, 0, 0, 1, 1, 2], [0], [0]>} : vector<1x8x8xbf16>, vector<1x8x8xbf16>, vector<1x8x8xf32> -> vector<1x8x8xf32>
    "tpu.trace_stop"() : () -> ()
    %123 = vector.extract_strided_slice %55 {offsets = [0, 0, 24], sizes = [1, 8, 8], strides = [1, 1, 1]} : vector<1x8x32xf32> to vector<1x8x8xf32>
    %124 = arith.truncf %123 : vector<1x8x8xf32> to vector<1x8x8xbf16>
    %125 = vector.extract_strided_slice %58 {offsets = [0, 0, 24], sizes = [1, 8, 8], strides = [1, 1, 1]} : vector<1x8x32xbf16> to vector<1x8x8xbf16>
    "tpu.trace_start"() <{level = 10 : i32, message = "bqd,bkd->bqk"}> : () -> ()
    %cst_53 = arith.constant dense<0.000000e+00> : vector<1x8x8xf32>
    %126 = tpu.matmul %124, %125, %cst_53 {dimension_numbers = #tpu.dot_dimension_numbers<[2], [2], [1], [1], [0, 0, 0, 1, 1, 1], [0], [0]>} : vector<1x8x8xbf16>, vector<1x8x8xbf16>, vector<1x8x8xf32> -> vector<1x8x8xf32>
    "tpu.trace_stop"() : () -> ()
    %cst_54 = arith.constant 0.353553385 : f32
    %127 = vector.broadcast %cst_54 : f32 to vector<1x8x8xf32>
    %128 = arith.mulf %126, %127 : vector<1x8x8xf32>
    %129 = vector.broadcast %8 : vector<1x1x8xf32> to vector<1x8x8xf32>
    %130 = arith.addf %128, %129 : vector<1x8x8xf32>
    %cst_55 = arith.constant dense<0xFF800000> : vector<1x8xf32>
    %131 = vector.multi_reduction <maximumf>, %130, %cst_55 [2] : vector<1x8x8xf32> to vector<1x8xf32>
    %132 = vector.shape_cast %131 : vector<1x8xf32> to vector<1x8x1xf32>
    %133 = vector.broadcast %132 : vector<1x8x1xf32> to vector<1x8x8xf32>
    %134 = arith.subf %130, %133 : vector<1x8x8xf32>
    %135 = math.exp %134 : vector<1x8x8xf32>
    %cst_56 = arith.constant dense<0.000000e+00> : vector<1x8xf32>
    %136 = vector.multi_reduction <add>, %135, %cst_56 [2] : vector<1x8x8xf32> to vector<1x8xf32>
    %137 = vector.shape_cast %136 : vector<1x8xf32> to vector<1x8x1xf32>
    %138 = tpu.reciprocal %137 {approx = true} : vector<1x8x1xf32> -> vector<1x8x1xf32>
    %139 = vector.broadcast %138 : vector<1x8x1xf32> to vector<1x8x8xf32>
    %140 = arith.mulf %135, %139 : vector<1x8x8xf32>
    %141 = arith.truncf %140 : vector<1x8x8xf32> to vector<1x8x8xbf16>
    %142 = vector.extract_strided_slice %59 {offsets = [0, 0, 24], sizes = [1, 8, 8], strides = [1, 1, 1]} : vector<1x8x32xbf16> to vector<1x8x8xbf16>
    "tpu.trace_start"() <{level = 10 : i32, message = "bqk,bkd->bqd"}> : () -> ()
    %cst_57 = arith.constant dense<0.000000e+00> : vector<1x8x8xf32>
    %143 = tpu.matmul %141, %142, %cst_57 {dimension_numbers = #tpu.dot_dimension_numbers<[2], [1], [1], [2], [0, 0, 0, 1, 1, 2], [0], [0]>} : vector<1x8x8xbf16>, vector<1x8x8xbf16>, vector<1x8x8xf32> -> vector<1x8x8xf32>
    "tpu.trace_stop"() : () -> ()
    %144 = tpu.concatenate %80, %101, %122, %143 in 2 : vector<1x8x8xf32>, vector<1x8x8xf32>, vector<1x8x8xf32>, vector<1x8x8xf32> -> vector<1x8x32xf32>
    %145 = arith.truncf %56 : vector<1x8x32xf32> to vector<1x8x32xbf16>
    %146 = arith.truncf %57 : vector<1x8x32xf32> to vector<1x8x32xbf16>
    %147 = vector.extract_strided_slice %44 {offsets = [0, 0, 0], sizes = [1, 8, 8], strides = [1, 1, 1]} : vector<1x8x32xf32> to vector<1x8x8xf32>
    %148 = arith.truncf %147 : vector<1x8x8xf32> to vector<1x8x8xbf16>
    %149 = vector.extract_strided_slice %145 {offsets = [0, 0, 0], sizes = [1, 8, 8], strides = [1, 1, 1]} : vector<1x8x32xbf16> to vector<1x8x8xbf16>
    "tpu.trace_start"() <{level = 10 : i32, message = "bqd,bkd->bqk"}> : () -> ()
    %cst_58 = arith.constant dense<0.000000e+00> : vector<1x8x8xf32>
    %150 = tpu.matmul %148, %149, %cst_58 {dimension_numbers = #tpu.dot_dimension_numbers<[2], [2], [1], [1], [0, 0, 0, 1, 1, 1], [0], [0]>} : vector<1x8x8xbf16>, vector<1x8x8xbf16>, vector<1x8x8xf32> -> vector<1x8x8xf32>
    "tpu.trace_stop"() : () -> ()
    %cst_59 = arith.constant 0.353553385 : f32
    %151 = vector.broadcast %cst_59 : f32 to vector<1x8x8xf32>
    %152 = arith.mulf %150, %151 : vector<1x8x8xf32>
    %153 = vector.broadcast %15 : vector<1x1x8xf32> to vector<1x8x8xf32>
    %154 = arith.addf %152, %153 : vector<1x8x8xf32>
    %cst_60 = arith.constant dense<0xFF800000> : vector<1x8xf32>
    %155 = vector.multi_reduction <maximumf>, %154, %cst_60 [2] : vector<1x8x8xf32> to vector<1x8xf32>
    %156 = vector.shape_cast %155 : vector<1x8xf32> to vector<1x8x1xf32>
    %157 = vector.broadcast %156 : vector<1x8x1xf32> to vector<1x8x8xf32>
    %158 = arith.subf %154, %157 : vector<1x8x8xf32>
    %159 = math.exp %158 : vector<1x8x8xf32>
    %cst_61 = arith.constant dense<0.000000e+00> : vector<1x8xf32>
    %160 = vector.multi_reduction <add>, %159, %cst_61 [2] : vector<1x8x8xf32> to vector<1x8xf32>
    %161 = vector.shape_cast %160 : vector<1x8xf32> to vector<1x8x1xf32>
    %162 = tpu.reciprocal %161 {approx = true} : vector<1x8x1xf32> -> vector<1x8x1xf32>
    %163 = vector.broadcast %162 : vector<1x8x1xf32> to vector<1x8x8xf32>
    %164 = arith.mulf %159, %163 : vector<1x8x8xf32>
    %165 = arith.truncf %164 : vector<1x8x8xf32> to vector<1x8x8xbf16>
    %166 = vector.extract_strided_slice %146 {offsets = [0, 0, 0], sizes = [1, 8, 8], strides = [1, 1, 1]} : vector<1x8x32xbf16> to vector<1x8x8xbf16>
    "tpu.trace_start"() <{level = 10 : i32, message = "bqk,bkd->bqd"}> : () -> ()
    %cst_62 = arith.constant dense<0.000000e+00> : vector<1x8x8xf32>
    %167 = tpu.matmul %165, %166, %cst_62 {dimension_numbers = #tpu.dot_dimension_numbers<[2], [1], [1], [2], [0, 0, 0, 1, 1, 2], [0], [0]>} : vector<1x8x8xbf16>, vector<1x8x8xbf16>, vector<1x8x8xf32> -> vector<1x8x8xf32>
    "tpu.trace_stop"() : () -> ()
    %168 = vector.extract_strided_slice %44 {offsets = [0, 0, 8], sizes = [1, 8, 8], strides = [1, 1, 1]} : vector<1x8x32xf32> to vector<1x8x8xf32>
    %169 = arith.truncf %168 : vector<1x8x8xf32> to vector<1x8x8xbf16>
    %170 = vector.extract_strided_slice %145 {offsets = [0, 0, 8], sizes = [1, 8, 8], strides = [1, 1, 1]} : vector<1x8x32xbf16> to vector<1x8x8xbf16>
    "tpu.trace_start"() <{level = 10 : i32, message = "bqd,bkd->bqk"}> : () -> ()
    %cst_63 = arith.constant dense<0.000000e+00> : vector<1x8x8xf32>
    %171 = tpu.matmul %169, %170, %cst_63 {dimension_numbers = #tpu.dot_dimension_numbers<[2], [2], [1], [1], [0, 0, 0, 1, 1, 1], [0], [0]>} : vector<1x8x8xbf16>, vector<1x8x8xbf16>, vector<1x8x8xf32> -> vector<1x8x8xf32>
    "tpu.trace_stop"() : () -> ()
    %cst_64 = arith.constant 0.353553385 : f32
    %172 = vector.broadcast %cst_64 : f32 to vector<1x8x8xf32>
    %173 = arith.mulf %171, %172 : vector<1x8x8xf32>
    %174 = vector.broadcast %15 : vector<1x1x8xf32> to vector<1x8x8xf32>
    %175 = arith.addf %173, %174 : vector<1x8x8xf32>
    %cst_65 = arith.constant dense<0xFF800000> : vector<1x8xf32>
    %176 = vector.multi_reduction <maximumf>, %175, %cst_65 [2] : vector<1x8x8xf32> to vector<1x8xf32>
    %177 = vector.shape_cast %176 : vector<1x8xf32> to vector<1x8x1xf32>
    %178 = vector.broadcast %177 : vector<1x8x1xf32> to vector<1x8x8xf32>
    %179 = arith.subf %175, %178 : vector<1x8x8xf32>
    %180 = math.exp %179 : vector<1x8x8xf32>
    %cst_66 = arith.constant dense<0.000000e+00> : vector<1x8xf32>
    %181 = vector.multi_reduction <add>, %180, %cst_66 [2] : vector<1x8x8xf32> to vector<1x8xf32>
    %182 = vector.shape_cast %181 : vector<1x8xf32> to vector<1x8x1xf32>
    %183 = tpu.reciprocal %182 {approx = true} : vector<1x8x1xf32> -> vector<1x8x1xf32>
    %184 = vector.broadcast %183 : vector<1x8x1xf32> to vector<1x8x8xf32>
    %185 = arith.mulf %180, %184 : vector<1x8x8xf32>
    %186 = arith.truncf %185 : vector<1x8x8xf32> to vector<1x8x8xbf16>
    %187 = vector.extract_strided_slice %146 {offsets = [0, 0, 8], sizes = [1, 8, 8], strides = [1, 1, 1]} : vector<1x8x32xbf16> to vector<1x8x8xbf16>
    "tpu.trace_start"() <{level = 10 : i32, message = "bqk,bkd->bqd"}> : () -> ()
    %cst_67 = arith.constant dense<0.000000e+00> : vector<1x8x8xf32>
    %188 = tpu.matmul %186, %187, %cst_67 {dimension_numbers = #tpu.dot_dimension_numbers<[2], [1], [1], [2], [0, 0, 0, 1, 1, 2], [0], [0]>} : vector<1x8x8xbf16>, vector<1x8x8xbf16>, vector<1x8x8xf32> -> vector<1x8x8xf32>
    "tpu.trace_stop"() : () -> ()
    %189 = vector.extract_strided_slice %44 {offsets = [0, 0, 16], sizes = [1, 8, 8], strides = [1, 1, 1]} : vector<1x8x32xf32> to vector<1x8x8xf32>
    %190 = arith.truncf %189 : vector<1x8x8xf32> to vector<1x8x8xbf16>
    %191 = vector.extract_strided_slice %145 {offsets = [0, 0, 16], sizes = [1, 8, 8], strides = [1, 1, 1]} : vector<1x8x32xbf16> to vector<1x8x8xbf16>
    "tpu.trace_start"() <{level = 10 : i32, message = "bqd,bkd->bqk"}> : () -> ()
    %cst_68 = arith.constant dense<0.000000e+00> : vector<1x8x8xf32>
    %192 = tpu.matmul %190, %191, %cst_68 {dimension_numbers = #tpu.dot_dimension_numbers<[2], [2], [1], [1], [0, 0, 0, 1, 1, 1], [0], [0]>} : vector<1x8x8xbf16>, vector<1x8x8xbf16>, vector<1x8x8xf32> -> vector<1x8x8xf32>
    "tpu.trace_stop"() : () -> ()
    %cst_69 = arith.constant 0.353553385 : f32
    %193 = vector.broadcast %cst_69 : f32 to vector<1x8x8xf32>
    %194 = arith.mulf %192, %193 : vector<1x8x8xf32>
    %195 = vector.broadcast %15 : vector<1x1x8xf32> to vector<1x8x8xf32>
    %196 = arith.addf %194, %195 : vector<1x8x8xf32>
    %cst_70 = arith.constant dense<0xFF800000> : vector<1x8xf32>
    %197 = vector.multi_reduction <maximumf>, %196, %cst_70 [2] : vector<1x8x8xf32> to vector<1x8xf32>
    %198 = vector.shape_cast %197 : vector<1x8xf32> to vector<1x8x1xf32>
    %199 = vector.broadcast %198 : vector<1x8x1xf32> to vector<1x8x8xf32>
    %200 = arith.subf %196, %199 : vector<1x8x8xf32>
    %201 = math.exp %200 : vector<1x8x8xf32>
    %cst_71 = arith.constant dense<0.000000e+00> : vector<1x8xf32>
    %202 = vector.multi_reduction <add>, %201, %cst_71 [2] : vector<1x8x8xf32> to vector<1x8xf32>
    %203 = vector.shape_cast %202 : vector<1x8xf32> to vector<1x8x1xf32>
    %204 = tpu.reciprocal %203 {approx = true} : vector<1x8x1xf32> -> vector<1x8x1xf32>
    %205 = vector.broadcast %204 : vector<1x8x1xf32> to vector<1x8x8xf32>
    %206 = arith.mulf %201, %205 : vector<1x8x8xf32>
    %207 = arith.truncf %206 : vector<1x8x8xf32> to vector<1x8x8xbf16>
    %208 = vector.extract_strided_slice %146 {offsets = [0, 0, 16], sizes = [1, 8, 8], strides = [1, 1, 1]} : vector<1x8x32xbf16> to vector<1x8x8xbf16>
    "tpu.trace_start"() <{level = 10 : i32, message = "bqk,bkd->bqd"}> : () -> ()
    %cst_72 = arith.constant dense<0.000000e+00> : vector<1x8x8xf32>
    %209 = tpu.matmul %207, %208, %cst_72 {dimension_numbers = #tpu.dot_dimension_numbers<[2], [1], [1], [2], [0, 0, 0, 1, 1, 2], [0], [0]>} : vector<1x8x8xbf16>, vector<1x8x8xbf16>, vector<1x8x8xf32> -> vector<1x8x8xf32>
    "tpu.trace_stop"() : () -> ()
    %210 = vector.extract_strided_slice %44 {offsets = [0, 0, 24], sizes = [1, 8, 8], strides = [1, 1, 1]} : vector<1x8x32xf32> to vector<1x8x8xf32>
    %211 = arith.truncf %210 : vector<1x8x8xf32> to vector<1x8x8xbf16>
    %212 = vector.extract_strided_slice %145 {offsets = [0, 0, 24], sizes = [1, 8, 8], strides = [1, 1, 1]} : vector<1x8x32xbf16> to vector<1x8x8xbf16>
    "tpu.trace_start"() <{level = 10 : i32, message = "bqd,bkd->bqk"}> : () -> ()
    %cst_73 = arith.constant dense<0.000000e+00> : vector<1x8x8xf32>
    %213 = tpu.matmul %211, %212, %cst_73 {dimension_numbers = #tpu.dot_dimension_numbers<[2], [2], [1], [1], [0, 0, 0, 1, 1, 1], [0], [0]>} : vector<1x8x8xbf16>, vector<1x8x8xbf16>, vector<1x8x8xf32> -> vector<1x8x8xf32>
    "tpu.trace_stop"() : () -> ()
    %cst_74 = arith.constant 0.353553385 : f32
    %214 = vector.broadcast %cst_74 : f32 to vector<1x8x8xf32>
    %215 = arith.mulf %213, %214 : vector<1x8x8xf32>
    %216 = vector.broadcast %15 : vector<1x1x8xf32> to vector<1x8x8xf32>
    %217 = arith.addf %215, %216 : vector<1x8x8xf32>
    %cst_75 = arith.constant dense<0xFF800000> : vector<1x8xf32>
    %218 = vector.multi_reduction <maximumf>, %217, %cst_75 [2] : vector<1x8x8xf32> to vector<1x8xf32>
    %219 = vector.shape_cast %218 : vector<1x8xf32> to vector<1x8x1xf32>
    %220 = vector.broadcast %219 : vector<1x8x1xf32> to vector<1x8x8xf32>
    %221 = arith.subf %217, %220 : vector<1x8x8xf32>
    %222 = math.exp %221 : vector<1x8x8xf32>
    %cst_76 = arith.constant dense<0.000000e+00> : vector<1x8xf32>
    %223 = vector.multi_reduction <add>, %222, %cst_76 [2] : vector<1x8x8xf32> to vector<1x8xf32>
    %224 = vector.shape_cast %223 : vector<1x8xf32> to vector<1x8x1xf32>
    %225 = tpu.reciprocal %224 {approx = true} : vector<1x8x1xf32> -> vector<1x8x1xf32>
    %226 = vector.broadcast %225 : vector<1x8x1xf32> to vector<1x8x8xf32>
    %227 = arith.mulf %222, %226 : vector<1x8x8xf32>
    %228 = arith.truncf %227 : vector<1x8x8xf32> to vector<1x8x8xbf16>
    %229 = vector.extract_strided_slice %146 {offsets = [0, 0, 24], sizes = [1, 8, 8], strides = [1, 1, 1]} : vector<1x8x32xbf16> to vector<1x8x8xbf16>
    "tpu.trace_start"() <{level = 10 : i32, message = "bqk,bkd->bqd"}> : () -> ()
    %cst_77 = arith.constant dense<0.000000e+00> : vector<1x8x8xf32>
    %230 = tpu.matmul %228, %229, %cst_77 {dimension_numbers = #tpu.dot_dimension_numbers<[2], [1], [1], [2], [0, 0, 0, 1, 1, 2], [0], [0]>} : vector<1x8x8xbf16>, vector<1x8x8xbf16>, vector<1x8x8xf32> -> vector<1x8x8xf32>
    "tpu.trace_stop"() : () -> ()
    %231 = tpu.concatenate %167, %188, %209, %230 in 2 : vector<1x8x8xf32>, vector<1x8x8xf32>, vector<1x8x8xf32>, vector<1x8x8xf32> -> vector<1x8x32xf32>
    %232 = vector.shape_cast %144 : vector<1x8x32xf32> to vector<8x32xf32>
    %233 = arith.truncf %232 : vector<8x32xf32> to vector<8x32xbf16>
    %c0_78 = arith.constant 0 : index
    %c0_79 = arith.constant 0 : index
    %234 = vector.load %arg13[%c0_78, %c0_79] : memref<32x32xbf16, #tpu.memory_space<vmem>>, vector<32x32xbf16>
    %cst_80 = arith.constant dense<0.000000e+00> : vector<8x32xf32>
    %235 = tpu.matmul %233, %234, %cst_80 {dimension_numbers = #tpu.dot_dimension_numbers<[1], [0], [0], [1], [0, 0, 1, 1], [], []>} : vector<8x32xbf16>, vector<32x32xbf16>, vector<8x32xf32> -> vector<8x32xf32>
    %c0_81 = arith.constant 0 : index
    %c0_82 = arith.constant 0 : index
    %236 = vector.load %arg14[%c0_81, %c0_82] : memref<1x32xf32, #tpu.memory_space<vmem>>, vector<1x32xf32>
    %237 = vector.broadcast %236 : vector<1x32xf32> to vector<8x32xf32>
    %238 = arith.addf %235, %237 : vector<8x32xf32>
    %239 = vector.shape_cast %35 : vector<1x8x32xf32> to vector<8x32xf32>
    %240 = arith.addf %239, %238 : vector<8x32xf32>
    %c0_83 = arith.constant 0 : index
    %c0_84 = arith.constant 0 : index
    %241 = vector.load %arg17[%c0_83, %c0_84] : memref<1x32xf32, #tpu.memory_space<vmem>>, vector<1x32xf32>
    %c0_85 = arith.constant 0 : index
    %c0_86 = arith.constant 0 : index
    %242 = vector.load %arg18[%c0_85, %c0_86] : memref<1x32xf32, #tpu.memory_space<vmem>>, vector<1x32xf32>
    %cst_87 = arith.constant dense<0.000000e+00> : vector<8xf32>
    %243 = vector.multi_reduction <add>, %240, %cst_87 [1] : vector<8x32xf32> to vector<8xf32>
    %244 = vector.shape_cast %243 : vector<8xf32> to vector<8x1xf32>
    %cst_88 = arith.constant 3.200000e+01 : f32
    %245 = vector.broadcast %cst_88 : f32 to vector<8x1xf32>
    %246 = arith.divf %244, %245 : vector<8x1xf32>
    %247 = vector.broadcast %246 : vector<8x1xf32> to vector<8x32xf32>
    %248 = arith.subf %240, %247 : vector<8x32xf32>
    %249 = arith.mulf %248, %248 : vector<8x32xf32>
    %cst_89 = arith.constant dense<0.000000e+00> : vector<8xf32>
    %250 = vector.multi_reduction <add>, %249, %cst_89 [1] : vector<8x32xf32> to vector<8xf32>
    %251 = vector.shape_cast %250 : vector<8xf32> to vector<8x1xf32>
    %cst_90 = arith.constant 3.200000e+01 : f32
    %252 = vector.broadcast %cst_90 : f32 to vector<8x1xf32>
    %253 = arith.divf %251, %252 : vector<8x1xf32>
    %254 = vector.broadcast %246 : vector<8x1xf32> to vector<8x32xf32>
    %255 = arith.subf %240, %254 : vector<8x32xf32>
    %cst_91 = arith.constant 9.99999974E-6 : f32
    %256 = vector.broadcast %cst_91 : f32 to vector<8x1xf32>
    %257 = arith.addf %253, %256 : vector<8x1xf32>
    %258 = math.rsqrt %257 : vector<8x1xf32>
    %259 = vector.broadcast %258 : vector<8x1xf32> to vector<8x32xf32>
    %260 = arith.mulf %255, %259 : vector<8x32xf32>
    %261 = vector.broadcast %241 : vector<1x32xf32> to vector<8x32xf32>
    %262 = arith.mulf %260, %261 : vector<8x32xf32>
    %263 = vector.broadcast %242 : vector<1x32xf32> to vector<8x32xf32>
    %264 = arith.addf %262, %263 : vector<8x32xf32>
    %265 = vector.shape_cast %264 : vector<8x32xf32> to vector<1x8x32xf32>
    %266 = vector.shape_cast %231 : vector<1x8x32xf32> to vector<8x32xf32>
    %267 = arith.truncf %266 : vector<8x32xf32> to vector<8x32xbf16>
    %c0_92 = arith.constant 0 : index
    %c0_93 = arith.constant 0 : index
    %268 = vector.load %arg15[%c0_92, %c0_93] : memref<32x32xbf16, #tpu.memory_space<vmem>>, vector<32x32xbf16>
    %cst_94 = arith.constant dense<0.000000e+00> : vector<8x32xf32>
    %269 = tpu.matmul %267, %268, %cst_94 {dimension_numbers = #tpu.dot_dimension_numbers<[1], [0], [0], [1], [0, 0, 1, 1], [], []>} : vector<8x32xbf16>, vector<32x32xbf16>, vector<8x32xf32> -> vector<8x32xf32>
    %c0_95 = arith.constant 0 : index
    %c0_96 = arith.constant 0 : index
    %270 = vector.load %arg16[%c0_95, %c0_96] : memref<1x32xf32, #tpu.memory_space<vmem>>, vector<1x32xf32>
    %271 = vector.broadcast %270 : vector<1x32xf32> to vector<8x32xf32>
    %272 = arith.addf %269, %271 : vector<8x32xf32>
    %273 = vector.shape_cast %25 : vector<1x8x32xf32> to vector<8x32xf32>
    %274 = arith.addf %273, %272 : vector<8x32xf32>
    %c0_97 = arith.constant 0 : index
    %c0_98 = arith.constant 0 : index
    %275 = vector.load %arg19[%c0_97, %c0_98] : memref<1x32xf32, #tpu.memory_space<vmem>>, vector<1x32xf32>
    %c0_99 = arith.constant 0 : index
    %c0_100 = arith.constant 0 : index
    %276 = vector.load %arg20[%c0_99, %c0_100] : memref<1x32xf32, #tpu.memory_space<vmem>>, vector<1x32xf32>
    %cst_101 = arith.constant dense<0.000000e+00> : vector<8xf32>
    %277 = vector.multi_reduction <add>, %274, %cst_101 [1] : vector<8x32xf32> to vector<8xf32>
    %278 = vector.shape_cast %277 : vector<8xf32> to vector<8x1xf32>
    %cst_102 = arith.constant 3.200000e+01 : f32
    %279 = vector.broadcast %cst_102 : f32 to vector<8x1xf32>
    %280 = arith.divf %278, %279 : vector<8x1xf32>
    %281 = vector.broadcast %280 : vector<8x1xf32> to vector<8x32xf32>
    %282 = arith.subf %274, %281 : vector<8x32xf32>
    %283 = arith.mulf %282, %282 : vector<8x32xf32>
    %cst_103 = arith.constant dense<0.000000e+00> : vector<8xf32>
    %284 = vector.multi_reduction <add>, %283, %cst_103 [1] : vector<8x32xf32> to vector<8xf32>
    %285 = vector.shape_cast %284 : vector<8xf32> to vector<8x1xf32>
    %cst_104 = arith.constant 3.200000e+01 : f32
    %286 = vector.broadcast %cst_104 : f32 to vector<8x1xf32>
    %287 = arith.divf %285, %286 : vector<8x1xf32>
    %288 = vector.broadcast %280 : vector<8x1xf32> to vector<8x32xf32>
    %289 = arith.subf %274, %288 : vector<8x32xf32>
    %cst_105 = arith.constant 9.99999974E-6 : f32
    %290 = vector.broadcast %cst_105 : f32 to vector<8x1xf32>
    %291 = arith.addf %287, %290 : vector<8x1xf32>
    %292 = math.rsqrt %291 : vector<8x1xf32>
    %293 = vector.broadcast %292 : vector<8x1xf32> to vector<8x32xf32>
    %294 = arith.mulf %289, %293 : vector<8x32xf32>
    %295 = vector.broadcast %275 : vector<1x32xf32> to vector<8x32xf32>
    %296 = arith.mulf %294, %295 : vector<8x32xf32>
    %297 = vector.broadcast %276 : vector<1x32xf32> to vector<8x32xf32>
    %298 = arith.addf %296, %297 : vector<8x32xf32>
    %299 = vector.shape_cast %298 : vector<8x32xf32> to vector<1x8x32xf32>
    %300 = arith.truncf %299 : vector<1x8x32xf32> to vector<1x8x32xbf16>
    %c0_106 = arith.constant 0 : index
    %c0_107 = arith.constant 0 : index
    %c0_108 = arith.constant 0 : index
    %301 = vector.load %arg21[%c0_106, %c0_107, %c0_108] : memref<1x16x32xbf16, #tpu.memory_space<vmem>>, vector<1x8x32xbf16>
    tpu.vector_store %arg21[%c0_106, %c0_107, %c0_108], %300 {strides = array<i32>} : memref<1x16x32xbf16, #tpu.memory_space<vmem>>, vector<1x8x32xbf16>,
    %302 = arith.truncf %265 : vector<1x8x32xf32> to vector<1x8x32xbf16>
    %c0_109 = arith.constant 0 : index
    %c8 = arith.constant 8 : index
    %c0_110 = arith.constant 0 : index
    %303 = vector.load %arg21[%c0_109, %c8, %c0_110] : memref<1x16x32xbf16, #tpu.memory_space<vmem>>, vector<1x8x32xbf16>
    tpu.vector_store %arg21[%c0_109, %c8, %c0_110], %302 {strides = array<i32>} : memref<1x16x32xbf16, #tpu.memory_space<vmem>>, vector<1x8x32xbf16>,
    return
  }
  func.func @transform_0(%arg0: i32) -> (i32, i32, i32) {
    %c0_i32 = arith.constant 0 : i32
    %c0_i32_0 = arith.constant 0 : i32
    %c0_i32_1 = arith.constant 0 : i32
    return %arg0, %c0_i32, %c0_i32_0 : i32, i32, i32
  }
  func.func @transform_1(%arg0: i32) -> (i32, i32, i32) {
    %c0_i32 = arith.constant 0 : i32
    %c0_i32_0 = arith.constant 0 : i32
    %c0_i32_1 = arith.constant 0 : i32
    return %arg0, %c0_i32, %c0_i32_0 : i32, i32, i32
  }
  func.func @transform_2(%arg0: i32) -> (i32, i32) {
    %c0_i32 = arith.constant 0 : i32
    %c0_i32_0 = arith.constant 0 : i32
    %c0_i32_1 = arith.constant 0 : i32
    return %c0_i32, %c0_i32_0 : i32, i32
  }
  func.func @transform_3(%arg0: i32) -> (i32, i32) {
    %c0_i32 = arith.constant 0 : i32
    %c0_i32_0 = arith.constant 0 : i32
    %c0_i32_1 = arith.constant 0 : i32
    return %c0_i32, %c0_i32_0 : i32, i32
  }
  func.func @transform_4(%arg0: i32) -> (i32, i32) {
    %c0_i32 = arith.constant 0 : i32
    %c0_i32_0 = arith.constant 0 : i32
    %c0_i32_1 = arith.constant 0 : i32
    return %c0_i32, %c0_i32_0 : i32, i32
  }
  func.func @transform_5(%arg0: i32) -> (i32, i32) {
    %c0_i32 = arith.constant 0 : i32
    %c0_i32_0 = arith.constant 0 : i32
    %c0_i32_1 = arith.constant 0 : i32
    return %c0_i32, %c0_i32_0 : i32, i32
  }
  func.func @transform_6(%arg0: i32) -> (i32, i32, i32) {
    %c0_i32 = arith.constant 0 : i32
    %c0_i32_0 = arith.constant 0 : i32
    %c0_i32_1 = arith.constant 0 : i32
    %c0_i32_2 = arith.constant 0 : i32
    return %c0_i32, %c0_i32_0, %c0_i32_1 : i32, i32, i32
  }
  func.func @transform_7(%arg0: i32) -> (i32, i32, i32) {
    %c0_i32 = arith.constant 0 : i32
    %c0_i32_0 = arith.constant 0 : i32
    %c0_i32_1 = arith.constant 0 : i32
    %c0_i32_2 = arith.constant 0 : i32
    return %c0_i32, %c0_i32_0, %c0_i32_1 : i32, i32, i32
  }
  func.func @transform_8(%arg0: i32) -> (i32, i32) {
    %c0_i32 = arith.constant 0 : i32
    %c0_i32_0 = arith.constant 0 : i32
    %c0_i32_1 = arith.constant 0 : i32
    return %c0_i32, %c0_i32_0 : i32, i32
  }
  func.func @transform_9(%arg0: i32) -> (i32, i32) {
    %c0_i32 = arith.constant 0 : i32
    %c0_i32_0 = arith.constant 0 : i32
    %c0_i32_1 = arith.constant 0 : i32
    return %c0_i32, %c0_i32_0 : i32, i32
  }
  func.func @transform_10(%arg0: i32) -> (i32, i32) {
    %c0_i32 = arith.constant 0 : i32
    %c0_i32_0 = arith.constant 0 : i32
    %c0_i32_1 = arith.constant 0 : i32
    return %c0_i32, %c0_i32_0 : i32, i32
  }
  func.func @transform_11(%arg0: i32) -> (i32, i32) {
    %c0_i32 = arith.constant 0 : i32
    %c0_i32_0 = arith.constant 0 : i32
    %c0_i32_1 = arith.constant 0 : i32
    return %c0_i32, %c0_i32_0 : i32, i32
  }
  func.func @transform_12(%arg0: i32) -> (i32, i32) {
    %c0_i32 = arith.constant 0 : i32
    %c0_i32_0 = arith.constant 0 : i32
    %c0_i32_1 = arith.constant 0 : i32
    return %c0_i32, %c0_i32_0 : i32, i32
  }
  func.func @transform_13(%arg0: i32) -> (i32, i32) {
    %c0_i32 = arith.constant 0 : i32
    %c0_i32_0 = arith.constant 0 : i32
    %c0_i32_1 = arith.constant 0 : i32
    return %c0_i32, %c0_i32_0 : i32, i32
  }
  func.func @transform_14(%arg0: i32) -> (i32, i32) {
    %c0_i32 = arith.constant 0 : i32
    %c0_i32_0 = arith.constant 0 : i32
    %c0_i32_1 = arith.constant 0 : i32
    return %c0_i32, %c0_i32_0 : i32, i32
  }
  func.func @transform_15(%arg0: i32) -> (i32, i32) {
    %c0_i32 = arith.constant 0 : i32
    %c0_i32_0 = arith.constant 0 : i32
    %c0_i32_1 = arith.constant 0 : i32
    return %c0_i32, %c0_i32_0 : i32, i32
  }
  func.func @transform_16(%arg0: i32) -> (i32, i32) {
    %c0_i32 = arith.constant 0 : i32
    %c0_i32_0 = arith.constant 0 : i32
    %c0_i32_1 = arith.constant 0 : i32
    return %c0_i32, %c0_i32_0 : i32, i32
  }
  func.func @transform_17(%arg0: i32) -> (i32, i32) {
    %c0_i32 = arith.constant 0 : i32
    %c0_i32_0 = arith.constant 0 : i32
    %c0_i32_1 = arith.constant 0 : i32
    return %c0_i32, %c0_i32_0 : i32, i32
  }
  func.func @transform_18(%arg0: i32) -> (i32, i32) {
    %c0_i32 = arith.constant 0 : i32
    %c0_i32_0 = arith.constant 0 : i32
    %c0_i32_1 = arith.constant 0 : i32
    return %c0_i32, %c0_i32_0 : i32, i32
  }
  func.func @transform_19(%arg0: i32) -> (i32, i32) {
    %c0_i32 = arith.constant 0 : i32
    %c0_i32_0 = arith.constant 0 : i32
    %c0_i32_1 = arith.constant 0 : i32
    return %c0_i32, %c0_i32_0 : i32, i32
  }
  func.func @transform_20(%arg0: i32) -> (i32, i32, i32) {
    %c0_i32 = arith.constant 0 : i32
    %c0_i32_0 = arith.constant 0 : i32
    %c0_i32_1 = arith.constant 0 : i32
    return %arg0, %c0_i32, %c0_i32_0 : i32, i32, i32
  }
}

module attributes {stable_mosaic.version = 11 : i64} {
  func.func @_classifier_kernel(%arg0: i32, %arg1: memref<1x1x648xbf16, #tpu.memory_space<vmem>>, %arg2: memref<648x64xbf16, #tpu.memory_space<vmem>>, %arg3: memref<1x64xf32, #tpu.memory_space<vmem>>, %arg4: memref<1x64xf32, #tpu.memory_space<vmem>>, %arg5: memref<1x64xf32, #tpu.memory_space<vmem>>, %arg6: memref<1x64xf32, #tpu.memory_space<vmem>>, %arg7: memref<1x64xf32, #tpu.memory_space<vmem>>, %arg8: memref<64x64xbf16, #tpu.memory_space<vmem>>, %arg9: memref<1x64xf32, #tpu.memory_space<vmem>>, %arg10: memref<1x64xf32, #tpu.memory_space<vmem>>, %arg11: memref<1x64xf32, #tpu.memory_space<vmem>>, %arg12: memref<64x64xbf16, #tpu.memory_space<vmem>>, %arg13: memref<1x64xf32, #tpu.memory_space<vmem>>, %arg14: memref<1x64xf32, #tpu.memory_space<vmem>>, %arg15: memref<1x1xf32, #tpu.memory_space<vmem>>, %arg16: memref<1x1x1xf32, #tpu.memory_space<vmem>>) attributes {dimension_semantics = [#tpu.dimension_semantics<parallel>], iteration_bounds = array<i64: 2>, scalar_prefetch = 0 : i64, scratch_operands = 0 : i64, tpu.core_type = #tpu.core_type<tc>, window_params = [{transform_indices = @transform_0, window_bounds = array<i64: 1, 1, 648>}, {pipeline_mode = #tpu.pipeline_mode<synchronous>, transform_indices = @transform_1, window_bounds = array<i64: 648, 64>}, {pipeline_mode = #tpu.pipeline_mode<synchronous>, transform_indices = @transform_2, window_bounds = array<i64: 1, 64>}, {pipeline_mode = #tpu.pipeline_mode<synchronous>, transform_indices = @transform_3, window_bounds = array<i64: 1, 64>}, {pipeline_mode = #tpu.pipeline_mode<synchronous>, transform_indices = @transform_4, window_bounds = array<i64: 1, 64>}, {pipeline_mode = #tpu.pipeline_mode<synchronous>, transform_indices = @transform_5, window_bounds = array<i64: 1, 64>}, {pipeline_mode = #tpu.pipeline_mode<synchronous>, transform_indices = @transform_6, window_bounds = array<i64: 1, 64>}, {pipeline_mode = #tpu.pipeline_mode<synchronous>, transform_indices = @transform_7, window_bounds = array<i64: 64, 64>}, {pipeline_mode = #tpu.pipeline_mode<synchronous>, transform_indices = @transform_8, window_bounds = array<i64: 1, 64>}, {pipeline_mode = #tpu.pipeline_mode<synchronous>, transform_indices = @transform_9, window_bounds = array<i64: 1, 64>}, {pipeline_mode = #tpu.pipeline_mode<synchronous>, transform_indices = @transform_10, window_bounds = array<i64: 1, 64>}, {pipeline_mode = #tpu.pipeline_mode<synchronous>, transform_indices = @transform_11, window_bounds = array<i64: 64, 64>}, {pipeline_mode = #tpu.pipeline_mode<synchronous>, transform_indices = @transform_12, window_bounds = array<i64: 1, 64>}, {pipeline_mode = #tpu.pipeline_mode<synchronous>, transform_indices = @transform_13, window_bounds = array<i64: 1, 64>}, {pipeline_mode = #tpu.pipeline_mode<synchronous>, transform_indices = @transform_14, window_bounds = array<i64: 1, 1>}, {transform_indices = @transform_15, window_bounds = array<i64: 1, 1, 1>}]} {
    %c0 = arith.constant 0 : index
    %c0_0 = arith.constant 0 : index
    %c0_1 = arith.constant 0 : index
    %0 = vector.load %arg1[%c0, %c0_0, %c0_1] : memref<1x1x648xbf16, #tpu.memory_space<vmem>>, vector<1x1x648xbf16>
    %1 = vector.shape_cast %0 : vector<1x1x648xbf16> to vector<1x648xbf16>
    %c0_2 = arith.constant 0 : index
    %c0_3 = arith.constant 0 : index
    %2 = vector.load %arg2[%c0_2, %c0_3] : memref<648x64xbf16, #tpu.memory_space<vmem>>, vector<648x64xbf16>
    %cst = arith.constant dense<0.000000e+00> : vector<1x64xf32>
    %3 = tpu.matmul %1, %2, %cst {dimension_numbers = #tpu.dot_dimension_numbers<[1], [0], [0], [1], [0, 0, 1, 1], [], []>} : vector<1x648xbf16>, vector<648x64xbf16>, vector<1x64xf32> -> vector<1x64xf32>
    %c0_4 = arith.constant 0 : index
    %c0_5 = arith.constant 0 : index
    %4 = vector.load %arg3[%c0_4, %c0_5] : memref<1x64xf32, #tpu.memory_space<vmem>>, vector<1x64xf32>
    %5 = arith.addf %3, %4 : vector<1x64xf32>
    %c0_6 = arith.constant 0 : index
    %c0_7 = arith.constant 0 : index
    %6 = vector.load %arg4[%c0_6, %c0_7] : memref<1x64xf32, #tpu.memory_space<vmem>>, vector<1x64xf32>
    %c0_8 = arith.constant 0 : index
    %c0_9 = arith.constant 0 : index
    %7 = vector.load %arg5[%c0_8, %c0_9] : memref<1x64xf32, #tpu.memory_space<vmem>>, vector<1x64xf32>
    %cst_10 = arith.constant dense<0.000000e+00> : vector<1xf32>
    %8 = vector.multi_reduction <add>, %5, %cst_10 [1] : vector<1x64xf32> to vector<1xf32>
    %9 = vector.shape_cast %8 : vector<1xf32> to vector<1x1xf32>
    %cst_11 = arith.constant 6.400000e+01 : f32
    %10 = vector.broadcast %cst_11 : f32 to vector<1x1xf32>
    %11 = arith.divf %9, %10 : vector<1x1xf32>
    %12 = vector.broadcast %11 : vector<1x1xf32> to vector<1x64xf32>
    %13 = arith.subf %5, %12 : vector<1x64xf32>
    %14 = arith.mulf %13, %13 : vector<1x64xf32>
    %cst_12 = arith.constant dense<0.000000e+00> : vector<1xf32>
    %15 = vector.multi_reduction <add>, %14, %cst_12 [1] : vector<1x64xf32> to vector<1xf32>
    %16 = vector.shape_cast %15 : vector<1xf32> to vector<1x1xf32>
    %cst_13 = arith.constant 6.400000e+01 : f32
    %17 = vector.broadcast %cst_13 : f32 to vector<1x1xf32>
    %18 = arith.divf %16, %17 : vector<1x1xf32>
    %19 = vector.broadcast %11 : vector<1x1xf32> to vector<1x64xf32>
    %20 = arith.subf %5, %19 : vector<1x64xf32>
    %cst_14 = arith.constant 9.99999974E-6 : f32
    %21 = vector.broadcast %cst_14 : f32 to vector<1x1xf32>
    %22 = arith.addf %18, %21 : vector<1x1xf32>
    %23 = math.rsqrt %22 : vector<1x1xf32>
    %24 = vector.broadcast %23 : vector<1x1xf32> to vector<1x64xf32>
    %25 = arith.mulf %20, %24 : vector<1x64xf32>
    %26 = arith.mulf %25, %6 : vector<1x64xf32>
    %27 = arith.addf %26, %7 : vector<1x64xf32>
    %cst_15 = arith.constant 0.000000e+00 : f32
    %28 = vector.broadcast %cst_15 : f32 to vector<1x64xf32>
    %29 = arith.maximumf %27, %28 : vector<1x64xf32>
    %c0_16 = arith.constant 0 : index
    %c0_17 = arith.constant 0 : index
    %30 = vector.load %arg6[%c0_16, %c0_17] : memref<1x64xf32, #tpu.memory_space<vmem>>, vector<1x64xf32>
    %c0_18 = arith.constant 0 : index
    %c0_19 = arith.constant 0 : index
    %31 = vector.load %arg7[%c0_18, %c0_19] : memref<1x64xf32, #tpu.memory_space<vmem>>, vector<1x64xf32>
    %cst_20 = arith.constant dense<0.000000e+00> : vector<1xf32>
    %32 = vector.multi_reduction <add>, %29, %cst_20 [1] : vector<1x64xf32> to vector<1xf32>
    %33 = vector.shape_cast %32 : vector<1xf32> to vector<1x1xf32>
    %cst_21 = arith.constant 6.400000e+01 : f32
    %34 = vector.broadcast %cst_21 : f32 to vector<1x1xf32>
    %35 = arith.divf %33, %34 : vector<1x1xf32>
    %36 = vector.broadcast %35 : vector<1x1xf32> to vector<1x64xf32>
    %37 = arith.subf %29, %36 : vector<1x64xf32>
    %38 = arith.mulf %37, %37 : vector<1x64xf32>
    %cst_22 = arith.constant dense<0.000000e+00> : vector<1xf32>
    %39 = vector.multi_reduction <add>, %38, %cst_22 [1] : vector<1x64xf32> to vector<1xf32>
    %40 = vector.shape_cast %39 : vector<1xf32> to vector<1x1xf32>
    %cst_23 = arith.constant 6.400000e+01 : f32
    %41 = vector.broadcast %cst_23 : f32 to vector<1x1xf32>
    %42 = arith.divf %40, %41 : vector<1x1xf32>
    %43 = vector.broadcast %35 : vector<1x1xf32> to vector<1x64xf32>
    %44 = arith.subf %29, %43 : vector<1x64xf32>
    %cst_24 = arith.constant 9.99999974E-6 : f32
    %45 = vector.broadcast %cst_24 : f32 to vector<1x1xf32>
    %46 = arith.addf %42, %45 : vector<1x1xf32>
    %47 = math.rsqrt %46 : vector<1x1xf32>
    %48 = vector.broadcast %47 : vector<1x1xf32> to vector<1x64xf32>
    %49 = arith.mulf %44, %48 : vector<1x64xf32>
    %50 = arith.mulf %49, %30 : vector<1x64xf32>
    %51 = arith.addf %50, %31 : vector<1x64xf32>
    %cst_25 = arith.constant 0.000000e+00 : f32
    %52 = vector.broadcast %cst_25 : f32 to vector<1x64xf32>
    %53 = arith.maximumf %51, %52 : vector<1x64xf32>
    %54 = arith.truncf %53 : vector<1x64xf32> to vector<1x64xbf16>
    %c0_26 = arith.constant 0 : index
    %c0_27 = arith.constant 0 : index
    %55 = vector.load %arg8[%c0_26, %c0_27] : memref<64x64xbf16, #tpu.memory_space<vmem>>, vector<64x64xbf16>
    %cst_28 = arith.constant dense<0.000000e+00> : vector<1x64xf32>
    %56 = tpu.matmul %54, %55, %cst_28 {dimension_numbers = #tpu.dot_dimension_numbers<[1], [0], [0], [1], [0, 0, 1, 1], [], []>} : vector<1x64xbf16>, vector<64x64xbf16>, vector<1x64xf32> -> vector<1x64xf32>
    %c0_29 = arith.constant 0 : index
    %c0_30 = arith.constant 0 : index
    %57 = vector.load %arg9[%c0_29, %c0_30] : memref<1x64xf32, #tpu.memory_space<vmem>>, vector<1x64xf32>
    %58 = arith.addf %56, %57 : vector<1x64xf32>
    %c0_31 = arith.constant 0 : index
    %c0_32 = arith.constant 0 : index
    %59 = vector.load %arg10[%c0_31, %c0_32] : memref<1x64xf32, #tpu.memory_space<vmem>>, vector<1x64xf32>
    %c0_33 = arith.constant 0 : index
    %c0_34 = arith.constant 0 : index
    %60 = vector.load %arg11[%c0_33, %c0_34] : memref<1x64xf32, #tpu.memory_space<vmem>>, vector<1x64xf32>
    %cst_35 = arith.constant dense<0.000000e+00> : vector<1xf32>
    %61 = vector.multi_reduction <add>, %58, %cst_35 [1] : vector<1x64xf32> to vector<1xf32>
    %62 = vector.shape_cast %61 : vector<1xf32> to vector<1x1xf32>
    %cst_36 = arith.constant 6.400000e+01 : f32
    %63 = vector.broadcast %cst_36 : f32 to vector<1x1xf32>
    %64 = arith.divf %62, %63 : vector<1x1xf32>
    %65 = vector.broadcast %64 : vector<1x1xf32> to vector<1x64xf32>
    %66 = arith.subf %58, %65 : vector<1x64xf32>
    %67 = arith.mulf %66, %66 : vector<1x64xf32>
    %cst_37 = arith.constant dense<0.000000e+00> : vector<1xf32>
    %68 = vector.multi_reduction <add>, %67, %cst_37 [1] : vector<1x64xf32> to vector<1xf32>
    %69 = vector.shape_cast %68 : vector<1xf32> to vector<1x1xf32>
    %cst_38 = arith.constant 6.400000e+01 : f32
    %70 = vector.broadcast %cst_38 : f32 to vector<1x1xf32>
    %71 = arith.divf %69, %70 : vector<1x1xf32>
    %72 = vector.broadcast %64 : vector<1x1xf32> to vector<1x64xf32>
    %73 = arith.subf %58, %72 : vector<1x64xf32>
    %cst_39 = arith.constant 9.99999974E-6 : f32
    %74 = vector.broadcast %cst_39 : f32 to vector<1x1xf32>
    %75 = arith.addf %71, %74 : vector<1x1xf32>
    %76 = math.rsqrt %75 : vector<1x1xf32>
    %77 = vector.broadcast %76 : vector<1x1xf32> to vector<1x64xf32>
    %78 = arith.mulf %73, %77 : vector<1x64xf32>
    %79 = arith.mulf %78, %59 : vector<1x64xf32>
    %80 = arith.addf %79, %60 : vector<1x64xf32>
    %cst_40 = arith.constant 0.000000e+00 : f32
    %81 = vector.broadcast %cst_40 : f32 to vector<1x64xf32>
    %82 = arith.maximumf %80, %81 : vector<1x64xf32>
    %83 = arith.truncf %82 : vector<1x64xf32> to vector<1x64xbf16>
    %c0_41 = arith.constant 0 : index
    %c0_42 = arith.constant 0 : index
    %84 = vector.load %arg12[%c0_41, %c0_42] : memref<64x64xbf16, #tpu.memory_space<vmem>>, vector<64x64xbf16>
    %cst_43 = arith.constant dense<0.000000e+00> : vector<1x64xf32>
    %85 = tpu.matmul %83, %84, %cst_43 {dimension_numbers = #tpu.dot_dimension_numbers<[1], [0], [0], [1], [0, 0, 1, 1], [], []>} : vector<1x64xbf16>, vector<64x64xbf16>, vector<1x64xf32> -> vector<1x64xf32>
    %c0_44 = arith.constant 0 : index
    %c0_45 = arith.constant 0 : index
    %86 = vector.load %arg13[%c0_44, %c0_45] : memref<1x64xf32, #tpu.memory_space<vmem>>, vector<1x64xf32>
    %87 = arith.addf %85, %86 : vector<1x64xf32>
    %88 = arith.addf %29, %87 : vector<1x64xf32>
    %c0_46 = arith.constant 0 : index
    %c0_47 = arith.constant 0 : index
    %89 = vector.load %arg14[%c0_46, %c0_47] : memref<1x64xf32, #tpu.memory_space<vmem>>, vector<1x64xf32>
    %90 = arith.mulf %88, %89 : vector<1x64xf32>
    %cst_48 = arith.constant dense<0.000000e+00> : vector<1xf32>
    %91 = vector.multi_reduction <add>, %90, %cst_48 [1] : vector<1x64xf32> to vector<1xf32>
    %92 = vector.shape_cast %91 : vector<1xf32> to vector<1x1xf32>
    %c0_49 = arith.constant 0 : index
    %c0_50 = arith.constant 0 : index
    %93 = vector.load %arg15[%c0_49, %c0_50] : memref<1x1xf32, #tpu.memory_space<vmem>>, vector<1x1xf32>
    %94 = arith.addf %92, %93 : vector<1x1xf32>
    %95 = vector.shape_cast %94 : vector<1x1xf32> to vector<1x1x1xf32>
    %c0_51 = arith.constant 0 : index
    %c0_52 = arith.constant 0 : index
    %c0_53 = arith.constant 0 : index
    %96 = vector.load %arg16[%c0_51, %c0_52, %c0_53] : memref<1x1x1xf32, #tpu.memory_space<vmem>>, vector<1x1x1xf32>
    tpu.vector_store %arg16[%c0_51, %c0_52, %c0_53], %95 {strides = array<i32>} : memref<1x1x1xf32, #tpu.memory_space<vmem>>, vector<1x1x1xf32>,
    return
  }
  func.func @transform_0(%arg0: i32) -> (i32, i32, i32) {
    %c0_i32 = arith.constant 0 : i32
    %c0_i32_0 = arith.constant 0 : i32
    %c0_i32_1 = arith.constant 0 : i32
    return %arg0, %c0_i32, %c0_i32_0 : i32, i32, i32
  }
  func.func @transform_1(%arg0: i32) -> (i32, i32) {
    %c0_i32 = arith.constant 0 : i32
    %c0_i32_0 = arith.constant 0 : i32
    %c0_i32_1 = arith.constant 0 : i32
    return %c0_i32, %c0_i32_0 : i32, i32
  }
  func.func @transform_2(%arg0: i32) -> (i32, i32) {
    %c0_i32 = arith.constant 0 : i32
    %c0_i32_0 = arith.constant 0 : i32
    %c0_i32_1 = arith.constant 0 : i32
    return %c0_i32, %c0_i32_0 : i32, i32
  }
  func.func @transform_3(%arg0: i32) -> (i32, i32) {
    %c0_i32 = arith.constant 0 : i32
    %c0_i32_0 = arith.constant 0 : i32
    %c0_i32_1 = arith.constant 0 : i32
    return %c0_i32, %c0_i32_0 : i32, i32
  }
  func.func @transform_4(%arg0: i32) -> (i32, i32) {
    %c0_i32 = arith.constant 0 : i32
    %c0_i32_0 = arith.constant 0 : i32
    %c0_i32_1 = arith.constant 0 : i32
    return %c0_i32, %c0_i32_0 : i32, i32
  }
  func.func @transform_5(%arg0: i32) -> (i32, i32) {
    %c0_i32 = arith.constant 0 : i32
    %c0_i32_0 = arith.constant 0 : i32
    %c0_i32_1 = arith.constant 0 : i32
    return %c0_i32, %c0_i32_0 : i32, i32
  }
  func.func @transform_6(%arg0: i32) -> (i32, i32) {
    %c0_i32 = arith.constant 0 : i32
    %c0_i32_0 = arith.constant 0 : i32
    %c0_i32_1 = arith.constant 0 : i32
    return %c0_i32, %c0_i32_0 : i32, i32
  }
  func.func @transform_7(%arg0: i32) -> (i32, i32) {
    %c0_i32 = arith.constant 0 : i32
    %c0_i32_0 = arith.constant 0 : i32
    %c0_i32_1 = arith.constant 0 : i32
    return %c0_i32, %c0_i32_0 : i32, i32
  }
  func.func @transform_8(%arg0: i32) -> (i32, i32) {
    %c0_i32 = arith.constant 0 : i32
    %c0_i32_0 = arith.constant 0 : i32
    %c0_i32_1 = arith.constant 0 : i32
    return %c0_i32, %c0_i32_0 : i32, i32
  }
  func.func @transform_9(%arg0: i32) -> (i32, i32) {
    %c0_i32 = arith.constant 0 : i32
    %c0_i32_0 = arith.constant 0 : i32
    %c0_i32_1 = arith.constant 0 : i32
    return %c0_i32, %c0_i32_0 : i32, i32
  }
  func.func @transform_10(%arg0: i32) -> (i32, i32) {
    %c0_i32 = arith.constant 0 : i32
    %c0_i32_0 = arith.constant 0 : i32
    %c0_i32_1 = arith.constant 0 : i32
    return %c0_i32, %c0_i32_0 : i32, i32
  }
  func.func @transform_11(%arg0: i32) -> (i32, i32) {
    %c0_i32 = arith.constant 0 : i32
    %c0_i32_0 = arith.constant 0 : i32
    %c0_i32_1 = arith.constant 0 : i32
    return %c0_i32, %c0_i32_0 : i32, i32
  }
  func.func @transform_12(%arg0: i32) -> (i32, i32) {
    %c0_i32 = arith.constant 0 : i32
    %c0_i32_0 = arith.constant 0 : i32
    %c0_i32_1 = arith.constant 0 : i32
    return %c0_i32, %c0_i32_0 : i32, i32
  }
  func.func @transform_13(%arg0: i32) -> (i32, i32) {
    %c0_i32 = arith.constant 0 : i32
    %c0_i32_0 = arith.constant 0 : i32
    %c0_i32_1 = arith.constant 0 : i32
    return %c0_i32, %c0_i32_0 : i32, i32
  }
  func.func @transform_14(%arg0: i32) -> (i32, i32) {
    %c0_i32 = arith.constant 0 : i32
    %c0_i32_0 = arith.constant 0 : i32
    %c0_i32_1 = arith.constant 0 : i32
    return %c0_i32, %c0_i32_0 : i32, i32
  }
  func.func @transform_15(%arg0: i32) -> (i32, i32, i32) {
    %c0_i32 = arith.constant 0 : i32
    %c0_i32_0 = arith.constant 0 : i32
    %c0_i32_1 = arith.constant 0 : i32
    return %arg0, %c0_i32, %c0_i32_0 : i32, i32, i32
  }
}

</mosaic_0001>

<bundles_post_ra>
// kernel: forward.3
= control target key start
LH: loop header
LB: loop body
LE: loop exit
PB: predicated region body
PF: predicated region fallthrough
CT: control target
= control target key end

     0   :  { %s1567_s20 = smov 0   ;;  %s1785_s0 = inlined_call_operand.vmem [shape: bf16[2,1,648], index: 0, kind: input, shape index: {}]   ;;  %s1786_s1 = inlined_call_operand.vmem [shape: bf16[648,64], index: 1, kind: input, shape index: {}]   ;;  %s1787_s2 = inlined_call_operand.vmem [shape: f32[1,64], index: 2, kind: input, shape index: {}]   ;;  %s1788_s3 = inlined_call_operand.vmem [shape: f32[1,64], index: 3, kind: input, shape index: {}]   ;;  %s1789_s4 = inlined_call_operand.vmem [shape: f32[1,64], index: 4, kind: input, shape index: {}]   ;;  %s1790_s5 = inlined_call_operand.vmem [shape: f32[1,64], index: 5, kind: input, shape index: {}]   ;;  %s1791_s6 = inlined_call_operand.vmem [shape: f32[1,64], index: 6, kind: input, shape index: {}]   ;;  %s1792_s7 = inlined_call_operand.vmem [shape: bf16[64,64], index: 7, kind: input, shape index: {}]   ;;  %s1793_s8 = inlined_call_operand.vmem [shape: f32[1,64], index: 8, kind: input, shape index: {}]   ;;  %s1794_s9 = inlined_call_operand.vmem [shape: f32[1,64], index: 9, kind: input, shape index: {}]   ;;  %s1795_s10 = inlined_call_operand.vmem [shape: f32[1,64], index: 10, kind: input, shape index: {}]   ;;  %s1796_s11 = inlined_call_operand.vmem [shape: bf16[64,64], index: 11, kind: input, shape index: {}]   ;;  %s1797_s12 = inlined_call_operand.vmem [shape: f32[1,64], index: 12, kind: input, shape index: {}]   ;;  %s1798_s13 = inlined_call_operand.vmem [shape: f32[1,64], index: 13, kind: input, shape index: {}]   ;;  %s1799_s14 = inlined_call_operand.<no memory space> [shape: f32[1,1], index: 14, kind: input, shape index: {}]   ;;  %s1800_s15 = inlined_call_operand.vmem [shape: f32[2,1,1], index: 15, kind: output, shape index: {}]  }
   0x1   :  { %v20_v0 = vstv %s1799_s14 }
   0x2   :  { %21 = vst [vmem:[#allocation2] sm:$0x1] %v20_v0 }
   0x3 LB: > { %s1266_s21 = sadd.s32 4294967295, %s1478_s20   ;;  %p1270_p0 = scmp.ge.s32.totalorder %s1478_s20, 1  ;;  %s1478_s20 = sphi %s1567_s20, %s27_s20  }
   0x4   : > { %p438_p1 = scmp.lt.s32.totalorder %s1478_s20, 3 }
   0x6   : > { %p439_p2 = pnand %p1270_p0, %p438_p1 }
   0x7   : > { %v1416_v1 = vld [vmem:[%s1786_s1 + $0x40] sm:$0xff] (!%p439_p2)   ;;  %v1420_v5 = vld [vmem:[%s1786_s1 + $0x48] sm:$0xff] (!%p439_p2)   ;;  %v1424_v9 = vld [vmem:[%s1786_s1 + $0x50] sm:$0xff] (!%p439_p2)   ;;  %p483_p3 = scmp.lt.s32.totalorder (!%p439_p2), %s1266_s21, 1  ;;  %v579_v30 = vlaneseq (!%p439_p2)  ;;  %v1480_v33 = vmov (!%p439_p2), 1966171168  }
   0x8   : > { %442 = sbr.rel (%p439_p2) target bundleno = 1817 (0x719), region = 80  ;;  %v1417_v2 = vld [vmem:[%s1786_s1] sm:$0xff] (!%p439_p2)   ;;  %1325 = vmatprep.subr.bf16.mxu0 (!%p439_p2), %v1416_v1  ;;  %v1421_v6 = vld [vmem:[%s1786_s1 + $0x8] sm:$0xff] (!%p439_p2)   ;;  %v1425_v10 = vld [vmem:[%s1786_s1 + $0x10] sm:$0xff] (!%p439_p2)   ;;  %v577_v34 = vunpack.c.l.s4 (!%p439_p2), %v1480_v33  ;;  %v1481_v37 = vmov (!%p439_p2), 0   ;;  %vm870_vm0 = vcmask (!%p439_p2), 64512  }
   0x9   : > { %v1418_v3 = vld [vmem:[%s1786_s1 + $0xc0] sm:$0xff] (!%p439_p2)   ;;  %1326 = vmatpush3.bf16.msra.mxu0 (!%p439_p2), %v1417_v2  ;;  %v1422_v7 = vld [vmem:[%s1786_s1 + $0xc8] sm:$0xff] (!%p439_p2)   ;;  %v1426_v11 = vld [vmem:[%s1786_s1 + $0xd0] sm:$0xff] (!%p439_p2)   ;;  %v580_v35 = vshrl.u32 (!%p439_p2), %v579_v30, 7  ;;  %vm874_vm1 = vcmask (!%p439_p2), 1043456   ;;  %vm1000_vm2 = vcmask (!%p439_p2), 516096  }
   0xa   : > { %v1419_v4 = vld [vmem:[%s1786_s1 + $0x80] sm:$0xff] (!%p439_p2)   ;;  %1347 = vmatprep.subr.bf16.mxu1 (!%p439_p2), %v1418_v3  ;;  %1327 = vmatprep.subr.bf16.mxu0 (!%p439_p2), %v1420_v5  ;;  %v1423_v8 = vld [vmem:[%s1786_s1 + $0x88] sm:$0xff] (!%p439_p2)   ;;  %v1427_v12 = vld [vmem:[%s1786_s1 + $0x90] sm:$0xff] (!%p439_p2)   ;;  %v578_v40 = vunpack.c.0.s8 (!%p439_p2), %v577_v34  ;;  %vm1483_vm3 = vmmov (!%p439_p2), 0   ;;  %vm1070_vm4 = vcmask (!%p439_p2), 523264   ;;  %vm1217_vm5 = vcmask (!%p439_p2), 0  }
   0xb   : > { %1348 = vmatpush3.bf16.msra.mxu1 (!%p439_p2), %v1419_v4  ;;  %v1428_v13 = vld [vmem:[%s1786_s1 + $0x58] sm:$0xff] (!%p439_p2)   ;;  %v1432_v17 = vld [vmem:[%s1786_s1 + $0x60] sm:$0xff] (!%p439_p2)   ;;  %v1436_v21 = vld [vmem:[%s1786_s1 + $0x68] sm:$0xff] (!%p439_p2)  }
   0xc   : > { %1349 = vmatprep.subr.bf16.mxu1 (!%p439_p2), %v1422_v7  ;;  %v1429_v14 = vld [vmem:[%s1786_s1 + $0x18] sm:$0xff] (!%p439_p2)   ;;  %v1433_v18 = vld [vmem:[%s1786_s1 + $0x20] sm:$0xff] (!%p439_p2)   ;;  %v1437_v22 = vld [vmem:[%s1786_s1 + $0x28] sm:$0xff] (!%p439_p2)   ;;  %v581_v41 = vsub.s32 (!%p439_p2), %v578_v40, %v580_v35 }
   0xd   : > { %1328 = vmatpush3.bf16.msra.mxu0 (!%p439_p2), %v1421_v6  ;;  %v1430_v15 = vld [vmem:[%s1786_s1 + $0xd8] sm:$0xff] (!%p439_p2)   ;;  %v1434_v19 = vld [vmem:[%s1786_s1 + $0xe0] sm:$0xff] (!%p439_p2)   ;;  %v1438_v23 = vld [vmem:[%s1786_s1 + $0xe8] sm:$0xff] (!%p439_p2)  }
   0xe   : > { %1329 = vmatprep.subr.bf16.mxu0 (!%p439_p2), %v1424_v9  ;;  %v1431_v16 = vld [vmem:[%s1786_s1 + $0x98] sm:$0xff] (!%p439_p2)   ;;  %v1435_v20 = vld [vmem:[%s1786_s1 + $0xa0] sm:$0xff] (!%p439_p2)   ;;  %v1439_v24 = vld [vmem:[%s1786_s1 + $0xa8] sm:$0xff] (!%p439_p2)  }
   0xf   : > { %1350 = vmatpush3.bf16.msra.mxu1 %v1423_v8  ;;  %s1802_s21 = smov (!%p483_p3, %s1266_s21), 1  ;;  %v1440_v25 = vld [vmem:[%s1786_s1 + $0x70] sm:$0xff]   ;;  %v1444_v29 = vld [vmem:[%s1786_s1 + $0x78] sm:$0xff]   ;;  %v1449_v47 = vld [vmem:[%s1786_s1 + $0x100] sm:$0xff]  }
  0x10   : > { %1351 = vmatprep.subr.bf16.mxu1 %v1426_v11  ;;  %v1441_v26 = vld [vmem:[%s1786_s1 + $0x30] sm:$0xff]   ;;  %s1403_s18 = smul.u32 6, %s1802_s21  ;;  %v1445_v31 = vld [vmem:[%s1786_s1 + $0x38] sm:$0xff]   ;;  %v1450_v51 = vld [vmem:[%s1786_s1 + $0x108] sm:$0xff]  }
  0x11   : > { %1330 = vmatpush3.bf16.msra.mxu0 %v1425_v10  ;;  %v1442_v27 = vld [vmem:[%s1786_s1 + $0xf0] sm:$0xff]   ;;  %v1446_v32 = vld [vmem:[%s1786_s1 + $0xf8] sm:$0xff]   ;;  %v1453_v55 = vld [vmem:[%s1786_s1 + $0x120] sm:$0xff]  }
  0x12   : > { %1331 = vmatprep.subr.bf16.mxu0 %v1428_v13  ;;  %v1443_v28 = vld [vmem:[%s1786_s1 + $0xb0] sm:$0xff]   ;;  %s486_s30 = scalar_lea.vmem %s1785_s0, %s1403_s18  ;;  %v1448_v36 = vld [vmem:[%s1786_s1 + $0xb8] sm:$0xff]   ;;  %v1454_v56 = vld [vmem:[%s1786_s1 + $0x128] sm:$0xff]   ;;  %s489_s18 = scalar_lea.vmem %s1800_s15, %s1802_s21 }
  0x13   : > { %1352 = vmatpush3.bf16.msra.mxu1 %v1427_v12  ;;  %v491_v38 = vld [vmem:[%s486_s30] sm:$0x3f]  ;;  %v1451_v53 = vld [vmem:[%s1786_s1 + $0x110] sm:$0xff]   ;;  %v1452_v54 = vld [vmem:[%s1786_s1 + $0x118] sm:$0xff]  }
  0x14   : > { %1353 = vmatprep.subr.bf16.mxu1 %v1430_v15  ;;  %v575_v39 = vcombine.high %v491_v38, %v491_v38  ;;  %v582_v42 = vrot.slane %v491_v38, %v581_v41  ;;  %v1455_v57 = vld [vmem:[%s1786_s1 + $0x130] sm:$0xff]   ;;  %v1456_v58 = vld [vmem:[%s1786_s1 + $0x138] sm:$0xff]   ;;  %v1457_v59 = vld [vmem:[%s1786_s1 + $0x140] ss:$0 sps:$4 sm:$0xff]  }
  0x15   : > { %1332 = vmatpush3.bf16.msra.mxu0 %v1429_v14  ;;  %v876_v60 = vsel %vm874_vm1, %v1457_v59, 0  ;;  %v573_v63 = vld [vmem:[%s1787_s2] sm:$0x1]  ;;  %v1459_v40 = vld [vmem:[%s1792_s7 + $0x8] sm:$0xff]  }
  0x16   : > { %1333 = vmatprep.subr.bf16.mxu0 %v1432_v17  ;;  %v589_v43 = vrot.slane %v575_v39, %v581_v41  ;;  %v590_v44 = vcombine.high %v582_v42, %v582_v42  ;;  %v598_v45 = vrot.slane %v582_v42, %v581_v41  ;;  %v1458_v38 = vld [vmem:[%s1792_s7] sm:$0xff]   ;;  %v1482_v39 = vmov 0.0   ;;  %v1461_v42 = vld [vmem:[%s1792_s7 + $0x18] sm:$0xff]  }
  0x17   : > { %1354 = vmatpush3.bf16.msra.mxu1 %v1431_v16 }
  0x18   : > { %1355 = vmatprep.subr.bf16.mxu1 %v1434_v19  ;;  %v591_v46 = vcombine.high %v589_v43, %v589_v43  ;;  %v612_v48 = vrot.slane %v590_v44, %v581_v41  ;;  %v620_v49 = vcombine.high %v598_v45, %v598_v45  ;;  %v605_v61 = vrot.slane %v589_v43, %v581_v41 }
  0x19   : > { %1334 = vmatpush3.bf16.msra.mxu0 %v1433_v18 }
  0x1a   : > { %1335 = vmatprep.subr.bf16.mxu0 %v1436_v21  ;;  %910 = vmatprep.mubr.bf16.mxu0 %v612_v48  ;;  %v621_v50 = vcombine.high %v612_v48, %v612_v48  ;;  %v619_v52 = vrot.slane %v591_v46, %v581_v41  ;;  %v1460_v41 = vld [vmem:[%s1792_s7 + $0x10] sm:$0xff]  }
  0x1b   : > { %1356 = vmatpush3.bf16.msra.mxu1 %v1435_v20 }
  0x1c   : > { %1357 = vmatprep.subr.bf16.mxu1 %v1438_v23  ;;  %950 = vmatprep.mubr.bf16.mxu1 %v621_v50 }
  0x1d   : > { %1336 = vmatpush3.bf16.msra.mxu0 %v1437_v22 }
  0x1e   : > { %1337 = vmatprep.subr.bf16.mxu0 %v1440_v25 }
  0x1f   : > { %1358 = vmatpush3.bf16.msra.mxu1 %v1439_v24 }
  0x20   : > { %1359 = vmatprep.subr.bf16.mxu1 %v1442_v27 }
  0x21   : > { %1338 = vmatpush3.bf16.msra.mxu0 %v1441_v26  ;;  %v998_v26 = vld [vmem:[%s1788_s3] sm:$0x1] }
  0x22   : > { %1339 = vmatprep.subr.bf16.mxu0 %v1444_v29 }
  0x23   : > { %1360 = vmatpush3.bf16.msra.mxu1 %v1443_v28  ;;  %v999_v28 = vld [vmem:[%s1789_s4] sm:$0x1] }
  0x24   : > { %1361 = vmatprep.subr.bf16.mxu1 %v1446_v32 }
  0x25   : > { %1340 = vmatpush3.bf16.msra.mxu0 %v1445_v31 }
  0x26   : > { %958 = vmatprep.subr.bf16.mxu0 %v1481_v37 }
  0x27   : > { %1362 = vmatpush3.bf16.msra.mxu1 %v1448_v36 }
  0x28   : > { %911 = vmatmul.mubr.bf16.vlgmr.msra.gmra.mrb[0].mxu0 %v598_v45  ;;  %1379 = vmatprep.subr.bf16.mxu1 %v1482_v39 }
  0x29   : > { %959 = vmatpush1.bf16.msra.mxu0 %v1449_v47  ;;  %1312 = vmatprep.mubr.msk.bf16.mxu0 %vm870_vm0, %v619_v52  ;;  %v1018_v47 = vld [vmem:[%s1790_s5] sm:$0x1] }
  0x2a   : > { %951 = vmatmul.mubr.bf16.vlgmr.msra.gmra.mrb[0].mxu1 %v620_v49  ;;  %960 = vmatprep.subr.bf16.mxu0 %v1481_v37  ;;  %v1019_v49 = vld [vmem:[%s1791_s6] sm:$0x1] }
  0x2b   : > { %1380 = vmatpush3.bf16.msra.mxu1 %v1458_v38  ;;  %1387 = vmatprep.mubr.msk.bf16.mxu1 %vm1483_vm3, %v1482_v39 }
  0x2c   : > { %1381 = vmatprep.subr.bf16.mxu1 %v1482_v39 }
  0x2d   : > { %961 = vmatpush1.bf16.msra.mxu0 %v1450_v51 }
  0x2e   : > { %962 = vmatprep.subr.bf16.mxu0 %v1481_v37 }
  0x2f   : > { %1382 = vmatpush3.bf16.msra.mxu1 %v1459_v40 }
  0x30   : > { %1383 = vmatprep.subr.bf16.mxu1 %v1482_v39 }
  0x31   : > { %963 = vmatpush1.bf16.msra.mxu0 %v1451_v53 }
  0x32   : > { %964 = vmatprep.subr.bf16.mxu0 %v1481_v37 }
  0x33   : > { %1384 = vmatpush3.bf16.msra.mxu1 %v1460_v41 }
  0x34   : > { %1385 = vmatprep.subr.bf16.mxu1 %v1482_v39 }
  0x35   : > { %965 = vmatpush1.bf16.msra.mxu0 %v1452_v54  ;;  %v1045_v54 = vld [vmem:[%s1793_s8] sm:$0x1] }
  0x36   : > { %966 = vmatprep.subr.bf16.mxu0 %v1481_v37 }
  0x37   : > { %1386 = vmatpush3.bf16.msra.mxu1 %v1461_v42 }
  0x38   : > { %1391 = vmatprep.subr.bf16.mxu1 %v1482_v39 }
  0x39   : > { %967 = vmatpush1.bf16.msra.mxu0 %v1453_v55 }
  0x3a   : > { %968 = vmatprep.subr.bf16.mxu0 %v1481_v37 }
  0x3d   : > { %969 = vmatpush1.bf16.msra.mxu0 %v1454_v56 }
  0x3e   : > { %970 = vmatprep.subr.bf16.mxu0 %v1481_v37 }
  0x41   : > { %971 = vmatpush1.bf16.msra.mxu0 %v1455_v57 }
  0x42   : > { %972 = vmatprep.subr.bf16.mxu0 %v1481_v37 }
  0x45   : > { %973 = vmatpush1.bf16.msra.mxu0 %v1456_v58 }
  0x46   : > { %974 = vmatprep.subr.bf16.mxu0 %v1481_v37 }
  0x49   : > { %975 = vmatpush1.bf16.msra.mxu0 %v876_v60 }
  0x4c   : > { %991 = vmatmul.mubr.bf16.vlgmr.msra.gmra.mrb[4].mxu0 %v605_v61 }
  0xfb   : > { %v1341_v62 = vpop.f32.mrb[0].mxu0 }
  0xfc   : > { %v1342_v0 = vpop.f32.mrb[1].mxu0 }
  0xfd   : > { %v1343_v1 = vadd.f32 %v1342_v0, %v1341_v62  ;;  %v1344_v2 = vpop.f32.mrb[2].mxu0  ;;  %v1363_v3 = vpop.f32.mrb[0].mxu1 }
  0xfe   : > { %v1345_v4 = vpop.f32.mrb[3].mxu0  ;;  %v1364_v5 = vpop.f32.mrb[1].mxu1  ;;  %v1462_v2 = vld [vmem:[%s1796_s11] sm:$0xff]  }
  0xff   : > { %v913_v6 = vadd.f32 %v1343_v1, %v573_v63  ;;  %v1365_v7 = vadd.f32 %v1364_v5, %v1363_v3  ;;  %v1366_v8 = vpop.f32.mrb[2].mxu1  ;;  %v1463_v3 = vld [vmem:[%s1796_s11 + $0x8] sm:$0xff]   ;;  %v1464_v4 = vld [vmem:[%s1796_s11 + $0x10] sm:$0xff]   ;;  %v1465_v5 = vld [vmem:[%s1796_s11 + $0x18] sm:$0xff]  }
 0x100   : > { %v1367_v9 = vpop.f32.mrb[3].mxu1 }
 0x101   : > { %v953_v10 = vadd.f32 %v1365_v7, %v913_v6 }
 0x11f   : > { %v992_v11 = vpop.f32.mrb[4].mxu0 }
 0x120   : > { %v993_v12 = vadd.f32 %v992_v11, %v953_v10  ;;  %v994_v13 = vpop.f32.mrb[5].mxu0  ;;  %v1114_v10 = vld [vmem:[%s1794_s9] sm:$0x1] }
 0x121   : > { %v995_v14 = vpop.f32.mrb[6].mxu0 }
 0x122   : > { %v996_v15 = vpop.f32.mrb[7].mxu0  ;;  %v1001_v16 = vsel %vm1000_vm2, %v993_v12, 0.0 }
 0x123   : > { %1002 = vadd.xlane.f32.xlu0 %v1001_v16 }
 0x1b0   : > { %v1003_v17 = vpop.xlane.xlu0 %1002 }
 0x1b1   : > { %v1005_v18 = vmul.f32 0.015625, %v1003_v17  ;;  %v1141_v17 = vld [vmem:[%s1797_s12] sm:$0x1] }
 0x1b3   : > { %v1006_v19 = vsub.f32 %v993_v12, %v1005_v18  ;;  %v1115_v12 = vld [vmem:[%s1795_s10] sm:$0x1] }
 0x1b5   : > { %v1007_v20 = vmul.f32 %v1006_v19, %v1006_v19 }
 0x1b7   : > { %v1008_v21 = vsel %vm1000_vm2, %v1007_v20, 0.0 }
 0x1b8   : > { %1009 = vadd.xlane.f32.xlu0 %v1008_v21 }
 0x245   : > { %v1010_v22 = vpop.xlane.xlu0 %1009 }
 0x246   : > { %v1011_v23 = vmul.f32 0.015625, %v1010_v22  ;;  %v1210_v22 = vld [vmem:[%s1798_s13] sm:$0x1] }
 0x248   : > { %v1012_v24 = vadd.f32 1e-05, %v1011_v23 }
 0x24a   : > { %1466 = vrsqrt.f32 %v1012_v24 }
 0x254   : > { %v1467_v25 = vpop.eup %1466 }
 0x255   : > { %v1014_v27 = vmul.f32 %v1467_v25, %v1006_v19 }
 0x257   : > { %v1015_v29 = vmul.f32 %v1014_v27, %v998_v26  ;;  %v1215_v27 = vld [vmem:[#allocation2] sm:$0x1] }
 0x259   : > { %v1016_v30 = vadd.f32 %v1015_v29, %v999_v28 }
 0x25b   : > { %v1719_v31 = vmax.f32 %v1016_v30, 0.0 }
 0x25d   : > { %v1020_v32 = vsel %vm1000_vm2, %v1719_v31, 0.0 }
 0x25e   : > { %1021 = vadd.xlane.f32.xlu1 %v1020_v32 }
 0x2eb   : > { %v1022_v33 = vpop.xlane.xlu1 %1021 }
 0x2ec   : > { %v1023_v34 = vmul.f32 0.015625, %v1022_v33 }
 0x2ee   : > { %v1024_v35 = vsub.f32 %v1719_v31, %v1023_v34 }
 0x2f0   : > { %v1025_v36 = vmul.f32 %v1024_v35, %v1024_v35 }
 0x2f2   : > { %v1026_v37 = vsel %vm1000_vm2, %v1025_v36, 0.0 }
 0x2f3   : > { %1027 = vadd.xlane.f32.xlu1 %v1026_v37 }
 0x380   : > { %v1028_v43 = vpop.xlane.xlu1 %1027 }
 0x381   : > { %v1029_v44 = vmul.f32 0.015625, %v1028_v43 }
 0x383   : > { %v1030_v45 = vadd.f32 1e-05, %v1029_v44 }
 0x385   : > { %1468 = vrsqrt.f32 %v1030_v45 }
 0x38f   : > { %v1469_v46 = vpop.eup %1468 }
 0x390   : > { %v1032_v48 = vmul.f32 %v1469_v46, %v1024_v35 }
 0x392   : > { %v1033_v50 = vmul.f32 %v1032_v48, %v1018_v47 }
 0x394   : > { %v1034_v51 = vadd.f32 %v1033_v50, %v1019_v49 }
 0x396   : > { %v1035_v52 = vmax.f32 %v1034_v51, 0.0 }
 0x398   : > { %v1036_v53 = vpack.c.bf16 %v1035_v52, %v1035_v52 }
 0x39a   : > { %1388 = vmatmul.mubr.msk.bf16.vlgmr.msra.gmra.mrb[4].mxu1 %vm1070_vm4, %v1036_v53 }
 0x39b   : > { %1399 = vmatprep.mubr.msk.bf16.mxu1 %vm1483_vm3, %v1482_v39  ;;  %1392 = vmatpush3.bf16.msra.mxu1 %v1462_v2 }
 0x39c   : > { %1393 = vmatprep.subr.bf16.mxu1 %v1482_v39 }
 0x39f   : > { %1394 = vmatpush3.bf16.msra.mxu1 %v1463_v3 }
 0x3a0   : > { %1395 = vmatprep.subr.bf16.mxu1 %v1482_v39 }
 0x3a3   : > { %1396 = vmatpush3.bf16.msra.mxu1 %v1464_v4 }
 0x3a4   : > { %1397 = vmatprep.subr.bf16.mxu1 %v1482_v39 }
 0x3a7   : > { %1398 = vmatpush3.bf16.msra.mxu1 %v1465_v5 }
 0x46d   : > { %v1108_v55 = vpop.f32.mrb[4].mxu1 }
 0x46e   : > { %v1109_v56 = vadd.f32 %v1108_v55, %v1045_v54  ;;  %v1389_v57 = vpop.f32.mrb[5].mxu1 }
 0x46f   : > { %v1111_v58 = vpop.f32.mrb[6].mxu1 }
 0x470   : > { %v1390_v59 = vpop.f32.mrb[7].mxu1  ;;  %v1116_v60 = vsel %vm1000_vm2, %v1109_v56, 0.0 }
 0x471   : > { %1117 = vadd.xlane.f32.xlu0 %v1116_v60 }
 0x4fe   : > { %v1118_v61 = vpop.xlane.xlu0 %1117 }
 0x4ff   : > { %v1119_v62 = vmul.f32 0.015625, %v1118_v61 }
 0x501   : > { %v1120_v63 = vsub.f32 %v1109_v56, %v1119_v62 }
 0x503   : > { %v1121_v0 = vmul.f32 %v1120_v63, %v1120_v63 }
 0x505   : > { %v1122_v1 = vsel %vm1000_vm2, %v1121_v0, 0.0 }
 0x506   : > { %1123 = vadd.xlane.f32.xlu1 %v1122_v1 }
 0x593   : > { %v1124_v6 = vpop.xlane.xlu1 %1123 }
 0x594   : > { %v1125_v7 = vmul.f32 0.015625, %v1124_v6 }
 0x596   : > { %v1126_v8 = vadd.f32 1e-05, %v1125_v7 }
 0x598   : > { %1470 = vrsqrt.f32 %v1126_v8 }
 0x5a2   : > { %v1471_v9 = vpop.eup %1470 }
 0x5a3   : > { %v1128_v11 = vmul.f32 %v1471_v9, %v1120_v63 }
 0x5a5   : > { %v1129_v13 = vmul.f32 %v1128_v11, %v1114_v10 }
 0x5a7   : > { %v1130_v14 = vadd.f32 %v1129_v13, %v1115_v12 }
 0x5a9   : > { %v1131_v15 = vmax.f32 %v1130_v14, 0.0 }
 0x5ab   : > { %v1132_v16 = vpack.c.bf16 %v1131_v15, %v1131_v15 }
 0x5ad   : > { %1400 = vmatmul.mubr.msk.bf16.vlgmr.msra.gmra.mrb[8].mxu1 %vm1070_vm4, %v1132_v16 }
 0x680   : > { %v1203_v18 = vpop.f32.mrb[8].mxu1 }
 0x681   : > { %v1204_v19 = vadd.f32 %v1203_v18, %v1141_v17  ;;  %v1401_v20 = vpop.f32.mrb[9].mxu1 }
 0x682   : > { %v1206_v21 = vpop.f32.mrb[10].mxu1 }
 0x683   : > { %v1209_v23 = vadd.f32 %v1204_v19, %v1719_v31  ;;  %v1402_v24 = vpop.f32.mrb[11].mxu1 }
 0x685   : > { %v1211_v25 = vmul.f32 %v1210_v22, %v1209_v23 }
 0x687   : > { %v1212_v26 = vsel %vm1000_vm2, %v1211_v25, 0.0 }
 0x688   : > { %1213 = vadd.xlane.f32.xlu0 %v1212_v26 }
 0x715   : > { %v1214_v28 = vpop.xlane.xlu0 %1213 }
 0x716   : > { %v1216_v29 = vadd.f32 %v1215_v27, %v1214_v28 }
 0x718   : > { %1218 = vst.msk [vmem:[%s489_s18] sm:$0x1] %vm1217_vm5, %v1216_v29 }
 0x719 PF: > { %s27_s20 = sadd.s32 1, %s1478_s20  }
 0x71a   : > { %p24_p4 = scmp.ge.s32.totalorder %s27_s20, 4  }
 0x71c   :  { %26 = sbr.rel (!%p24_p4) target bundleno = 3 (0x3), region = 110 }

// kernel: forward.2
= control target key start
LH: loop header
LB: loop body
LE: loop exit
PB: predicated region body
PF: predicated region fallthrough
CT: control target
= control target key end

     0   :  { %s6663_s0 = inlined_call_operand.hbm [shape: f32[2,8,1024], index: 0, kind: input, shape index: {}]   ;;  %s6664_s1 = inlined_call_operand.hbm [shape: f32[2,8,1024], index: 1, kind: input, shape index: {}]   ;;  %s6665_s2 = inlined_call_operand.hbm [shape: bf16[1024,32], index: 2, kind: input, shape index: {}]   ;;  %s6666_s3 = inlined_call_operand.hbm [shape: f32[1,32], index: 3, kind: input, shape index: {}]   ;;  %s6667_s4 = inlined_call_operand.hbm [shape: bf16[1024,32], index: 4, kind: input, shape index: {}]   ;;  %s6668_s5 = inlined_call_operand.hbm [shape: f32[1,32], index: 5, kind: input, shape index: {}]   ;;  %s6669_s6 = inlined_call_operand.hbm [shape: f32[1,8,32], index: 6, kind: input, shape index: {}]   ;;  %s6670_s7 = inlined_call_operand.hbm [shape: f32[1,8,32], index: 7, kind: input, shape index: {}]   ;;  %s6671_s8 = inlined_call_operand.hbm [shape: bf16[32,96], index: 8, kind: input, shape index: {}]   ;;  %s6672_s9 = inlined_call_operand.hbm [shape: f32[1,96], index: 9, kind: input, shape index: {}]   ;;  %s6673_s10 = inlined_call_operand.hbm [shape: bf16[32,96], index: 10, kind: input, shape index: {}]   ;;  %s6674_s11 = inlined_call_operand.hbm [shape: f32[1,96], index: 11, kind: input, shape index: {}]   ;;  %s6675_s12 = inlined_call_operand.hbm [shape: bf16[32,32], index: 12, kind: input, shape index: {}]   ;;  %s6676_s13 = inlined_call_operand.hbm [shape: f32[1,32], index: 13, kind: input, shape index: {}]   ;;  %s6677_s14 = inlined_call_operand.hbm [shape: bf16[32,32], index: 14, kind: input, shape index: {}]   ;;  %s6678_s15 = inlined_call_operand.hbm [shape: f32[1,32], index: 15, kind: input, shape index: {}]   ;;  %s6679_s16 = inlined_call_operand.hbm [shape: f32[1,32], index: 16, kind: input, shape index: {}]   ;;  %s6680_s17 = inlined_call_operand.hbm [shape: f32[1,32], index: 17, kind: input, shape index: {}]   ;;  %s6681_s18 = inlined_call_operand.hbm [shape: f32[1,32], index: 18, kind: input, shape index: {}]   ;;  %s6682_s19 = inlined_call_operand.hbm [shape: f32[1,32], index: 19, kind: input, shape index: {}]   ;;  %s6683_s20 = inlined_call_operand.hbm [shape: bf16[2,16,32], index: 20, kind: output, shape index: {}]  }
   0x1   :  { %6710 = sst [smem:[#allocation54_spill]] %s6663_s0 }
   0x2   :  { %6711 = sst [smem:[#allocation55_spill]] %s6664_s1 }
   0x3   :  { %6712 = sst [smem:[#allocation56_spill]] %s6665_s2 }
   0x4   :  { %6713 = sst [smem:[#allocation57_spill]] %s6666_s3 }
   0x5   :  { %6714 = sst [smem:[#allocation58_spill]] %s6667_s4 }
   0x6   :  { %6715 = sst [smem:[#allocation59_spill]] %s6668_s5 }
   0x7   :  { %6716 = sst [smem:[#allocation60_spill]] %s6669_s6 }
   0x8   :  { %6717 = sst [smem:[#allocation61_spill]] %s6670_s7 }
   0x9   :  { %6718 = sst [smem:[#allocation62_spill]] %s6671_s8 }
   0xa   :  { %6719 = sst [smem:[#allocation63_spill]] %s6672_s9 }
   0xb   :  { %6720 = sst [smem:[#allocation64_spill]] %s6673_s10 }
   0xc   :  { %6721 = sst [smem:[#allocation65_spill]] %s6674_s11 }
   0xd   :  { %6722 = sst [smem:[#allocation66_spill]] %s6675_s12 }
   0xe   :  { %6723 = sst [smem:[#allocation67_spill]] %s6676_s13 }
   0xf   :  { %6724 = sst [smem:[#allocation68_spill]] %s6677_s14 }
  0x10   :  { %6725 = sst [smem:[#allocation69_spill]] %s6679_s16 }
  0x11   :  { %6726 = sst [smem:[#allocation70_spill]] %s6681_s18 }
  0x12   :  { %6727 = sst [smem:[#allocation71_spill]] %s6682_s19 }
  0x13   :  { %6728 = sst [smem:[#allocation72_spill]] %s6683_s20 }
  0x14   :  { %25 = vsyncpa [#allocation3], 0 }
  0x15   :  { %27 = vsyncpa [#allocation3 + $0x1], 0 }
  0x16   :  { %28 = vsyncpa [#allocation6], 0 }
  0x17   :  { %30 = vsyncpa [#allocation6 + $0x1], 0 }
  0x18   :  { %31 = vsyncpa [#allocation9], 0 }
  0x19   :  { %32 = vsyncpa [#allocation12], 0 }
  0x1a   :  { %33 = vsyncpa [#allocation15], 0 }
  0x1b   :  { %34 = vsyncpa [#allocation18], 0 }
  0x1c   :  { %35 = vsyncpa [#allocation21], 0 }
  0x1d   :  { %36 = vsyncpa [#allocation24], 0 }
  0x1e   :  { %37 = vsyncpa [#allocation27], 0 }
  0x1f   :  { %38 = vsyncpa [#allocation30], 0 }
  0x20   :  { %39 = vsyncpa [#allocation33], 0 }
  0x21   :  { %40 = vsyncpa [#allocation4], 0 }
  0x22   :  { %42 = vsyncpa [#allocation4 + $0x1], 0  ;;  %s5746_s1 = smov 0   ;;  %s5748_s22 = smov 0  }
  0x23   :  { %s5750_s23 = smov 0   ;;  %s5752_s24 = smov 0  }
  0x24 LB: > { %6729 = sst [smem:[#allocation48_spill]] %s5587_s1  ;;  %s5601_s2 = smov [#allocation7]   ;;  %s5599_s24 = sphi %s5752_s24, %s6158_s24   ;;  %s5595_s23 = sphi %s5750_s23, %s6806_s23   ;;  %s5591_s22 = sphi %s5748_s22, %s6805_s22   ;;  %s5587_s1 = sphi %s5746_s1, %s6802_s1  }
  0x25   : > { %6730 = sst [smem:[#allocation49_spill]] %s5591_s22  ;;  %s521_s25 = sshll.u32 %s5601_s2, 4  ;;  %s5772_s25 = int_to_ptr.vmem [resolvable:$true] %s521_s25 }
  0x26   : > { %6731 = sst [smem:[#allocation50_spill]] %s5595_s23  ;;  %s5767_s3 = sadd.s32 4294967295, %s5599_s24  }
  0x27   : > { %6732 = sst [smem:[#allocation51_spill]] %s5599_s24  ;;  %p3917_p0 = scmp.ge.s32.totalorder %s5599_s24, 1 }
  0x28   : > { %6733 = sst [smem:[#allocation52_spill]] %s5767_s3  ;;  %p6701_p1 = scmp.eq.s32.totalorder %s5767_s3, 0 }
  0x29   : > { %p509_p2 = scmp.lt.s32.totalorder %s5599_s24, 3  ;;  %s5602_s27 = smov [#allocation8]  }
  0x2a   : > { %s535_s28 = sshll.u32 %s5602_s27, 4  ;;  %s5603_s29 = smov [#allocation11]   ;;  %s5787_s28 = int_to_ptr.vmem [resolvable:$true] %s535_s28 }
  0x2b   : > { %p5774_p3 = pnand %p3917_p0, %p509_p2  ;;  %s559_s30 = sshll.u32 %s5603_s29, 4  ;;  %s5789_s30 = int_to_ptr.vmem [resolvable:$true] %s559_s30 }
  0x2c   : > { %s6737_s2 = sld [smem:[#allocation56_spill]] }
  0x2d   : > { %s6734_s26 = scalar_select %p5774_p3, 1, 0 }
  0x2e   : > { %p4565_p5 = pneg %p5774_p3 }
  0x2f   : > { %6735 = sst [smem:[#allocation53_spill]] %s6734_s26 }
  0x30   : > { %p5783_p6 = pnand %p4565_p5, %p6701_p1 }
  0x32   : > { %s4925_s20 = scalar_lea.hbm %s6737_s2, 8192  ;;  %p5799_p8 = pneg %p5783_p6 }
  0x33   : > { %p4926_p7 = scmp.ne.s32.totalorder %s6737_s2, %s4925_s20  ;;  %p4932_p11 = scmp.lt.u32.totalorder %s4925_s20, %s6737_s2 }
  0x35   : > { %p4928_p9 = pnand %p5799_p8, %p4926_p7 }
  0x37   : > { %p4929_p10 = pneg %p4928_p9 }
  0x39   : > { %p4934_p12 = pnand %p4932_p11, %p4929_p10 }
  0x3b   : > { %4937 = shalt.err (!%p4934_p12)
}
  0x3c   : > { %s4938_s1 = scalar_lea.vmem %s5772_s25, 8192  ;;  %p4946_p5 = scmp.lt.s32.totalorder %s5772_s25, %s5772_s25 }
  0x3d   : > { %p4939_p13 = scmp.ne.s32.totalorder %s5772_s25, %s4938_s1  ;;  %p4947_p4 = scmp.lt.s32.totalorder %s4938_s1, %s4938_s1 }
  0x3f   : > { %p4941_p0 = pnand %p4939_p13, %p5799_p8  ;;  %p4948_p7 = por %p4947_p4, %p4946_p5 }
  0x41   : > { %p4942_p2 = pneg %p4941_p0 }
  0x43   : > { %p4949_p9 = pnand %p4948_p7, %p4942_p2 }
  0x45   : > { %4952 = shalt.err (!%p4949_p9)
}
  0x46   : > { %s6703_s26 = smov 64   ;;  %s6705_s20 = smov 4  }
  0x47   : > { %4568 = dma.hbm_to_vmem [thread:$0]  (!%p5783_p6), %s6737_s2, 8192, %s5772_s25, [#allocation6], %s6703_s26, %s6703_s26, %s6705_s20  }
  0x48   : > { %s6739_s22 = sld [smem:[#allocation57_spill]] }
  0x4e   : > { %s6740_s19 = smov %s6739_s22  ;;  %s4953_s1 = scalar_lea.hbm %s6739_s22, 16 }
  0x4f   : > { %p4954_p4 = scmp.ne.s32.totalorder %s6740_s19, %s4953_s1  ;;  %p4960_p12 = scmp.lt.u32.totalorder %s4953_s1, %s6740_s19 }
  0x51   : > { %p4956_p10 = pnand %p4954_p4, %p5799_p8 }
  0x53   : > { %p4957_p11 = pneg %p4956_p10 }
  0x55   : > { %p4962_p13 = pnand %p4960_p12, %p4957_p11 }
  0x57   : > { %4965 = shalt.err (!%p4962_p13)
}
  0x58   : > { %s4966_s25 = scalar_lea.vmem %s5787_s28, 16  ;;  %s4973_s22 = scalar_lea.vmem %s5787_s28, 32 }
  0x59   : > { %p4967_p0 = scmp.ne.s32.totalorder %s5787_s28, %s4966_s25  ;;  %p4974_p7 = scmp.lt.s32.totalorder %s5787_s28, %s5787_s28 }
  0x5a   : > { %p4975_p9 = scmp.lt.s32.totalorder %s4973_s22, %s4966_s25 }
  0x5b   : > { %p4969_p2 = pnand %p4967_p0, %p5799_p8 }
  0x5c   : > { %p4976_p4 = por %p4975_p9, %p4974_p7 }
  0x5d   : > { %p4970_p5 = pneg %p4969_p2 }
  0x5f   : > { %p4977_p10 = pnand %p4976_p4, %p4970_p5 }
  0x61   : > { %4980 = shalt.err (!%p4977_p10)
}
  0x62   : > { %4571 = dma.hbm_to_vmem [thread:$0]  (!%p5783_p6), %s6740_s19, 16, %s5787_s28, [#allocation9]  }
  0x63   : > { %s6741_s5 = sld [smem:[#allocation59_spill]] }
  0x69   : > { %s4981_s3 = scalar_lea.hbm %s6741_s5, 16 }
  0x6a   : > { %p4982_p11 = scmp.ne.s32.totalorder %s6741_s5, %s4981_s3  ;;  %p4988_p0 = scmp.lt.u32.totalorder %s4981_s3, %s6741_s5 }
  0x6c   : > { %p4984_p12 = pnand %p4982_p11, %p5799_p8 }
  0x6e   : > { %p4985_p13 = pneg %p4984_p12 }
  0x70   : > { %p4990_p2 = pnand %p4988_p0, %p4985_p13 }
  0x72   : > { %4993 = shalt.err (!%p4990_p2)
}
  0x73   : > { %s4994_s28 = scalar_lea.vmem %s5789_s30, 16  ;;  %s5001_s25 = scalar_lea.vmem %s5789_s30, 32 }
  0x74   : > { %p4995_p5 = scmp.ne.s32.totalorder %s5789_s30, %s4994_s28  ;;  %p5002_p4 = scmp.lt.s32.totalorder %s5789_s30, %s5789_s30 }
  0x75   : > { %p5003_p10 = scmp.lt.s32.totalorder %s5001_s25, %s4994_s28 }
  0x76   : > { %p4997_p7 = pnand %p4995_p5, %p5799_p8 }
  0x77   : > { %p5004_p11 = por %p5003_p10, %p5002_p4 }
  0x78   : > { %p4998_p9 = pneg %p4997_p7 }
  0x7a   : > { %p5005_p12 = pnand %p5004_p11, %p4998_p9 }
  0x7c   : > { %5008 = shalt.err (!%p5005_p12)
}
  0x7d   : > { %4577 = dma.hbm_to_vmem [thread:$0]  (!%p5783_p6), %s6741_s5, 16, %s5789_s30, [#allocation12]  }
  0x7e   : > { %s5606_s18 = smov [#allocation14]   ;;  %s5607_s24 = smov [#allocation17]  }
  0x7f   : > { %s581_s23 = sshll.u32 %s5606_s18, 4  ;;  %s605_s3 = sshll.u32 %s5607_s24, 4  ;;  %s582_s23 = int_to_ptr.vmem [resolvable:$true] %s581_s23  ;;  %s606_s3 = int_to_ptr.vmem [resolvable:$true] %s605_s3 }
  0x80   : > { %s6742_s7 = sld [smem:[#allocation61_spill]] }
  0x86   : > { %s5009_s29 = scalar_lea.hbm %s6742_s7, 128 }
  0x87   : > { %p5010_p13 = scmp.ne.s32.totalorder %s6742_s7, %s5009_s29  ;;  %p5016_p5 = scmp.lt.u32.totalorder %s5009_s29, %s6742_s7 }
  0x89   : > { %p5012_p0 = pnand %p5010_p13, %p5799_p8 }
  0x8b   : > { %p5013_p2 = pneg %p5012_p0 }
  0x8d   : > { %p5018_p7 = pnand %p5016_p5, %p5013_p2 }
  0x8f   : > { %5021 = shalt.err (!%p5018_p7)
}
  0x90   : > { %s5022_s30 = scalar_lea.vmem %s582_s23, 128  ;;  %p5030_p11 = scmp.lt.s32.totalorder %s582_s23, %s582_s23 }
  0x91   : > { %p5023_p9 = scmp.ne.s32.totalorder %s582_s23, %s5022_s30  ;;  %p5031_p12 = scmp.lt.s32.totalorder %s5022_s30, %s5022_s30 }
  0x93   : > { %p5025_p4 = pnand %p5023_p9, %p5799_p8  ;;  %p5032_p1 = por %p5031_p12, %p5030_p11 }
  0x95   : > { %p5026_p10 = pneg %p5025_p4 }
  0x97   : > { %p5033_p3 = pnand %p5032_p1, %p5026_p10 }
  0x99   : > { %5036 = shalt.err (!%p5033_p3)
}
  0x9a   : > { %4583 = dma.hbm_to_vmem [thread:$0]  (!%p5783_p6), %s6742_s7, 128, %s582_s23, [#allocation15]  }
  0x9b   : > { %s6743_s9 = sld [smem:[#allocation63_spill]] }
  0xa1   : > { %s5037_s21 = scalar_lea.hbm %s6743_s9, 16 }
  0xa2   : > { %p5038_p13 = scmp.ne.s32.totalorder %s6743_s9, %s5037_s21  ;;  %p5044_p3 = scmp.lt.u32.totalorder %s5037_s21, %s6743_s9 }
  0xa4   : > { %p5040_p0 = pnand %p5038_p13, %p5799_p8 }
  0xa6   : > { %p5041_p1 = pneg %p5040_p0 }
  0xa8   : > { %p5046_p2 = pnand %p5044_p3, %p5041_p1 }
  0xaa   : > { %5049 = shalt.err (!%p5046_p2)
}
  0xab   : > { %s5050_s22 = scalar_lea.vmem %s606_s3, 16  ;;  %s5057_s23 = scalar_lea.vmem %s606_s3, 32 }
  0xac   : > { %p5051_p5 = scmp.ne.s32.totalorder %s606_s3, %s5050_s22  ;;  %p5058_p4 = scmp.lt.s32.totalorder %s606_s3, %s606_s3 }
  0xad   : > { %p5059_p10 = scmp.lt.s32.totalorder %s5057_s23, %s5050_s22 }
  0xae   : > { %p5053_p7 = pnand %p5051_p5, %p5799_p8 }
  0xaf   : > { %p5060_p11 = por %p5059_p10, %p5058_p4 }
  0xb0   : > { %p5054_p9 = pneg %p5053_p7 }
  0xb2   : > { %p5061_p12 = pnand %p5060_p11, %p5054_p9 }
  0xb4   : > { %5064 = shalt.err (!%p5061_p12)
}
  0xb5   : > { %4589 = dma.hbm_to_vmem [thread:$0]  (!%p5783_p6), %s6743_s9, 16, %s606_s3, [#allocation18]  }
  0xb6   : > { %s5608_s18 = smov [#allocation20]   ;;  %s5609_s0 = smov [#allocation23]  }
  0xb7   : > { %s629_s24 = sshll.u32 %s5608_s18, 4  ;;  %s653_s21 = sshll.u32 %s5609_s0, 4  ;;  %s630_s24 = int_to_ptr.vmem [resolvable:$true] %s629_s24  ;;  %s654_s21 = int_to_ptr.vmem [resolvable:$true] %s653_s21 }
  0xb8   : > { %s6744_s11 = sld [smem:[#allocation65_spill]] }
  0xbe   : > { %s5065_s28 = scalar_lea.hbm %s6744_s11, 16 }
  0xbf   : > { %p5066_p13 = scmp.ne.s32.totalorder %s6744_s11, %s5065_s28  ;;  %p5072_p3 = scmp.lt.u32.totalorder %s5065_s28, %s6744_s11 }
  0xc1   : > { %p5068_p0 = pnand %p5066_p13, %p5799_p8 }
  0xc3   : > { %p5069_p1 = pneg %p5068_p0 }
  0xc5   : > { %p5074_p2 = pnand %p5072_p3, %p5069_p1 }
  0xc7   : > { %5077 = shalt.err (!%p5074_p2)
}
  0xc8   : > { %s5078_s3 = scalar_lea.vmem %s630_s24, 16  ;;  %s5085_s16 = scalar_lea.vmem %s630_s24, 32 }
  0xc9   : > { %p5079_p5 = scmp.ne.s32.totalorder %s630_s24, %s5078_s3  ;;  %p5086_p4 = scmp.lt.s32.totalorder %s630_s24, %s630_s24 }
  0xca   : > { %p5087_p10 = scmp.lt.s32.totalorder %s5085_s16, %s5078_s3 }
  0xcb   : > { %p5081_p7 = pnand %p5079_p5, %p5799_p8 }
  0xcc   : > { %p5088_p11 = por %p5087_p10, %p5086_p4 }
  0xcd   : > { %p5082_p9 = pneg %p5081_p7 }
  0xcf   : > { %p5089_p12 = pnand %p5088_p11, %p5082_p9 }
  0xd1   : > { %5092 = shalt.err (!%p5089_p12)
}
  0xd2   : > { %4595 = dma.hbm_to_vmem [thread:$0]  (!%p5783_p6), %s6744_s11, 16, %s630_s24, [#allocation21]  }
  0xd3   : > { %s6745_s13 = sld [smem:[#allocation67_spill]] }
  0xd9   : > { %s5093_s28 = scalar_lea.hbm %s6745_s13, 16 }
  0xda   : > { %p5094_p13 = scmp.ne.s32.totalorder %s6745_s13, %s5093_s28  ;;  %p5100_p3 = scmp.lt.u32.totalorder %s5093_s28, %s6745_s13 }
  0xdc   : > { %p5096_p0 = pnand %p5094_p13, %p5799_p8 }
  0xde   : > { %p5097_p1 = pneg %p5096_p0 }
  0xe0   : > { %p5102_p2 = pnand %p5100_p3, %p5097_p1 }
  0xe2   : > { %5105 = shalt.err (!%p5102_p2)
}
  0xe3   : > { %s5106_s3 = scalar_lea.vmem %s654_s21, 16  ;;  %s5113_s24 = scalar_lea.vmem %s654_s21, 32 }
  0xe4   : > { %p5107_p5 = scmp.ne.s32.totalorder %s654_s21, %s5106_s3  ;;  %p5114_p4 = scmp.lt.s32.totalorder %s654_s21, %s654_s21 }
  0xe5   : > { %p5115_p10 = scmp.lt.s32.totalorder %s5113_s24, %s5106_s3 }
  0xe6   : > { %p5109_p7 = pnand %p5107_p5, %p5799_p8 }
  0xe7   : > { %p5116_p11 = por %p5115_p10, %p5114_p4 }
  0xe8   : > { %p5110_p9 = pneg %p5109_p7 }
  0xea   : > { %p5117_p12 = pnand %p5116_p11, %p5110_p9 }
  0xec   : > { %5120 = shalt.err (!%p5117_p12)
}
  0xed   : > { %4601 = dma.hbm_to_vmem [thread:$0]  (!%p5783_p6), %s6745_s13, 16, %s654_s21, [#allocation24]  }
  0xee   : > { %s5610_s0 = smov [#allocation26]   ;;  %s5611_s1 = smov [#allocation29]  }
  0xef   : > { %s677_s29 = sshll.u32 %s5610_s0, 4  ;;  %s699_s28 = sshll.u32 %s5611_s1, 4  ;;  %s678_s29 = int_to_ptr.vmem [resolvable:$true] %s677_s29  ;;  %s700_s28 = int_to_ptr.vmem [resolvable:$true] %s699_s28 }
  0xf0   : > { %s5121_s23 = scalar_lea.hbm %s6678_s15, 16 }
  0xf1   : > { %p5122_p13 = scmp.ne.s32.totalorder %s6678_s15, %s5121_s23  ;;  %p5128_p3 = scmp.lt.u32.totalorder %s5121_s23, %s6678_s15 }
  0xf3   : > { %p5124_p0 = pnand %p5122_p13, %p5799_p8 }
  0xf5   : > { %p5125_p1 = pneg %p5124_p0 }
  0xf7   : > { %p5130_p2 = pnand %p5128_p3, %p5125_p1 }
  0xf9   : > { %5133 = shalt.err (!%p5130_p2)
}
  0xfa   : > { %s5134_s21 = scalar_lea.vmem %s678_s29, 16  ;;  %s5141_s18 = scalar_lea.vmem %s678_s29, 32 }
  0xfb   : > { %p5135_p5 = scmp.ne.s32.totalorder %s678_s29, %s5134_s21  ;;  %p5142_p4 = scmp.lt.s32.totalorder %s678_s29, %s678_s29 }
  0xfc   : > { %p5143_p10 = scmp.lt.s32.totalorder %s5141_s18, %s5134_s21 }
  0xfd   : > { %p5137_p7 = pnand %p5135_p5, %p5799_p8 }
  0xfe   : > { %p5144_p11 = por %p5143_p10, %p5142_p4 }
  0xff   : > { %p5138_p9 = pneg %p5137_p7 }
 0x101   : > { %p5145_p12 = pnand %p5144_p11, %p5138_p9 }
 0x103   : > { %5148 = shalt.err (!%p5145_p12)
}
 0x104   : > { %4607 = dma.hbm_to_vmem [thread:$0]  (!%p5783_p6), %s6678_s15, 16, %s678_s29, [#allocation27]  }
 0x105   : > { %s5149_s23 = scalar_lea.hbm %s6680_s17, 16 }
 0x106   : > { %p5150_p13 = scmp.ne.s32.totalorder %s6680_s17, %s5149_s23  ;;  %p5156_p3 = scmp.lt.u32.totalorder %s5149_s23, %s6680_s17 }
 0x108   : > { %p5152_p0 = pnand %p5150_p13, %p5799_p8 }
 0x10a   : > { %p5153_p1 = pneg %p5152_p0 }
 0x10c   : > { %p5158_p2 = pnand %p5156_p3, %p5153_p1 }
 0x10e   : > { %5161 = shalt.err (!%p5158_p2)
}
 0x10f   : > { %s5162_s21 = scalar_lea.vmem %s700_s28, 16  ;;  %s5169_s29 = scalar_lea.vmem %s700_s28, 32 }
 0x110   : > { %p5163_p5 = scmp.ne.s32.totalorder %s700_s28, %s5162_s21  ;;  %p5170_p4 = scmp.lt.s32.totalorder %s700_s28, %s700_s28 }
 0x111   : > { %p5171_p10 = scmp.lt.s32.totalorder %s5169_s29, %s5162_s21 }
 0x112   : > { %p5165_p7 = pnand %p5163_p5, %p5799_p8 }
 0x113   : > { %p5172_p11 = por %p5171_p10, %p5170_p4 }
 0x114   : > { %p5166_p9 = pneg %p5165_p7 }
 0x116   : > { %p5173_p12 = pnand %p5172_p11, %p5166_p9 }
 0x118   : > { %5176 = shalt.err (!%p5173_p12)
}
 0x119   : > { %4613 = dma.hbm_to_vmem [thread:$0]  (!%p5783_p6), %s6680_s17, 16, %s700_s28, [#allocation30]  }
 0x11a   : > { %s5612_s1 = smov [#allocation10]   ;;  %s5613_s22 = smov [#allocation13]  }
 0x11b   : > { %s545_s25 = sshll.u32 %s5612_s1, 4  ;;  %s570_s23 = sshll.u32 %s5613_s22, 4  ;;  %s546_s25 = int_to_ptr.vmem [resolvable:$true] %s545_s25  ;;  %s571_s23 = int_to_ptr.vmem [resolvable:$true] %s570_s23 }
 0x11c   : > { %s6746_s24 = sld [smem:[#allocation58_spill]] }
 0x122   : > { %s6747_s16 = smov %s6746_s24  ;;  %s5177_s26 = scalar_lea.hbm %s6746_s24, 8192 }
 0x123   : > { %p5178_p13 = scmp.ne.s32.totalorder %s6747_s16, %s5177_s26  ;;  %p5184_p3 = scmp.lt.u32.totalorder %s5177_s26, %s6747_s16 }
 0x125   : > { %p5180_p0 = pnand %p5178_p13, %p5799_p8 }
 0x127   : > { %p5181_p1 = pneg %p5180_p0 }
 0x129   : > { %p5186_p2 = pnand %p5184_p3, %p5181_p1 }
 0x12b   : > { %5189 = shalt.err (!%p5186_p2)
}
 0x12c   : > { %s5190_s28 = scalar_lea.vmem %s546_s25, 8192  ;;  %p5198_p4 = scmp.lt.s32.totalorder %s546_s25, %s546_s25 }
 0x12d   : > { %p5191_p5 = scmp.ne.s32.totalorder %s546_s25, %s5190_s28  ;;  %p5199_p10 = scmp.lt.s32.totalorder %s5190_s28, %s5190_s28 }
 0x12f   : > { %p5193_p7 = pnand %p5191_p5, %p5799_p8  ;;  %p5200_p11 = por %p5199_p10, %p5198_p4 }
 0x131   : > { %p5194_p9 = pneg %p5193_p7 }
 0x133   : > { %p5201_p12 = pnand %p5200_p11, %p5194_p9 }
 0x135   : > { %5204 = shalt.err (!%p5201_p12)
}
 0x136   : > { %s6748_s0 = smov 4   ;;  %s6749_s1 = smov 64  }
 0x137   : > { %4574 = dma.hbm_to_vmem [thread:$0]  (!%p5783_p6), %s6747_s16, 8192, %s546_s25, [#allocation9], %s6749_s1, %s6749_s1, %s6748_s0  }
 0x138   : > { %s6750_s6 = sld [smem:[#allocation60_spill]] }
 0x13e   : > { %s5205_s3 = scalar_lea.hbm %s6750_s6, 128 }
 0x13f   : > { %p5206_p13 = scmp.ne.s32.totalorder %s6750_s6, %s5205_s3  ;;  %p5212_p3 = scmp.lt.u32.totalorder %s5205_s3, %s6750_s6 }
 0x141   : > { %p5208_p0 = pnand %p5206_p13, %p5799_p8 }
 0x143   : > { %p5209_p1 = pneg %p5208_p0 }
 0x145   : > { %p5214_p2 = pnand %p5212_p3, %p5209_p1 }
 0x147   : > { %5217 = shalt.err (!%p5214_p2)
}
 0x148   : > { %s5218_s28 = scalar_lea.vmem %s571_s23, 128  ;;  %p5226_p4 = scmp.lt.s32.totalorder %s571_s23, %s571_s23 }
 0x149   : > { %p5219_p5 = scmp.ne.s32.totalorder %s571_s23, %s5218_s28  ;;  %p5227_p10 = scmp.lt.s32.totalorder %s5218_s28, %s5218_s28 }
 0x14b   : > { %p5221_p7 = pnand %p5219_p5, %p5799_p8  ;;  %p5228_p11 = por %p5227_p10, %p5226_p4 }
 0x14d   : > { %p5222_p9 = pneg %p5221_p7 }
 0x14f   : > { %p5229_p12 = pnand %p5228_p11, %p5222_p9 }
 0x151   : > { %5232 = shalt.err (!%p5229_p12)
}
 0x152   : > { %4580 = dma.hbm_to_vmem [thread:$0]  (!%p5783_p6), %s6750_s6, 128, %s571_s23, [#allocation12]  }
 0x153   : > { %s5614_s26 = smov [#allocation16]   ;;  %s5615_s30 = smov [#allocation19]  }
 0x154   : > { %s591_s22 = sshll.u32 %s5614_s26, 4  ;;  %s615_s3 = sshll.u32 %s5615_s30, 4  ;;  %s592_s22 = int_to_ptr.vmem [resolvable:$true] %s591_s22  ;;  %s616_s3 = int_to_ptr.vmem [resolvable:$true] %s615_s3 }
 0x155   : > { %s6751_s8 = sld [smem:[#allocation62_spill]] }
 0x15b   : > { %s5233_s29 = scalar_lea.hbm %s6751_s8, 256 }
 0x15c   : > { %p5234_p13 = scmp.ne.s32.totalorder %s6751_s8, %s5233_s29  ;;  %p5240_p3 = scmp.lt.u32.totalorder %s5233_s29, %s6751_s8 }
 0x15e   : > { %p5236_p0 = pnand %p5234_p13, %p5799_p8 }
 0x160   : > { %p5237_p1 = pneg %p5236_p0 }
 0x162   : > { %p5242_p2 = pnand %p5240_p3, %p5237_p1 }
 0x164   : > { %5245 = shalt.err (!%p5242_p2)
}
 0x165   : > { %s5246_s23 = scalar_lea.vmem %s592_s22, 256  ;;  %p5254_p4 = scmp.lt.s32.totalorder %s592_s22, %s592_s22 }
 0x166   : > { %p5247_p5 = scmp.ne.s32.totalorder %s592_s22, %s5246_s23  ;;  %p5255_p10 = scmp.lt.s32.totalorder %s5246_s23, %s5246_s23 }
 0x168   : > { %p5249_p7 = pnand %p5247_p5, %p5799_p8  ;;  %p5256_p11 = por %p5255_p10, %p5254_p4 }
 0x16a   : > { %p5250_p9 = pneg %p5249_p7 }
 0x16c   : > { %p5257_p12 = pnand %p5256_p11, %p5250_p9 }
 0x16e   : > { %5260 = shalt.err (!%p5257_p12)
}
 0x16f   : > { %4586 = dma.hbm_to_vmem [thread:$0]  (!%p5783_p6), %s6751_s8, 256, %s592_s22, [#allocation15], %s6749_s1, %s6749_s1, %s6748_s0  }
 0x170   : > { %s6752_s10 = sld [smem:[#allocation64_spill]] }
 0x176   : > { %s5261_s24 = scalar_lea.hbm %s6752_s10, 256 }
 0x177   : > { %p5262_p13 = scmp.ne.s32.totalorder %s6752_s10, %s5261_s24  ;;  %p5268_p3 = scmp.lt.u32.totalorder %s5261_s24, %s6752_s10 }
 0x179   : > { %p5264_p0 = pnand %p5262_p13, %p5799_p8 }
 0x17b   : > { %p5265_p1 = pneg %p5264_p0 }
 0x17d   : > { %p5270_p2 = pnand %p5268_p3, %p5265_p1 }
 0x17f   : > { %5273 = shalt.err (!%p5270_p2)
}
 0x180   : > { %s5274_s25 = scalar_lea.vmem %s616_s3, 256  ;;  %p5282_p4 = scmp.lt.s32.totalorder %s616_s3, %s616_s3 }
 0x181   : > { %p5275_p5 = scmp.ne.s32.totalorder %s616_s3, %s5274_s25  ;;  %p5283_p10 = scmp.lt.s32.totalorder %s5274_s25, %s5274_s25 }
 0x183   : > { %p5277_p7 = pnand %p5275_p5, %p5799_p8  ;;  %p5284_p11 = por %p5283_p10, %p5282_p4 }
 0x185   : > { %p5278_p9 = pneg %p5277_p7 }
 0x187   : > { %p5285_p12 = pnand %p5284_p11, %p5278_p9 }
 0x189   : > { %5288 = shalt.err (!%p5285_p12)
}
 0x18a   : > { %4592 = dma.hbm_to_vmem [thread:$0]  (!%p5783_p6), %s6752_s10, 256, %s616_s3, [#allocation18], %s6749_s1, %s6749_s1, %s6748_s0  }
 0x18b   : > { %s5616_s2 = smov [#allocation22]   ;;  %s5617_s26 = smov [#allocation25]  }
 0x18c   : > { %s639_s20 = sshll.u32 %s5616_s2, 4  ;;  %s663_s30 = sshll.u32 %s5617_s26, 4  ;;  %s640_s20 = int_to_ptr.vmem [resolvable:$true] %s639_s20  ;;  %s664_s30 = int_to_ptr.vmem [resolvable:$true] %s663_s30 }
 0x18d   : > { %s6753_s12 = sld [smem:[#allocation66_spill]] }
 0x193   : > { %s5289_s29 = scalar_lea.hbm %s6753_s12, 256 }
 0x194   : > { %p5290_p13 = scmp.ne.s32.totalorder %s6753_s12, %s5289_s29  ;;  %p5296_p3 = scmp.lt.u32.totalorder %s5289_s29, %s6753_s12 }
 0x196   : > { %p5292_p0 = pnand %p5290_p13, %p5799_p8 }
 0x198   : > { %p5293_p1 = pneg %p5292_p0 }
 0x19a   : > { %p5298_p2 = pnand %p5296_p3, %p5293_p1 }
 0x19c   : > { %5301 = shalt.err (!%p5298_p2)
}
 0x19d   : > { %s5302_s3 = scalar_lea.vmem %s640_s20, 256  ;;  %p5310_p4 = scmp.lt.s32.totalorder %s640_s20, %s640_s20 }
 0x19e   : > { %p5303_p5 = scmp.ne.s32.totalorder %s640_s20, %s5302_s3  ;;  %p5311_p10 = scmp.lt.s32.totalorder %s5302_s3, %s5302_s3 }
 0x1a0   : > { %p5305_p7 = pnand %p5303_p5, %p5799_p8  ;;  %p5312_p11 = por %p5311_p10, %p5310_p4 }
 0x1a2   : > { %p5306_p9 = pneg %p5305_p7 }
 0x1a4   : > { %p5313_p12 = pnand %p5312_p11, %p5306_p9 }
 0x1a6   : > { %5316 = shalt.err (!%p5313_p12)
}
 0x1a7   : > { %4598 = dma.hbm_to_vmem [thread:$0]  (!%p5783_p6), %s6753_s12, 256, %s640_s20, [#allocation21], %s6749_s1, %s6749_s1, %s6748_s0  }
 0x1a8   : > { %s6754_s14 = sld [smem:[#allocation68_spill]] }
 0x1ae   : > { %s5317_s21 = scalar_lea.hbm %s6754_s14, 256 }
 0x1af   : > { %p5318_p13 = scmp.ne.s32.totalorder %s6754_s14, %s5317_s21  ;;  %p5324_p3 = scmp.lt.u32.totalorder %s5317_s21, %s6754_s14 }
 0x1b1   : > { %p5320_p0 = pnand %p5318_p13, %p5799_p8 }
 0x1b3   : > { %p5321_p1 = pneg %p5320_p0 }
 0x1b5   : > { %p5326_p2 = pnand %p5324_p3, %p5321_p1 }
 0x1b7   : > { %5329 = shalt.err (!%p5326_p2)
}
 0x1b8   : > { %s5330_s22 = scalar_lea.vmem %s664_s30, 256  ;;  %p5338_p4 = scmp.lt.s32.totalorder %s664_s30, %s664_s30 }
 0x1b9   : > { %p5331_p5 = scmp.ne.s32.totalorder %s664_s30, %s5330_s22  ;;  %p5339_p10 = scmp.lt.s32.totalorder %s5330_s22, %s5330_s22 }
 0x1bb   : > { %p5333_p7 = pnand %p5331_p5, %p5799_p8  ;;  %p5340_p11 = por %p5339_p10, %p5338_p4 }
 0x1bd   : > { %p5334_p9 = pneg %p5333_p7 }
 0x1bf   : > { %p5341_p12 = pnand %p5340_p11, %p5334_p9 }
 0x1c1   : > { %5344 = shalt.err (!%p5341_p12)
}
 0x1c2   : > { %4604 = dma.hbm_to_vmem [thread:$0]  (!%p5783_p6), %s6754_s14, 256, %s664_s30, [#allocation24], %s6749_s1, %s6749_s1, %s6748_s0  }
 0x1c3   : > { %s5618_s23 = smov [#allocation28]   ;;  %s5619_s26 = smov [#allocation31]  }
 0x1c4   : > { %s688_s2 = sshll.u32 %s5618_s23, 4  ;;  %s710_s24 = sshll.u32 %s5619_s26, 4  ;;  %s689_s2 = int_to_ptr.vmem [resolvable:$true] %s688_s2  ;;  %s711_s24 = int_to_ptr.vmem [resolvable:$true] %s710_s24 }
 0x1c5   : > { %s6755_s18 = sld [smem:[#allocation69_spill]] }
 0x1cb   : > { %s5345_s28 = scalar_lea.hbm %s6755_s18, 16 }
 0x1cc   : > { %p5346_p13 = scmp.ne.s32.totalorder %s6755_s18, %s5345_s28  ;;  %p5352_p3 = scmp.lt.u32.totalorder %s5345_s28, %s6755_s18 }
 0x1ce   : > { %p5348_p0 = pnand %p5346_p13, %p5799_p8 }
 0x1d0   : > { %p5349_p1 = pneg %p5348_p0 }
 0x1d2   : > { %p5354_p2 = pnand %p5352_p3, %p5349_p1 }
 0x1d4   : > { %5357 = shalt.err (!%p5354_p2)
}
 0x1d5   : > { %s5358_s0 = scalar_lea.vmem %s689_s2, 16  ;;  %s5365_s1 = scalar_lea.vmem %s689_s2, 32 }
 0x1d6   : > { %p5359_p5 = scmp.ne.s32.totalorder %s689_s2, %s5358_s0  ;;  %p5366_p4 = scmp.lt.s32.totalorder %s689_s2, %s689_s2 }
 0x1d7   : > { %p5367_p10 = scmp.lt.s32.totalorder %s5365_s1, %s5358_s0 }
 0x1d8   : > { %p5361_p7 = pnand %p5359_p5, %p5799_p8 }
 0x1d9   : > { %p5368_p11 = por %p5367_p10, %p5366_p4 }
 0x1da   : > { %p5362_p9 = pneg %p5361_p7 }
 0x1dc   : > { %p5369_p12 = pnand %p5368_p11, %p5362_p9 }
 0x1de   : > { %5372 = shalt.err (!%p5369_p12)
}
 0x1df   : > { %4610 = dma.hbm_to_vmem [thread:$0]  (!%p5783_p6), %s6755_s18, 16, %s689_s2, [#allocation27]  }
 0x1e0   : > { %s6756_s26 = sld [smem:[#allocation70_spill]] }
 0x1e6   : > { %s5373_s21 = scalar_lea.hbm %s6756_s26, 16 }
 0x1e7   : > { %p5374_p13 = scmp.ne.s32.totalorder %s6756_s26, %s5373_s21  ;;  %p5380_p3 = scmp.lt.u32.totalorder %s5373_s21, %s6756_s26 }
 0x1e9   : > { %p5376_p0 = pnand %p5374_p13, %p5799_p8 }
 0x1eb   : > { %p5377_p1 = pneg %p5376_p0 }
 0x1ed   : > { %p5382_p2 = pnand %p5380_p3, %p5377_p1 }
 0x1ef   : > { %5385 = shalt.err (!%p5382_p2)
}
 0x1f0   : > { %s5386_s20 = scalar_lea.vmem %s711_s24, 16  ;;  %s5393_s2 = scalar_lea.vmem %s711_s24, 32 }
 0x1f1   : > { %p5387_p5 = scmp.ne.s32.totalorder %s711_s24, %s5386_s20  ;;  %p5394_p4 = scmp.lt.s32.totalorder %s711_s24, %s711_s24 }
 0x1f2   : > { %p5395_p10 = scmp.lt.s32.totalorder %s5393_s2, %s5386_s20 }
 0x1f3   : > { %p5389_p7 = pnand %p5387_p5, %p5799_p8 }
 0x1f4   : > { %p5396_p11 = por %p5395_p10, %p5394_p4 }
 0x1f5   : > { %p5390_p9 = pneg %p5389_p7 }
 0x1f7   : > { %p5397_p12 = pnand %p5396_p11, %p5390_p9 }
 0x1f9   : > { %5400 = shalt.err (!%p5397_p12)
}
 0x1fa   : > { %4616 = dma.hbm_to_vmem [thread:$0]  (!%p5783_p6), %s6756_s26, 16, %s711_s24, [#allocation30]  }
 0x1fb   : > { %s5620_s30 = smov [#allocation32]   ;;  %s6757_s21 = sld [smem:[#allocation71_spill]] }
 0x1fc   : > { %s721_s3 = sshll.u32 %s5620_s30, 4  ;;  %s722_s3 = int_to_ptr.vmem [resolvable:$true] %s721_s3 }
 0x201   : > { %s5401_s29 = scalar_lea.hbm %s6757_s21, 16 }
 0x202   : > { %p5402_p13 = scmp.ne.s32.totalorder %s6757_s21, %s5401_s29  ;;  %p5408_p3 = scmp.lt.u32.totalorder %s5401_s29, %s6757_s21 }
 0x204   : > { %p5404_p0 = pnand %p5402_p13, %p5799_p8 }
 0x206   : > { %p5405_p1 = pneg %p5404_p0 }
 0x208   : > { %p5410_p2 = pnand %p5408_p3, %p5405_p1 }
 0x20a   : > { %5413 = shalt.err (!%p5410_p2)
}
 0x20b   : > { %s5414_s24 = scalar_lea.vmem %s722_s3, 16  ;;  %s5421_s2 = scalar_lea.vmem %s722_s3, 32 }
 0x20c   : > { %p5415_p5 = scmp.ne.s32.totalorder %s722_s3, %s5414_s24  ;;  %p5422_p4 = scmp.lt.s32.totalorder %s722_s3, %s722_s3 }
 0x20d   : > { %p5423_p10 = scmp.lt.s32.totalorder %s5421_s2, %s5414_s24 }
 0x20e   : > { %p5417_p7 = pnand %p5415_p5, %p5799_p8 }
 0x20f   : > { %p5424_p11 = por %p5423_p10, %p5422_p4 }
 0x210   : > { %p5418_p9 = pneg %p5417_p7 }
 0x212   : > { %p5425_p12 = pnand %p5424_p11, %p5418_p9 }
 0x214   : > { %5428 = shalt.err (!%p5425_p12)
}
 0x215   : > { %s6758_s30 = sld [smem:[#allocation51_spill]]  ;;  %s6759_s5 = sld [smem:[#allocation50_spill]] }
 0x216   : > { %s6760_s23 = sld [smem:[#allocation49_spill]]  ;;  %s6761_s27 = sld [smem:[#allocation48_spill]] }
 0x217   : > { %s6762_s29 = sld [smem:[#allocation52_spill]]  ;;  %s6768_s6 = sld [smem:[#allocation54_spill]] }
 0x218   : > { %4619 = dma.hbm_to_vmem [thread:$0]  (!%p5783_p6), %s6757_s21, 16, %s722_s3, [#allocation33]  }
 0x219   : > { %s6770_s10 = sld [smem:[#allocation55_spill]] }
 0x21b   : > { %s3916_s28 = sadd.s32 4294967294, %s6758_s30   ;;  %s6158_s24 = sadd.s32 1, %s6758_s30  }
 0x21c   : > { %s52_s4 = ssub.s32 %s6758_s30, %s6158_s24  ;;  %s55_s25 = sadd.s32 1, %s6759_s5 }
 0x21d   : > { %p53_p8 = scmp.eq.s32.totalorder %s52_s4, 0  ;;  %p62_p13 = scmp.ne.s32.totalorder %s6759_s5, %s6760_s23 }
 0x21e   : > { %p63_p0 = scmp.eq.s32.totalorder %s6758_s30, 0  ;;  %p68_p1 = scmp.ne.s32.totalorder %s6760_s23, %s6761_s27 }
 0x21f   : > { %s6169_s22 = scalar_select %p53_p8, %s6759_s5, %s55_s25  }
 0x220   : > { %p6171_p3 = por %p63_p0, %p62_p13  ;;  %p6764_p2 = scmp.eq.s32.totalorder %s6762_s29, 0 }
 0x221   : > { %p496_p5 = scmp.eq.s32.totalorder %s6762_s29, 1  ;;  %p502_p7 = scmp.eq.s32.totalorder %s3916_s28, 1 }
 0x222   : > { %p6177_p6 = por %p6764_p2, %p68_p1  ;;  %p4649_p9 = scmp.lt.s32.totalorder %s6758_s30, 2 }
 0x223   : > { %s732_s2 = sand.u32 1, %s6759_s5   ;;  %p6184_p4 = por %p496_p5, %p62_p13 }
 0x224   : > { %s6765_s3 = scalar_select %p6177_p6, 1, 0 }
 0x225   : > { %s6766_s0 = scalar_select %p6184_p4, 1, 0 }
 0x226   : > { %p6188_p10 = por %p502_p7, %p68_p1  ;;  %s6192_s23 = sshll.u32 %s732_s2, 6 }
 0x227   : > { %s4136_s27 = sshll.u32 %s6758_s30, 10  ;;  %s736_s5 = scalar_lea.vmem [#allocation2], %s6192_s23 }
 0x228   : > { %s6767_s1 = scalar_select %p6188_p10, 1, 0 }
 0x229   : > { %s6198_s7 = scalar_lea.hbm %s6768_s6, %s4136_s27  ;;  %s744_s29 = sshll.u32 %s736_s5, 4  ;;  %s6201_s29 = int_to_ptr.vmem [resolvable:$true] %s744_s29 }
 0x22a   : > { %p6205_p11 = pnand %p4649_p9, %p6171_p3  ;;  %s6212_s4 = scalar_lea.hbm %s6770_s10, %s4136_s27 }
 0x22b   : > { %s751_s25 = sand.u32 1, %s6758_s30   ;;  %s733_s11 = scalar_lea.sflag [#allocation3], %s732_s2 }
 0x22c   : > { %s5429_s12 = scalar_lea.hbm %s6198_s7, 1024  ;;  %p5431_p8 = pneg %p6205_p11 }
 0x22d   : > { %p5430_p12 = scmp.ne.s32.totalorder %s6198_s7, %s5429_s12  ;;  %s5434_s13 = scalar_lea.hbm %s6768_s6, 2048 }
 0x22e   : > { %p5435_p1 = scmp.lt.u32.totalorder %s6198_s7, %s6768_s6  ;;  %p5436_p3 = scmp.lt.u32.totalorder %s5434_s13, %s5429_s12 }
 0x22f   : > { %p5432_p13 = pnand %p5431_p8, %p5430_p12  ;;  %p5438_p5 = scmp.lt.u32.totalorder %s5429_s12, %s6198_s7 }
 0x230   : > { %p5437_p2 = por %p5436_p3, %p5435_p1 }
 0x231   : > { %p5433_p0 = pneg %p5432_p13 }
 0x232   : > { %p5439_p7 = por %p5438_p5, %p5437_p2 }
 0x234   : > { %p5440_p9 = pnand %p5439_p7, %p5433_p0 }
 0x236   : > { %5443 = shalt.err (!%p5440_p9)
}
 0x237   : > { %s5444_s9 = scalar_lea.vmem %s6201_s29, 1024  ;;  %s5621_s2 = smov [#allocation2]  }
 0x238   : > { %p5445_p12 = scmp.ne.s32.totalorder %s6201_s29, %s5444_s9  ;;  %s5449_s27 = sshll.u32 %s5621_s2, 4  ;;  %s5450_s27 = int_to_ptr.vmem [resolvable:$false] %s5449_s27 }
 0x239   : > { %s5451_s14 = scalar_lea.vmem %s5450_s27, 2048  ;;  %p5452_p4 = scmp.lt.s32.totalorder %s6201_s29, %s5450_s27 }
 0x23a   : > { %p5447_p13 = pnand %p5445_p12, %p5431_p8  ;;  %p5453_p1 = scmp.lt.s32.totalorder %s5451_s14, %s5444_s9 }
 0x23c   : > { %p5448_p10 = pneg %p5447_p13  ;;  %p5454_p3 = por %p5453_p1, %p5452_p4 }
 0x23e   : > { %p5455_p2 = pnand %p5454_p3, %p5448_p10 }
 0x240   : > { %5458 = shalt.err (!%p5455_p2)
}
 0x241   : > { %4623 = dma.hbm_to_vmem [thread:$0]  (!%p6205_p11), %s6198_s7, 1024, %s6201_s29, %s733_s11  }
 0x242   : > { %s755_s12 = scalar_lea.vmem [#allocation5], %s6192_s23  ;;  %s752_s20 = scalar_lea.sflag [#allocation6], %s751_s25 }
 0x243   : > { %s763_s13 = sshll.u32 %s755_s12, 4  ;;  %s5459_s5 = scalar_lea.hbm %s6212_s4, 1024  ;;  %s764_s13 = int_to_ptr.vmem [resolvable:$true] %s763_s13 }
 0x244   : > { %p5460_p4 = scmp.ne.s32.totalorder %s6212_s4, %s5459_s5  ;;  %s5464_s2 = scalar_lea.hbm %s6770_s10, 2048 }
 0x245   : > { %p5465_p5 = scmp.lt.u32.totalorder %s6212_s4, %s6770_s10  ;;  %p5466_p7 = scmp.lt.u32.totalorder %s5464_s2, %s5459_s5 }
 0x246   : > { %p5462_p10 = pnand %p5460_p4, %p5431_p8  ;;  %p5468_p12 = scmp.lt.u32.totalorder %s5459_s5, %s6212_s4 }
 0x247   : > { %p5467_p9 = por %p5466_p7, %p5465_p5 }
 0x248   : > { %p5463_p0 = pneg %p5462_p10 }
 0x249   : > { %p5469_p13 = por %p5468_p12, %p5467_p9 }
 0x24b   : > { %p5470_p1 = pnand %p5469_p13, %p5463_p0 }
 0x24d   : > { %5473 = shalt.err (!%p5470_p1)
}
 0x24e   : > { %s5474_s7 = scalar_lea.vmem %s764_s13, 1024  ;;  %s5622_s11 = smov [#allocation5]  }
 0x24f   : > { %p5475_p3 = scmp.ne.s32.totalorder %s764_s13, %s5474_s7  ;;  %s5479_s30 = sshll.u32 %s5622_s11, 4  ;;  %s5480_s30 = int_to_ptr.vmem [resolvable:$false] %s5479_s30 }
 0x250   : > { %s5481_s23 = scalar_lea.vmem %s5480_s30, 2048  ;;  %p5482_p10 = scmp.lt.s32.totalorder %s764_s13, %s5480_s30 }
 0x251   : > { %p5477_p2 = pnand %p5475_p3, %p5431_p8  ;;  %p5483_p6 = scmp.lt.s32.totalorder %s5481_s23, %s5474_s7 }
 0x253   : > { %p5478_p4 = pneg %p5477_p2  ;;  %p5484_p5 = por %p5483_p6, %p5482_p10 }
 0x255   : > { %p5485_p7 = pnand %p5484_p5, %p5478_p4 }
 0x257   : > { %5488 = shalt.err (!%p5485_p7)
}
 0x258   : > { %4626 = dma.hbm_to_vmem [thread:$0]  (!%p6205_p11), %s6212_s4, 1024, %s764_s13, %s752_s20  }
 0x259   : > { %s6771_s29 = sld [smem:[#allocation53_spill]] }
 0x25f   : > { %p6772_p0 = scmp.ne.s32.totalorder %s6771_s29, 0 }
 0x260   : > { %s6773_s25 = sld [smem:[#allocation49_spill]] (!%p6772_p0)  ;;  %p6774_p6 = scmp.ne.s32.totalorder (!%p6772_p0), %s6765_s3, 0 }
 0x261   : > { %772 = sbr.rel (%p6772_p0) target bundleno = 2861 (0xb2d), region = 100 }
 0x266   : > { %s6265_s12 = sand.u32 (!%p6772_p0), 1, %s6773_s25  }
 0x267   : > { %s3944_s5 = sshll.u32 (!%p6772_p0), %s6265_s12, 6  ;;  %s775_s8 = scalar_lea.sflag (!%p6772_p0), [#allocation3], %s6265_s12 }
 0x268   : > { %s6269_s9 = scalar_lea.vmem [#allocation2], %s3944_s5 }
 0x269   : > { %5534 = dma.done.wait (%p6774_p6), %s775_s8, 1024  }
 0x26a   : > { %5536 = vsyncadd (%p6774_p6), %s775_s8, 4294966272  ;;  %s6775_s28 = sld [smem:[#allocation52_spill]]  ;;  %s6276_s20 = scalar_lea.vmem [#allocation5], %s3944_s5 }
 0x270   : > { %s783_s4 = sand.u32 1, %s6775_s28  }
 0x271   : > { %s784_s13 = scalar_lea.sflag [#allocation6], %s783_s4 }
 0x272   : > { %5538 = dma.done.wait (%p6774_p6), %s784_s13, 1024  }
 0x273   : > { %5540 = vsyncadd (%p6774_p6), %s784_s13, 4294966272  ;;  %p6776_p11 = scmp.eq.s32.totalorder %s6775_s28, 0 }
 0x275   : > { %5542 = dma.done.wait (%p6776_p11), [#allocation6], 8192   ;;  %p6777_p8 = pmov %p6776_p11 }
 0x277   : > { %5544 = vsyncadd (%p6777_p8), [#allocation6], 4294959104  ;;  %p6778_p9 = pmov %p6777_p8 }
 0x278   : > { %p6779_p12 = pmov %p6777_p8 }
 0x279   : > { %5546 = dma.done.wait (%p6778_p9), [#allocation9], 8208  }
 0x27a   : > { %5548 = vsyncadd (%p6779_p12), [#allocation9], 4294959088  ;;  %p6780_p13 = pmov %p6777_p8 }
 0x27b   : > { %p6781_p1 = pmov %p6777_p8 }
 0x27c   : > { %5550 = dma.done.wait (%p6780_p13), [#allocation12], 144  }
 0x27d   : > { %5552 = vsyncadd (%p6781_p1), [#allocation12], 4294967152  ;;  %p6782_p3 = pmov %p6781_p1 }
 0x27e   : > { %p6783_p2 = pmov %p6781_p1 }
 0x27f   : > { %5554 = dma.done.wait (%p6782_p3), [#allocation15], 384  }
 0x280   : > { %5556 = vsyncadd (%p6783_p2), [#allocation15], 4294966912  ;;  %p6784_p4 = pmov %p6781_p1 }
 0x281   : > { %p6785_p10 = pmov %p6781_p1 }
 0x282   : > { %5558 = dma.done.wait (%p6784_p4), [#allocation18], 272  }
 0x283   : > { %5560 = vsyncadd (%p6785_p10), [#allocation18], 4294967024  ;;  %p6786_p5 = pmov %p6781_p1 }
 0x284   : > { %p6787_p7 = pmov %p6781_p1 }
 0x285   : > { %5562 = dma.done.wait (%p6786_p5), [#allocation21], 272  }
 0x286   : > { %5564 = vsyncadd (%p6787_p7), [#allocation21], 4294967024  ;;  %p6788_p0 = pmov %p6781_p1 }
 0x288   : > { %5566 = dma.done.wait (%p6788_p0), [#allocation24], 272   ;;  %p6789_p6 = pmov %p6788_p0 }
 0x289   : > { %p6790_p11 = pmov %p6788_p0 }
 0x28a   : > { %5568 = vsyncadd (%p6789_p6), [#allocation24], 4294967024 }
 0x28b   : > { %5570 = dma.done.wait (%p6790_p11), [#allocation27], 32   ;;  %p6791_p8 = pmov %p6788_p0 }
 0x28c   : > { %p6792_p9 = pmov %p6788_p0 }
 0x28d   : > { %5572 = vsyncadd (%p6791_p8), [#allocation27], 4294967264 }
 0x28e   : > { %5574 = dma.done.wait (%p6792_p9), [#allocation30], 32   ;;  %p6793_p12 = pmov %p6788_p0 }
 0x28f   : > { %p6794_p13 = pmov %p6788_p0 }
 0x290   : > { %5576 = vsyncadd (%p6793_p12), [#allocation30], 4294967264 }
 0x291   : > { %5578 = dma.done.wait (%p6794_p13), [#allocation33], 16   ;;  %p6795_p1 = pmov %p6788_p0 }
 0x292   : > { %v4753_v0 = vld [vmem:[#allocation7 + $0x40] sm:$0xff]   ;;  %v4757_v4 = vld [vmem:[#allocation7 + $0x48] sm:$0xff]   ;;  %v4761_v8 = vld [vmem:[#allocation7 + $0x50] sm:$0xff]   ;;  %vm5624_vm0 = vmmov 0   ;;  %vm2362_vm1 = vcmask 261120   ;;  %s5625_s3 = smov 96  }
 0x293   : > { %5580 = vsyncadd (%p6795_p1), [#allocation33], 4294967280  ;;  %v4754_v1 = vld [vmem:[#allocation7 + $0xc0] sm:$0xff]   ;;  %4139 = vmatprep.subr.bf16.mxu0 %v4753_v0  ;;  %v4758_v5 = vld [vmem:[#allocation7 + $0xc8] sm:$0xff]   ;;  %s5626_s2 = smov 88   ;;  %s5627_s27 = smov 120  }
 0x294   : > { %v4755_v2 = vld [vmem:[#allocation7] sm:$0xff]   ;;  %4161 = vmatprep.subr.bf16.mxu1 %v4754_v1  ;;  %v4759_v6 = vld [vmem:[#allocation7 + $0x8] sm:$0xff]   ;;  %v4762_v9 = vld [vmem:[#allocation7 + $0xd0] sm:$0xff]   ;;  %s5628_s14 = smov 112   ;;  %s5629_s7 = smov 80   ;;  %vm2478_vm2 = vcmask 64512  }
 0x295   : > { %v4756_v3 = vld [vmem:[#allocation7 + $0x80] sm:$0xff]   ;;  %4140 = vmatpush3.bf16.msra.mxu0 %v4755_v2  ;;  %v4760_v7 = vld [vmem:[#allocation7 + $0x88] sm:$0xff]   ;;  %v4763_v10 = vld [vmem:[#allocation7 + $0x10] sm:$0xff]   ;;  %s5630_s11 = smov 104   ;;  %s5631_s30 = smov 72   ;;  %vm2564_vm5 = vcmask 1043456  }
 0x296   : > { %4162 = vmatpush3.bf16.msra.mxu1 %v4756_v3  ;;  %4141 = vmatprep.subr.bf16.mxu0 %v4757_v4  ;;  %v4764_v11 = vld [vmem:[#allocation7 + $0x90] sm:$0xff]   ;;  %v4765_v12 = vld [vmem:[#allocation7 + $0x58] sm:$0xff]   ;;  %v4769_v16 = vld [vmem:[#allocation7 + $0x60] sm:$0xff]   ;;  %s5632_s23 = smov 56   ;;  %s5633_s29 = smov 64   ;;  %vm2958_vm6 = vcmask 130048  }
 0x297   : > { %4163 = vmatprep.subr.bf16.mxu1 %v4758_v5  ;;  %v4766_v13 = vld [vmem:[#allocation7 + $0xd8] sm:$0xff]   ;;  %v4770_v17 = vld [vmem:[#allocation7 + $0xe0] sm:$0xff]   ;;  %v4773_v20 = vld [vmem:[#allocation7 + $0x68] sm:$0xff]   ;;  %s5634_s25 = smov 48   ;;  %s5635_s5 = smov 40   ;;  %vm2960_vm7 = vcmask 195584  }
 0x298   : > { %v4767_v14 = vld [vmem:[#allocation7 + $0x18] sm:$0xff]   ;;  %v4771_v18 = vld [vmem:[#allocation7 + $0x20] sm:$0xff]   ;;  %v4774_v21 = vld [vmem:[#allocation7 + $0xe8] sm:$0xff]   ;;  %s5636_s8 = smov 8   ;;  %s5638_s4 = smov 24   ;;  %vm3631_vm8 = vcmask 257024  }
 0x299   : > { %4142 = vmatpush3.bf16.msra.mxu0 %v4759_v6  ;;  %v4768_v15 = vld [vmem:[#allocation7 + $0x98] sm:$0xff]   ;;  %v4772_v19 = vld [vmem:[#allocation7 + $0xa0] sm:$0xff]   ;;  %v4775_v22 = vld [vmem:[#allocation7 + $0x28] sm:$0xff]   ;;  %s3964_s13 = sshll.u32 %s6265_s12, 3  ;;  %p6797_p2 = scmp.ne.s32.totalorder %s6766_s0, 0 }
 0x29a   : > { %4164 = vmatpush3.bf16.msra.mxu1 %v4760_v7  ;;  %4143 = vmatprep.subr.bf16.mxu0 %v4761_v8  ;;  %v4776_v23 = vld [vmem:[#allocation7 + $0xa8] sm:$0xff]   ;;  %v4777_v24 = vld [vmem:[#allocation7 + $0x70] sm:$0xff]   ;;  %v4781_v28 = vld [vmem:[#allocation7 + $0x78] sm:$0xff]  }
 0x29b   : > { %4165 = vmatprep.subr.bf16.mxu1 %v4762_v9  ;;  %v4778_v25 = vld [vmem:[#allocation7 + $0xf0] sm:$0xff]   ;;  %v4782_v29 = vld [vmem:[#allocation7 + $0xf8] sm:$0xff]   ;;  %v922_v32 = vld [vmem:[%s6269_s9] sm:$0xff] }
 0x29c   : > { %v4779_v26 = vld [vmem:[#allocation7 + $0x30] sm:$0xff]   ;;  %v4783_v30 = vld [vmem:[#allocation7 + $0x38] sm:$0xff]   ;;  %v923_v33 = vld [vmem:[%s6269_s9 + $0x8] sm:$0xff]  ;;  %v960_v38 = vpack.c.bf16 %v922_v32, %v922_v32 }
 0x29d   : > { %4144 = vmatpush3.bf16.msra.mxu0 %v4763_v10  ;;  %v4780_v27 = vld [vmem:[#allocation7 + $0xb0] sm:$0xff]   ;;  %v4784_v31 = vld [vmem:[#allocation7 + $0xb8] sm:$0xff]   ;;  %v938_v35 = vadd.f32 %v923_v33, %v922_v32  ;;  %v961_v36 = vpack.c.bf16 %v923_v33, %v923_v33  ;;  %v4785_v41 = vld [vmem:[#allocation7 + $0x140] sm:$0xff]  }
 0x29e   : > { %4166 = vmatpush3.bf16.msra.mxu1 %v4764_v11  ;;  %4145 = vmatprep.subr.bf16.mxu0 %v4765_v12  ;;  %v924_v34 = vld [vmem:[%s6269_s9 + $0x10] sm:$0xff]  ;;  %v925_v37 = vld [vmem:[%s6269_s9 + $0x18] sm:$0xff]  ;;  %v4786_v43 = vld [vmem:[#allocation7 + $0x1c0] sm:$0xff]  }
 0x29f   : > { %4167 = vmatprep.subr.bf16.mxu1 %v4766_v13  ;;  %v962_v39 = vpack.c.bf16 %v924_v34, %v924_v34  ;;  %v963_v40 = vpack.c.bf16 %v925_v37, %v925_v37  ;;  %1519 = vmatprep.mubr.bf16.mxu0 %v961_v36  ;;  %v939_v42 = vadd.f32 %v938_v35, %v924_v34  ;;  %v6327_v44 = vld [vmem:[%s6269_s9 + $0x20] sm:$0xff]  ;;  %v4789_v48 = vld [vmem:[#allocation7 + $0x148] sm:$0xff]   ;;  %v4793_v53 = vld [vmem:[#allocation7 + $0x150] sm:$0xff]  }
 0x2a0   : > { %v4787_v45 = vld [vmem:[#allocation7 + $0x100] sm:$0xff]   ;;  %v4790_v50 = vld [vmem:[#allocation7 + $0x1c8] sm:$0xff]   ;;  %v4794_v54 = vld [vmem:[#allocation7 + $0x1d0] sm:$0xff]   ;;  %v964_v12 = vpack.c.bf16 %v6327_v44, %v6327_v44 }
 0x2a1   : > { %4146 = vmatpush3.bf16.msra.mxu0 %v4767_v14  ;;  %1559 = vmatprep.mubr.bf16.mxu1 %v963_v40  ;;  %v940_v46 = vadd.f32 %v939_v42, %v925_v37  ;;  %v4788_v47 = vld [vmem:[#allocation7 + $0x180] sm:$0xff]   ;;  %v4791_v51 = vld [vmem:[#allocation7 + $0x108] sm:$0xff]   ;;  %v4795_v55 = vld [vmem:[#allocation7 + $0x110] sm:$0xff]  }
 0x2a2   : > { %4168 = vmatpush3.bf16.msra.mxu1 %v4768_v15  ;;  %4147 = vmatprep.subr.bf16.mxu0 %v4769_v16  ;;  %v4792_v52 = vld [vmem:[#allocation7 + $0x188] sm:$0xff]   ;;  %v4796_v56 = vld [vmem:[#allocation7 + $0x190] sm:$0xff]   ;;  %v4797_v57 = vld [vmem:[#allocation7 + $0x158] sm:$0xff]  }
 0x2a3   : > { %4169 = vmatprep.subr.bf16.mxu1 %v4770_v17  ;;  %v6330_v49 = vadd.f32 %v940_v46, %v6327_v44  ;;  %v4798_v58 = vld [vmem:[#allocation7 + $0x1d8] sm:$0xff]   ;;  %v4801_v61 = vld [vmem:[#allocation7 + $0x160] sm:$0xff]   ;;  %v4805_v1 = vld [vmem:[#allocation7 + $0x168] sm:$0xff]  }
 0x2a4   : > { %v4799_v59 = vld [vmem:[#allocation7 + $0x118] sm:$0xff]   ;;  %v4802_v62 = vld [vmem:[#allocation7 + $0x1e0] sm:$0xff]   ;;  %v4806_v2 = vld [vmem:[#allocation7 + $0x1e8] sm:$0xff]  }
 0x2a5   : > { %4148 = vmatpush3.bf16.msra.mxu0 %v4771_v18  ;;  %v4800_v60 = vld [vmem:[#allocation7 + $0x198] sm:$0xff]   ;;  %v4803_v63 = vld [vmem:[#allocation7 + $0x120] sm:$0xff]   ;;  %v4807_v3 = vld [vmem:[#allocation7 + $0x128] sm:$0xff]  }
 0x2a6   : > { %4170 = vmatpush3.bf16.msra.mxu1 %v4772_v19  ;;  %4149 = vmatprep.subr.bf16.mxu0 %v4773_v20  ;;  %v4804_v0 = vld [vmem:[#allocation7 + $0x1a0] sm:$0xff]   ;;  %v4808_v4 = vld [vmem:[#allocation7 + $0x1a8] sm:$0xff]   ;;  %v4809_v5 = vld [vmem:[#allocation7 + $0x170] sm:$0xff]  }
 0x2a7   : > { %4171 = vmatprep.subr.bf16.mxu1 %v4774_v21  ;;  %v4810_v6 = vld [vmem:[#allocation7 + $0x1f0] sm:$0xff]   ;;  %v4813_v9 = vld [vmem:[#allocation7 + $0x178] sm:$0xff]   ;;  %v6335_v14 = vld [vmem:[%s6269_s9 + $0x28] sm:$0xff] }
 0x2a8   : > { %v4811_v7 = vld [vmem:[#allocation7 + $0x130] sm:$0xff]   ;;  %v4814_v10 = vld [vmem:[#allocation7 + $0x1f8] sm:$0xff]   ;;  %v965_v15 = vpack.c.bf16 %v6335_v14, %v6335_v14  ;;  %v4817_v20 = vld [vmem:[#allocation10 + $0x40] sm:$0xff]  }
 0x2a9   : > { %4150 = vmatpush3.bf16.msra.mxu0 %v4775_v22  ;;  %v4812_v8 = vld [vmem:[#allocation7 + $0x1b0] sm:$0xff]   ;;  %v4815_v11 = vld [vmem:[#allocation7 + $0x138] sm:$0xff]   ;;  %v4818_v21 = vld [vmem:[#allocation10 + $0xc0] sm:$0xff]  }
 0x2aa   : > { %4172 = vmatpush3.bf16.msra.mxu1 %v4776_v23  ;;  %4151 = vmatprep.subr.bf16.mxu0 %v4777_v24  ;;  %v4816_v13 = vld [vmem:[#allocation7 + $0x1b8] sm:$0xff]   ;;  %v6343_v17 = vld [vmem:[%s6269_s9 + $0x30] sm:$0xff]  ;;  %v4819_v22 = vld [vmem:[#allocation10] sm:$0xff]  }
 0x2ab   : > { %4173 = vmatprep.subr.bf16.mxu1 %v4778_v25  ;;  %v6340_v16 = vld [vmem:[%s6269_s9 + $0x38] sm:$0xff]  ;;  %v966_v19 = vpack.c.bf16 %v6343_v17, %v6343_v17  ;;  %v4820_v23 = vld [vmem:[#allocation10 + $0x80] sm:$0xff]   ;;  %v4821_v24 = vld [vmem:[#allocation10 + $0x48] sm:$0xff]   ;;  %s5637_s9 = smov 16  }
 0x2ac   : > { %v967_v18 = vpack.c.bf16 %v6340_v16, %v6340_v16  ;;  %v4822_v25 = vld [vmem:[#allocation10 + $0xc8] sm:$0xff]   ;;  %v4829_v32 = vld [vmem:[#allocation10 + $0x58] sm:$0xff]   ;;  %v4833_v36 = vld [vmem:[#allocation10 + $0x60] sm:$0xff]  }
 0x2ad   : > { %4152 = vmatpush3.bf16.msra.mxu0 %v4779_v26  ;;  %v4823_v26 = vld [vmem:[#allocation10 + $0x8] sm:$0xff]   ;;  %v4830_v33 = vld [vmem:[#allocation10 + $0xd8] sm:$0xff]   ;;  %v4834_v37 = vld [vmem:[#allocation10 + $0xe0] sm:$0xff]  }
 0x2ae   : > { %4174 = vmatpush3.bf16.msra.mxu1 %v4780_v27  ;;  %4153 = vmatprep.subr.bf16.mxu0 %v4781_v28  ;;  %v4824_v27 = vld [vmem:[#allocation10 + $0x88] sm:$0xff]   ;;  %v4825_v28 = vld [vmem:[#allocation10 + $0x50] sm:$0xff]   ;;  %v4831_v34 = vld [vmem:[#allocation10 + $0x18] sm:$0xff]  }
 0x2af   : > { %4175 = vmatprep.subr.bf16.mxu1 %v4782_v29  ;;  %v4826_v29 = vld [vmem:[#allocation10 + $0xd0] sm:$0xff]   ;;  %v4832_v35 = vld [vmem:[#allocation10 + $0x98] sm:$0xff]   ;;  %v4837_v40 = vld [vmem:[#allocation10 + $0x68] sm:$0xff]  }
 0x2b0   : > { %v4839_v42 = vld [vmem:[#allocation10 + $0x28] sm:$0xff]   ;;  %v4841_v44 = vld [vmem:[#allocation10 + $0x70] sm:$0xff]  }
 0x2b1   : > { %4154 = vmatpush3.bf16.msra.mxu0 %v4783_v30  ;;  %v4827_v30 = vld [vmem:[#allocation10 + $0x10] sm:$0xff]  }
 0x2b2   : > { %4176 = vmatpush3.bf16.msra.mxu1 %v4784_v31  ;;  %4183 = vmatprep.subr.bf16.mxu0 %v4785_v41  ;;  %v4828_v31 = vld [vmem:[#allocation10 + $0x90] sm:$0xff]   ;;  %v4838_v41 = vld [vmem:[#allocation10 + $0xe8] sm:$0xff]  }
 0x2b3   : > { %4205 = vmatprep.subr.bf16.mxu1 %v4786_v43  ;;  %v4840_v43 = vld [vmem:[#allocation10 + $0xa8] sm:$0xff]   ;;  %v4843_v46 = vld [vmem:[#allocation10 + $0x30] sm:$0xff]  }
 0x2b4   : > { %1520 = vmatmul.mubr.bf16.vlgmr.msra.gmra.mrb[0].mxu0 %v960_v38  ;;  %v4835_v38 = vld [vmem:[#allocation10 + $0x20] sm:$0xff]  }
 0x2b5   : > { %1560 = vmatmul.mubr.bf16.vlgmr.msra.gmra.mrb[0].mxu1 %v962_v39  ;;  %4184 = vmatpush3.bf16.msra.mxu0 %v4787_v45  ;;  %v4836_v39 = vld [vmem:[#allocation10 + $0xa0] sm:$0xff]   ;;  %v4842_v45 = vld [vmem:[#allocation10 + $0xf0] sm:$0xff]  }
 0x2b6   : > { %4206 = vmatpush3.bf16.msra.mxu1 %v4788_v47  ;;  %4185 = vmatprep.subr.bf16.mxu0 %v4789_v48  ;;  %v4844_v47 = vld [vmem:[#allocation10 + $0xb0] sm:$0xff]   ;;  %v4845_v48 = vld [vmem:[#allocation10 + $0x78] sm:$0xff]  }
 0x2b7   : > { %4207 = vmatprep.subr.bf16.mxu1 %v4790_v50  ;;  %1599 = vmatprep.mubr.bf16.mxu0 %v965_v15  ;;  %v4846_v50 = vld [vmem:[#allocation10 + $0xf8] sm:$0xff]  }
 0x2b8   : > { %1639 = vmatprep.mubr.bf16.mxu1 %v967_v18  ;;  %v4863_v15 = vld [vmem:[#allocation10 + $0x118] sm:$0xff]  }
 0x2b9   : > { %4186 = vmatpush3.bf16.msra.mxu0 %v4791_v51  ;;  %v4847_v51 = vld [vmem:[#allocation10 + $0x38] sm:$0xff]  }
 0x2ba   : > { %4208 = vmatpush3.bf16.msra.mxu1 %v4792_v52  ;;  %4187 = vmatprep.subr.bf16.mxu0 %v4793_v53  ;;  %v4848_v52 = vld [vmem:[#allocation10 + $0xb8] sm:$0xff]  }
 0x2bb   : > { %4209 = vmatprep.subr.bf16.mxu1 %v4794_v54  ;;  %v930_v53 = vld [vmem:[%s6276_s20] sm:$0xff]  ;;  %v931_v54 = vld [vmem:[%s6276_s20 + $0x8] sm:$0xff] }
 0x2bc   : > { %v4864_v18 = vld [vmem:[#allocation10 + $0x198] sm:$0xff]  }
 0x2bd   : > { %4188 = vmatpush3.bf16.msra.mxu0 %v4795_v55  ;;  %v932_v55 = vld [vmem:[%s6276_s20 + $0x10] sm:$0xff] }
 0x2be   : > { %4210 = vmatpush3.bf16.msra.mxu1 %v4796_v56  ;;  %4189 = vmatprep.subr.bf16.mxu0 %v4797_v57  ;;  %v933_v56 = vld [vmem:[%s6276_s20 + $0x18] sm:$0xff]  ;;  %v1649_v57 = vpack.c.bf16 %v930_v53, %v930_v53 }
 0x2bf   : > { %4211 = vmatprep.subr.bf16.mxu1 %v4798_v58  ;;  %v949_v58 = vadd.f32 %v931_v54, %v930_v53 }
 0x2c1   : > { %4190 = vmatpush3.bf16.msra.mxu0 %v4799_v59  ;;  %v1650_v59 = vpack.c.bf16 %v931_v54, %v931_v54 }
 0x2c2   : > { %4212 = vmatpush3.bf16.msra.mxu1 %v4800_v60  ;;  %4191 = vmatprep.subr.bf16.mxu0 %v4801_v61  ;;  %v1652_v60 = vpack.c.bf16 %v933_v56, %v933_v56  ;;  %v1651_v61 = vpack.c.bf16 %v932_v55, %v932_v55 }
 0x2c3   : > { %4213 = vmatprep.subr.bf16.mxu1 %v4802_v62  ;;  %v4849_v62 = vld [vmem:[#allocation10 + $0x140] sm:$0xff]  }
 0x2c5   : > { %4192 = vmatpush3.bf16.msra.mxu0 %v4803_v63  ;;  %v4850_v63 = vld [vmem:[#allocation10 + $0x1c0] sm:$0xff]  }
 0x2c6   : > { %4214 = vmatpush3.bf16.msra.mxu1 %v4804_v0  ;;  %4193 = vmatprep.subr.bf16.mxu0 %v4805_v1  ;;  %v950_v0 = vadd.f32 %v949_v58, %v932_v55  ;;  %v4851_v1 = vld [vmem:[#allocation10 + $0x100] sm:$0xff]  }
 0x2c7   : > { %4215 = vmatprep.subr.bf16.mxu1 %v4806_v2  ;;  %v4852_v2 = vld [vmem:[#allocation10 + $0x180] sm:$0xff]  }
 0x2c9   : > { %4194 = vmatpush3.bf16.msra.mxu0 %v4807_v3  ;;  %v6353_v3 = vadd.f32 %v950_v0, %v933_v56 }
 0x2ca   : > { %4216 = vmatpush3.bf16.msra.mxu1 %v4808_v4  ;;  %4195 = vmatprep.subr.bf16.mxu0 %v4809_v5  ;;  %v4853_v4 = vld [vmem:[#allocation10 + $0x148] sm:$0xff]  }
 0x2cb   : > { %4217 = vmatprep.subr.bf16.mxu1 %v4810_v6  ;;  %v4854_v5 = vld [vmem:[#allocation10 + $0x1c8] sm:$0xff]  }
 0x2cc   : > { %v4855_v6 = vld [vmem:[#allocation10 + $0x108] sm:$0xff]  }
 0x2cd   : > { %4196 = vmatpush3.bf16.msra.mxu0 %v4811_v7  ;;  %v4856_v7 = vld [vmem:[#allocation10 + $0x188] sm:$0xff]  }
 0x2ce   : > { %4218 = vmatpush3.bf16.msra.mxu1 %v4812_v8  ;;  %4197 = vmatprep.subr.bf16.mxu0 %v4813_v9  ;;  %v4857_v8 = vld [vmem:[#allocation10 + $0x150] sm:$0xff]  }
 0x2cf   : > { %4219 = vmatprep.subr.bf16.mxu1 %v4814_v10  ;;  %v4858_v9 = vld [vmem:[#allocation10 + $0x1d0] sm:$0xff]  }
 0x2d0   : > { %v4859_v10 = vld [vmem:[#allocation10 + $0x110] sm:$0xff]  }
 0x2d1   : > { %4198 = vmatpush3.bf16.msra.mxu0 %v4815_v11  ;;  %v4860_v11 = vld [vmem:[#allocation10 + $0x190] sm:$0xff]  }
 0x2d2   : > { %4220 = vmatpush3.bf16.msra.mxu1 %v4816_v13  ;;  %4227 = vmatprep.subr.bf16.mxu0 %v4817_v20  ;;  %v4862_v13 = vld [vmem:[#allocation10 + $0x1d8] sm:$0xff]   ;;  %v4866_v20 = vld [vmem:[#allocation10 + $0x1e0] sm:$0xff]  }
 0x2d3   : > { %4249 = vmatprep.subr.bf16.mxu1 %v4818_v21  ;;  %v4867_v21 = vld [vmem:[#allocation10 + $0x120] sm:$0xff]  }
 0x2d4   : > { %1600 = vmatmul.mubr.bf16.vlgmr.msra.gmra.mrb[4].mxu0 %v964_v12  ;;  %v4861_v12 = vld [vmem:[#allocation10 + $0x158] sm:$0xff]  }
 0x2d5   : > { %1640 = vmatmul.mubr.bf16.vlgmr.msra.gmra.mrb[4].mxu1 %v966_v19  ;;  %4228 = vmatpush3.bf16.msra.mxu0 %v4819_v22  ;;  %v4865_v19 = vld [vmem:[#allocation10 + $0x160] sm:$0xff]  }
 0x2d6   : > { %4250 = vmatpush3.bf16.msra.mxu1 %v4820_v23  ;;  %4229 = vmatprep.subr.bf16.mxu0 %v4821_v24  ;;  %v4868_v22 = vld [vmem:[#allocation10 + $0x1a0] sm:$0xff]   ;;  %v4869_v23 = vld [vmem:[#allocation10 + $0x168] sm:$0xff]  }
 0x2d7   : > { %4251 = vmatprep.subr.bf16.mxu1 %v4822_v25  ;;  %2208 = vmatprep.mubr.bf16.mxu0 %v1650_v59  ;;  %v4870_v24 = vld [vmem:[#allocation10 + $0x1e8] sm:$0xff]  }
 0x2d8   : > { %2248 = vmatprep.mubr.bf16.mxu1 %v1652_v60  ;;  %v4871_v25 = vld [vmem:[#allocation10 + $0x128] sm:$0xff]  }
 0x2d9   : > { %4230 = vmatpush3.bf16.msra.mxu0 %v4823_v26  ;;  %v4872_v26 = vld [vmem:[#allocation10 + $0x1a8] sm:$0xff]  }
 0x2da   : > { %4252 = vmatpush3.bf16.msra.mxu1 %v4824_v27  ;;  %4231 = vmatprep.subr.bf16.mxu0 %v4825_v28  ;;  %v4873_v27 = vld [vmem:[#allocation10 + $0x170] sm:$0xff]  }
 0x2db   : > { %4253 = vmatprep.subr.bf16.mxu1 %v4826_v29  ;;  %v4874_v28 = vld [vmem:[#allocation10 + $0x1f0] sm:$0xff]  }
 0x2dc   : > { %v4875_v29 = vld [vmem:[#allocation10 + $0x130] sm:$0xff]  }
 0x2dd   : > { %4232 = vmatpush3.bf16.msra.mxu0 %v4827_v30  ;;  %v4876_v30 = vld [vmem:[#allocation10 + $0x1b0] sm:$0xff]  }
 0x2de   : > { %4254 = vmatpush3.bf16.msra.mxu1 %v4828_v31  ;;  %4233 = vmatprep.subr.bf16.mxu0 %v4829_v32  ;;  %v4877_v31 = vld [vmem:[#allocation10 + $0x178] sm:$0xff]  }
 0x2df   : > { %4255 = vmatprep.subr.bf16.mxu1 %v4830_v33  ;;  %v4878_v32 = vld [vmem:[#allocation10 + $0x1f8] sm:$0xff]  }
 0x2e0   : > { %v4879_v33 = vld [vmem:[#allocation10 + $0x138] sm:$0xff]  }
 0x2e1   : > { %4234 = vmatpush3.bf16.msra.mxu0 %v4831_v34  ;;  %v4880_v34 = vld [vmem:[#allocation10 + $0x1b8] sm:$0xff]  }
 0x2e2   : > { %4256 = vmatpush3.bf16.msra.mxu1 %v4832_v35  ;;  %4235 = vmatprep.subr.bf16.mxu0 %v4833_v36  ;;  %v6356_v35 = vld [vmem:[%s6276_s20 + $0x28] sm:$0xff]  ;;  %v6359_v36 = vld [vmem:[%s6276_s20 + $0x38] sm:$0xff] }
 0x2e3   : > { %4257 = vmatprep.subr.bf16.mxu1 %v4834_v37  ;;  %v6362_v37 = vld [vmem:[%s6276_s20 + $0x20] sm:$0xff] }
 0x2e5   : > { %4236 = vmatpush3.bf16.msra.mxu0 %v4835_v38  ;;  %v1654_v38 = vpack.c.bf16 %v6356_v35, %v6356_v35 }
 0x2e6   : > { %4258 = vmatpush3.bf16.msra.mxu1 %v4836_v39  ;;  %4237 = vmatprep.subr.bf16.mxu0 %v4837_v40  ;;  %v1656_v39 = vpack.c.bf16 %v6359_v36, %v6359_v36  ;;  %v1653_v40 = vpack.c.bf16 %v6362_v37, %v6362_v37 }
 0x2e7   : > { %4259 = vmatprep.subr.bf16.mxu1 %v4838_v41  ;;  %v6371_v41 = vld [vmem:[%s6276_s20 + $0x30] sm:$0xff]  ;;  %s4138_s20 = sshll.u32 %s6775_s28, 7  ;;  %s3636_s28 = scalar_lea.sflag [#allocation4], %s6265_s12 }
 0x2e9   : > { %4238 = vmatpush3.bf16.msra.mxu0 %v4839_v42  ;;  %v1655_v42 = vpack.c.bf16 %v6371_v41, %v6371_v41 }
 0x2ea   : > { %4260 = vmatpush3.bf16.msra.mxu1 %v4840_v43  ;;  %4239 = vmatprep.subr.bf16.mxu0 %v4841_v44  ;;  %v4881_v43 = vld [vmem:[#allocation16] sm:$0xff]   ;;  %v5623_v44 = vmov 0.0  }
 0x2eb   : > { %4261 = vmatprep.subr.bf16.mxu1 %v4842_v45  ;;  %v4882_v45 = vld [vmem:[#allocation16 + $0x8] sm:$0xff]  }
 0x2ed   : > { %4240 = vmatpush3.bf16.msra.mxu0 %v4843_v46  ;;  %v4883_v46 = vld [vmem:[#allocation19] sm:$0xff]  }
 0x2ee   : > { %4262 = vmatpush3.bf16.msra.mxu1 %v4844_v47  ;;  %4241 = vmatprep.subr.bf16.mxu0 %v4845_v48  ;;  %v4884_v47 = vld [vmem:[#allocation19 + $0x8] sm:$0xff]  }
 0x2ef   : > { %4263 = vmatprep.subr.bf16.mxu1 %v4846_v50 }
 0x2f1   : > { %4242 = vmatpush3.bf16.msra.mxu0 %v4847_v51  ;;  %v3965_v51 = vld [vmem:[#allocation8] ss:$0 sm:$0xff] }
 0x2f2   : > { %4264 = vmatpush3.bf16.msra.mxu1 %v4848_v52  ;;  %4271 = vmatprep.subr.bf16.mxu0 %v4849_v62 }
 0x2f3   : > { %4293 = vmatprep.subr.bf16.mxu1 %v4850_v63 }
 0x2f4   : > { %2209 = vmatmul.mubr.bf16.vlgmr.msra.gmra.mrb[8].mxu0 %v1649_v57 }
 0x2f5   : > { %2249 = vmatmul.mubr.bf16.vlgmr.msra.gmra.mrb[8].mxu1 %v1651_v61  ;;  %4272 = vmatpush3.bf16.msra.mxu0 %v4851_v1 }
 0x2f6   : > { %4294 = vmatpush3.bf16.msra.mxu1 %v4852_v2  ;;  %4273 = vmatprep.subr.bf16.mxu0 %v4853_v4 }
 0x2f7   : > { %4295 = vmatprep.subr.bf16.mxu1 %v4854_v5  ;;  %2288 = vmatprep.mubr.bf16.mxu0 %v1654_v38 }
 0x2f8   : > { %2328 = vmatprep.mubr.bf16.mxu1 %v1656_v39 }
 0x2f9   : > { %4274 = vmatpush3.bf16.msra.mxu0 %v4855_v6 }
 0x2fa   : > { %4296 = vmatpush3.bf16.msra.mxu1 %v4856_v7  ;;  %4275 = vmatprep.subr.bf16.mxu0 %v4857_v8 }
 0x2fb   : > { %4297 = vmatprep.subr.bf16.mxu1 %v4858_v9 }
 0x2fd   : > { %4276 = vmatpush3.bf16.msra.mxu0 %v4859_v10  ;;  %v1647_v10 = vld [vmem:[#allocation13] sm:$0xff] }
 0x2fe   : > { %4298 = vmatpush3.bf16.msra.mxu1 %v4860_v11  ;;  %4277 = vmatprep.subr.bf16.mxu0 %v4861_v12 }
 0x2ff   : > { %4299 = vmatprep.subr.bf16.mxu1 %v4862_v13 }
 0x301   : > { %4278 = vmatpush3.bf16.msra.mxu0 %v4863_v15 }
 0x302   : > { %4300 = vmatpush3.bf16.msra.mxu1 %v4864_v18  ;;  %4279 = vmatprep.subr.bf16.mxu0 %v4865_v19  ;;  %v4030_v19 = vld [vmem:[#allocation11] ss:$0 sm:$0xff] }
 0x303   : > { %4301 = vmatprep.subr.bf16.mxu1 %v4866_v20 }
 0x305   : > { %4280 = vmatpush3.bf16.msra.mxu0 %v4867_v21 }
 0x306   : > { %4302 = vmatpush3.bf16.msra.mxu1 %v4868_v22  ;;  %4281 = vmatprep.subr.bf16.mxu0 %v4869_v23 }
 0x307   : > { %4303 = vmatprep.subr.bf16.mxu1 %v4870_v24 }
 0x309   : > { %4282 = vmatpush3.bf16.msra.mxu0 %v4871_v25 }
 0x30a   : > { %4304 = vmatpush3.bf16.msra.mxu1 %v4872_v26  ;;  %4283 = vmatprep.subr.bf16.mxu0 %v4873_v27 }
 0x30b   : > { %4305 = vmatprep.subr.bf16.mxu1 %v4874_v28 }
 0x30d   : > { %4284 = vmatpush3.bf16.msra.mxu0 %v4875_v29 }
 0x30e   : > { %4306 = vmatpush3.bf16.msra.mxu1 %v4876_v30  ;;  %4285 = vmatprep.subr.bf16.mxu0 %v4877_v31 }
 0x30f   : > { %4307 = vmatprep.subr.bf16.mxu1 %v4878_v32 }
 0x311   : > { %4286 = vmatpush3.bf16.msra.mxu0 %v4879_v33 }
 0x312   : > { %4308 = vmatpush3.bf16.msra.mxu1 %v4880_v34  ;;  %4359 = vmatprep.subr.bf16.mxu0 %v5623_v44 }
 0x313   : > { %4367 = vmatprep.subr.bf16.mxu1 %v5623_v44 }
 0x314   : > { %2289 = vmatmul.mubr.bf16.vlgmr.msra.gmra.mrb[12].mxu0 %v1653_v40 }
 0x315   : > { %2329 = vmatmul.mubr.bf16.vlgmr.msra.gmra.mrb[12].mxu1 %v1655_v42  ;;  %4360 = vmatpush3.bf16.msra.mxu0 %v4881_v43 }
 0x316   : > { %4361 = vmatprep.subr.bf16.mxu0 %v5623_v44  ;;  %4363 = vmatprep.mubr.msk.bf16.mxu0 %vm5624_vm0, %v5623_v44 }
 0x317   : > { %4371 = vmatprep.mubr.msk.bf16.mxu1 %vm5624_vm0, %v5623_v44  ;;  %4368 = vmatpush3.bf16.msra.mxu1 %v4883_v46  ;;  %v2336_v46 = vld [vmem:[#allocation14] sm:$0xff] }
 0x318   : > { %4369 = vmatprep.subr.bf16.mxu1 %v5623_v44 }
 0x319   : > { %4362 = vmatpush3.bf16.msra.mxu0 %v4882_v45 }
 0x31a   : > { %4375 = vmatprep.subr.bf16.mxu0 %v5623_v44 }
 0x31b   : > { %4370 = vmatpush3.bf16.msra.mxu1 %v4884_v47 }
 0x31c   : > { %4381 = vmatprep.subr.bf16.mxu1 %v5623_v44 }
 0x387   : > { %v4155_v48 = vpop.f32.mrb[0].mxu0 }
 0x388   : > { %v4177_v50 = vpop.f32.mrb[0].mxu1  ;;  %v4156_v52 = vpop.f32.mrb[1].mxu0 }
 0x389   : > { %v4157_v53 = vadd.f32 %v4156_v52, %v4155_v48  ;;  %v4178_v54 = vpop.f32.mrb[1].mxu1  ;;  %v4158_v55 = vpop.f32.mrb[2].mxu0 }
 0x38a   : > { %v4179_v56 = vadd.f32 %v4178_v54, %v4177_v50  ;;  %v4180_v57 = vpop.f32.mrb[2].mxu1  ;;  %v4159_v58 = vpop.f32.mrb[3].mxu0 }
 0x38b   : > { %v1522_v59 = vadd.f32 %v4157_v53, %v3965_v51  ;;  %v4181_v60 = vpop.f32.mrb[3].mxu1  ;;  %v4095_v51 = vld [vmem:[#allocation17] ss:$0 sm:$0xff]  ;;  %v4099_v58 = vld [vmem:[#allocation20] ss:$0 sm:$0xff] }
 0x38d   : > { %v1562_v61 = vadd.f32 %v4179_v56, %v1522_v59 }
 0x3a7   : > { %v4199_v62 = vpop.f32.mrb[4].mxu0 }
 0x3a8   : > { %v4221_v63 = vpop.f32.mrb[4].mxu1  ;;  %v4200_v0 = vpop.f32.mrb[5].mxu0 }
 0x3a9   : > { %v4201_v1 = vadd.f32 %v4200_v0, %v4199_v62  ;;  %v4222_v2 = vpop.f32.mrb[5].mxu1  ;;  %v4202_v4 = vpop.f32.mrb[6].mxu0 }
 0x3aa   : > { %v4223_v5 = vadd.f32 %v4222_v2, %v4221_v63  ;;  %v4224_v6 = vpop.f32.mrb[6].mxu1  ;;  %v4203_v7 = vpop.f32.mrb[7].mxu0 }
 0x3ab   : > { %v1602_v8 = vadd.f32 %v4201_v1, %v1562_v61  ;;  %v4225_v9 = vpop.f32.mrb[7].mxu1  ;;  %v942_v1 = vadd.f32 %v6330_v49, %v6335_v14 }
 0x3ad   : > { %v1642_v11 = vadd.f32 %v4223_v5, %v1602_v8  ;;  %v943_v2 = vadd.f32 %v942_v1, %v6343_v17  ;;  %v952_v5 = vadd.f32 %v6353_v3, %v6362_v37 }
 0x3af   : > { %v6385_v12 = vadd.f32 %v1647_v10, %v1642_v11  ;;  %v944_v4 = vadd.f32 %v943_v2, %v6340_v16  ;;  %v953_v8 = vadd.f32 %v952_v5, %v6356_v35 }
 0x3b1   : > { %v2338_v13 = vpack.c.bf16 %v6385_v12, %v6385_v12  ;;  %v954_v9 = vadd.f32 %v953_v8, %v6371_v41 }
 0x3b3   : > { %4364 = vmatmul.mubr.msk.bf16.vlgmr.msra.gmra.mrb[16].mxu0 %vm2362_vm1, %v2338_v13  ;;  %v955_v16 = vadd.f32 %v954_v9, %v6359_v36 }
 0x3b4   : > { %4377 = vmatprep.mubr.msk.bf16.mxu0 %vm5624_vm0, %v5623_v44 }
 0x3c7   : > { %v4243_v15 = vpop.f32.mrb[8].mxu0 }
 0x3c8   : > { %v4265_v18 = vpop.f32.mrb[8].mxu1  ;;  %v4244_v20 = vpop.f32.mrb[9].mxu0 }
 0x3c9   : > { %v4266_v21 = vpop.f32.mrb[9].mxu1  ;;  %v4245_v22 = vadd.f32 %v4244_v20, %v4243_v15  ;;  %v4246_v24 = vpop.f32.mrb[10].mxu0 }
 0x3ca   : > { %v4267_v23 = vadd.f32 %v4266_v21, %v4265_v18  ;;  %v4268_v25 = vpop.f32.mrb[10].mxu1  ;;  %v4247_v26 = vpop.f32.mrb[11].mxu0 }
 0x3cb   : > { %v4269_v27 = vpop.f32.mrb[11].mxu1  ;;  %v2211_v28 = vadd.f32 %v4245_v22, %v4030_v19  ;;  %v2527_v26 = vlaneseq }
 0x3cd   : > { %v2251_v29 = vadd.f32 %v4267_v23, %v2211_v28  ;;  %v2528_v28 = vand.u32 127, %v2527_v26 }
 0x3e7   : > { %v4287_v30 = vpop.f32.mrb[12].mxu0 }
 0x3e8   : > { %v4309_v31 = vpop.f32.mrb[12].mxu1  ;;  %v4288_v32 = vpop.f32.mrb[13].mxu0 }
 0x3e9   : > { %v4310_v33 = vpop.f32.mrb[13].mxu1  ;;  %v4289_v34 = vadd.f32 %v4288_v32, %v4287_v30  ;;  %v4290_v39 = vpop.f32.mrb[14].mxu0 }
 0x3ea   : > { %v4311_v38 = vadd.f32 %v4310_v33, %v4309_v31  ;;  %v4312_v40 = vpop.f32.mrb[14].mxu1  ;;  %v4291_v42 = vpop.f32.mrb[15].mxu0 }
 0x3eb   : > { %v4313_v43 = vpop.f32.mrb[15].mxu1  ;;  %v2291_v45 = vadd.f32 %v4289_v34, %v2251_v29  ;;  %v2530_v29 = vshrl.u32 %v2527_v26, 7 }
 0x3ed   : > { %v2331_v47 = vadd.f32 %v4311_v38, %v2291_v45  ;;  %v2531_v30 = vsub.s32 %v2528_v28, %v2530_v29 }
 0x3ef   : > { %v6392_v48 = vadd.f32 %v2336_v46, %v2331_v47 }
 0x3f1   : > { %v2406_v50 = vpack.c.bf16 %v6392_v48, %v6392_v48 }
 0x3f3   : > { %4372 = vmatmul.mubr.msk.bf16.vlgmr.msra.gmra.mrb[16].mxu1 %vm2362_vm1, %v2406_v50 }
 0x3f4   : > { %4383 = vmatprep.mubr.msk.bf16.mxu1 %vm5624_vm0, %v5623_v44 }
 0x486   : > { %v2400_v52 = vpop.f32.mrb[16].mxu0 }
 0x487   : > { %v2401_v53 = vadd.f32 %v4095_v51, %v2400_v52  ;;  %v4365_v54 = vpop.f32.mrb[17].mxu0 }
 0x488   : > { %v2403_v55 = vpop.f32.mrb[18].mxu0 }
 0x489   : > { %v6399_v56 = vpack.c.bf16 %v2401_v53, %v2401_v53  ;;  %v4366_v57 = vpop.f32.mrb[19].mxu0 }
 0x48b   : > { %2476 = vrot.lane.b32.xlu0 %v6399_v56, %s5625_s3 }
 0x48f   : > { %2611 = vrot.lane.b32.xlu0 %v6399_v56, %s5626_s2 }
 0x4c6   : > { %v2467_v59 = vpop.f32.mrb[16].mxu1 }
 0x4c7   : > { %v2468_v60 = vadd.f32 %v4099_v58, %v2467_v59  ;;  %v4373_v61 = vpop.f32.mrb[17].mxu1 }
 0x4c8   : > { %v2470_v62 = vpop.f32.mrb[18].mxu1 }
 0x4c9   : > { %v6403_v63 = vpack.c.bf16 %v2468_v60, %v2468_v60  ;;  %v4374_v0 = vpop.f32.mrb[19].mxu1 }
 0x4cb   : > { %2609 = vrot.lane.b32.xlu1 %v6403_v63, %s5627_s27  ;;  %2721 = vrot.lane.b32.xlu0 %v6403_v63, %s5628_s14 }
 0x4cf   : > { %2723 = vrot.lane.b32.xlu1 %v6399_v56, %s5629_s7  ;;  %2833 = vrot.lane.b32.xlu0 %v6403_v63, %s5630_s11 }
 0x4d3   : > { %2835 = vrot.lane.b32.xlu1 %v6399_v56, %s5631_s30  ;;  %3086 = vrot.lane.b32.xlu0 %v6403_v63, %s5626_s2 }
 0x4d7   : > { %2962 = vrot.lane.b32.xlu1 %v6403_v63, %s5625_s3  ;;  %3198 = vrot.lane.b32.xlu0 %v6403_v63, %s5629_s7  ;;  %s920_s3 = scalar_lea.vmem [#allocation34], %s3964_s13  ;;  %s6796_s7 = sld [smem:[#allocation72_spill]] }
 0x4d8   : > { %s3649_s2 = sshll.u32 %s920_s3, 4  ;;  %s6617_s2 = int_to_ptr.vmem [resolvable:$true] %s3649_s2 }
 0x4db   : > { %3084 = vrot.lane.b32.xlu1 %v6399_v56, %s5627_s27  ;;  %3310 = vrot.lane.b32.xlu0 %v6403_v63, %s5631_s30  ;;  %s5489_s30 = scalar_lea.vmem %s6617_s2, 128 }
 0x4dc   : > { %p5490_p3 = scmp.ne.s32.totalorder %s6617_s2, %s5489_s30 }
 0x4de   : > { %p5491_p4 = pnand %p5490_p3, %p6797_p2 }
 0x4df   : > { %3196 = vrot.lane.b32.xlu1 %v6399_v56, %s5628_s14 }
 0x4e0   : > { %p5492_p10 = pneg %p5491_p4 }
 0x4e3   : > { %3308 = vrot.lane.b32.xlu1 %v6399_v56, %s5630_s11  ;;  %s6615_s11 = scalar_lea.hbm %s6796_s7, %s4138_s20 }
 0x4fa   : > { %945 = vadd.xlane.f32.xlu0 %v944_v4 }
 0x4fd   : > { %v2477_v6 = vpop.permute.xlu0 %2476 }
 0x4fe   : > { %v2483_v7 = vsel %vm2478_vm2, %v2477_v6, 0 }
 0x4ff   : > { %4376 = vmatpush3.bf16.xpose.msra.mxu0 %v2483_v7 }
 0x500   : > { %4387 = vmatprep.subr.bf16.mxu0 %v5623_v44 }
 0x501   : > { %v2612_v49 = vpop.permute.xlu0 %2611 }
 0x502   : > { %v2617_v14 = vsel %vm2478_vm2, %v2612_v49, 0 }
 0x506   : > { %4378 = vmatmul.mubr.msk.bf16.vlgmr.msra.gmra.mrb[20].mxu0 %vm2478_vm2, %v6403_v63 }
 0x507   : > { %4388 = vmatpush3.bf16.xpose.msra.mxu0 %v2617_v14  ;;  %4389 = vmatprep.mubr.msk.bf16.mxu0 %vm5624_vm0, %v5623_v44 }
 0x508   : > { %4399 = vmatprep.subr.bf16.mxu0 %v5623_v44  ;;  %956 = vadd.xlane.f32.xlu1 %v955_v16 }
 0x53d   : > { %v2610_v17 = vpop.permute.xlu1 %2609  ;;  %v2722_v37 = vpop.permute.xlu0 %2721 }
 0x53e   : > { %4390 = vmatmul.mubr.msk.bf16.vlgmr.msra.gmra.mrb[24].mxu0 %vm2478_vm2, %v2610_v17 }
 0x53f   : > { %4401 = vmatprep.mubr.msk.bf16.mxu0 %vm5624_vm0, %v5623_v44 }
 0x541   : > { %v2724_v3 = vpop.permute.xlu1 %2723  ;;  %v2834_v11 = vpop.permute.xlu0 %2833 }
 0x542   : > { %v2729_v35 = vsel %vm2478_vm2, %v2724_v3, 0 }
 0x543   : > { %4400 = vmatpush3.bf16.xpose.msra.mxu0 %v2729_v35 }
 0x544   : > { %4411 = vmatprep.subr.bf16.mxu0 %v5623_v44 }
 0x545   : > { %v2836_v36 = vpop.permute.xlu1 %2835  ;;  %v3087_v15 = vpop.permute.xlu0 %3086 }
 0x546   : > { %v2841_v41 = vsel %vm2478_vm2, %v2836_v36, 0  ;;  %v3092_v18 = vsel %vm2478_vm2, %v3087_v15, 0 }
 0x549   : > { %v2963_v10 = vpop.permute.xlu1 %2962  ;;  %v3199_v19 = vpop.permute.xlu0 %3198 }
 0x54a   : > { %4402 = vmatmul.mubr.msk.bf16.vlgmr.msra.gmra.mrb[28].mxu0 %vm2478_vm2, %v2722_v37  ;;  %v2968_v13 = vsel %vm2478_vm2, %v2963_v10, 0  ;;  %v3204_v21 = vsel %vm2478_vm2, %v3199_v19, 0 }
 0x54b   : > { %4412 = vmatpush3.bf16.xpose.msra.mxu0 %v2841_v41  ;;  %4413 = vmatprep.mubr.msk.bf16.mxu0 %vm5624_vm0, %v5623_v44 }
 0x54c   : > { %4423 = vmatprep.subr.bf16.mxu0 %v5623_v44 }
 0x54d   : > { %v3085_v20 = vpop.permute.xlu1 %3084  ;;  %v3311_v22 = vpop.permute.xlu0 %3310 }
 0x54e   : > { %v3316_v24 = vsel %vm2478_vm2, %v3311_v22, 0 }
 0x551   : > { %v3197_v23 = vpop.permute.xlu1 %3196 }
 0x552   : > { %4414 = vmatmul.mubr.msk.bf16.vlgmr.msra.gmra.mrb[32].mxu0 %vm2478_vm2, %v2834_v11 }
 0x553   : > { %4424 = vmatpush3.bf16.xpose.msra.mxu0 %v2968_v13  ;;  %4425 = vmatprep.mubr.msk.bf16.mxu0 %vm5624_vm0, %v5623_v44 }
 0x554   : > { %4435 = vmatprep.subr.bf16.mxu0 %v5623_v44 }
 0x555   : > { %v3309_v25 = vpop.permute.xlu1 %3308 }
 0x55a   : > { %4426 = vmatmul.mubr.msk.bf16.vlgmr.msra.gmra.mrb[36].mxu0 %vm2478_vm2, %v6399_v56 }
 0x55b   : > { %4436 = vmatpush3.bf16.xpose.msra.mxu0 %v3092_v18  ;;  %4437 = vmatprep.mubr.msk.bf16.mxu0 %vm5624_vm0, %v5623_v44 }
 0x55c   : > { %4447 = vmatprep.subr.bf16.mxu0 %v5623_v44 }
 0x562   : > { %4438 = vmatmul.mubr.msk.bf16.vlgmr.msra.gmra.mrb[40].mxu0 %vm2478_vm2, %v3085_v20 }
 0x563   : > { %4448 = vmatpush3.bf16.xpose.msra.mxu0 %v3204_v21  ;;  %4449 = vmatprep.mubr.msk.bf16.mxu0 %vm5624_vm0, %v5623_v44 }
 0x564   : > { %4459 = vmatprep.subr.bf16.mxu0 %v5623_v44 }
 0x56a   : > { %4450 = vmatmul.mubr.msk.bf16.vlgmr.msra.gmra.mrb[44].mxu0 %vm2478_vm2, %v3197_v23 }
 0x56b   : > { %4460 = vmatpush3.bf16.xpose.msra.mxu0 %v3316_v24  ;;  %4461 = vmatprep.mubr.msk.bf16.mxu0 %vm5624_vm0, %v5623_v44 }
 0x56c   : > { %4471 = vmatprep.subr.bf16.mxu0 %v5623_v44 }
 0x572   : > { %4462 = vmatmul.mubr.msk.bf16.vlgmr.msra.gmra.mrb[48].mxu0 %vm2478_vm2, %v3309_v25 }
 0x573   : > { %4475 = vmatprep.mubr.msk.bf16.mxu0 %vm5624_vm0, %v5623_v44 }
 0x587   : > { %v946_v27 = vpop.xlane.xlu0 %945 }
 0x588   : > { %vm947_vm3 = vcmp.eq.f32.partialorder %v946_v27, 0.0 }
 0x589   : > { %v948_v31 = vsel %vm947_vm3, -1e+09, %v5623_v44 }
 0x58a   : > { %v2532_v32 = vrot.slane %v948_v31, %v2531_v30 }
 0x595   : > { %v957_v62 = vpop.xlane.xlu1 %956 }
 0x596   : > { %vm958_vm4 = vcmp.eq.f32.partialorder %v957_v62, 0.0 }
 0x597   : > { %v959_v7 = vsel %vm958_vm4, -1e+09, %v5623_v44 }
 0x598   : > { %v3015_v9 = vrot.slane %v959_v7, %v2531_v30 }
 0x5d9   : > { %v2519_v33 = vpop.f32.mrb[20].mxu0 }
 0x5da   : > { %v2525_v34 = vmul.f32 0.35355338, %v2519_v33  ;;  %v4379_v38 = vpop.f32.mrb[21].mxu0 }
 0x5db   : > { %v2522_v39 = vpop.f32.mrb[22].mxu0 }
 0x5dc   : > { %v4380_v40 = vpop.f32.mrb[23].mxu0  ;;  %v6469_v42 = vadd.f32 %v2532_v32, %v2525_v34 }
 0x5de   : > { %v2547_v43 = vsel %vm2478_vm2, %v6469_v42, -inf }
 0x5df   : > { %2548 = vmax.xlane.f32.xlu0 %v2547_v43 }
 0x611   : > { %v2653_v45 = vpop.f32.mrb[24].mxu0 }
 0x612   : > { %v2659_v46 = vmul.f32 0.35355338, %v2653_v45  ;;  %v4391_v47 = vpop.f32.mrb[25].mxu0 }
 0x613   : > { %v2656_v50 = vpop.f32.mrb[26].mxu0 }
 0x614   : > { %v4392_v51 = vpop.f32.mrb[27].mxu0  ;;  %v6473_v52 = vadd.f32 %v2659_v46, %v2532_v32 }
 0x616   : > { %v2661_v53 = vsel %vm2478_vm2, %v6473_v52, -inf }
 0x617   : > { %2662 = vmax.xlane.f32.xlu0 %v2661_v53 }
 0x61d   : > { %v2765_v54 = vpop.f32.mrb[28].mxu0 }
 0x61e   : > { %v2771_v55 = vmul.f32 0.35355338, %v2765_v54  ;;  %v4403_v57 = vpop.f32.mrb[29].mxu0 }
 0x61f   : > { %v2768_v58 = vpop.f32.mrb[30].mxu0 }
 0x620   : > { %v4404_v59 = vpop.f32.mrb[31].mxu0  ;;  %v6477_v60 = vadd.f32 %v2771_v55, %v2532_v32 }
 0x622   : > { %v2773_v61 = vsel %vm2478_vm2, %v6477_v60, -inf }
 0x623   : > { %2774 = vmax.xlane.f32.xlu1 %v2773_v61 }
 0x625   : > { %v2877_v0 = vpop.f32.mrb[32].mxu0 }
 0x626   : > { %v2883_v1 = vmul.f32 0.35355338, %v2877_v0  ;;  %v4415_v2 = vpop.f32.mrb[33].mxu0 }
 0x627   : > { %v2880_v4 = vpop.f32.mrb[34].mxu0 }
 0x628   : > { %v4416_v5 = vpop.f32.mrb[35].mxu0  ;;  %v6481_v6 = vadd.f32 %v2883_v1, %v2532_v32 }
 0x62a   : > { %v2885_v8 = vsel %vm2478_vm2, %v6481_v6, -inf }
 0x62b   : > { %2886 = vmax.xlane.f32.xlu0 %v2885_v8 }
 0x62d   : > { %v3004_v49 = vpop.f32.mrb[36].mxu0 }
 0x62e   : > { %v3010_v14 = vmul.f32 0.35355338, %v3004_v49  ;;  %v4427_v16 = vpop.f32.mrb[37].mxu0 }
 0x62f   : > { %v3007_v17 = vpop.f32.mrb[38].mxu0 }
 0x630   : > { %v4428_v3 = vpop.f32.mrb[39].mxu0  ;;  %v6486_v35 = vadd.f32 %v3015_v9, %v3010_v14 }
 0x632   : > { %v3024_v36 = vsel %vm2478_vm2, %v6486_v35, -inf }
 0x633   : > { %3025 = vmax.xlane.f32.xlu1 %v3024_v36 }
 0x635   : > { %v3128_v37 = vpop.f32.mrb[40].mxu0 }
 0x636   : > { %v3134_v41 = vmul.f32 0.35355338, %v3128_v37  ;;  %v4439_v10 = vpop.f32.mrb[41].mxu0 }
 0x637   : > { %v3131_v11 = vpop.f32.mrb[42].mxu0 }
 0x638   : > { %v4440_v13 = vpop.f32.mrb[43].mxu0  ;;  %v6490_v15 = vadd.f32 %v3134_v41, %v3015_v9 }
 0x63a   : > { %v3136_v18 = vsel %vm2478_vm2, %v6490_v15, -inf }
 0x63b   : > { %3137 = vmax.xlane.f32.xlu0 %v3136_v18 }
 0x63d   : > { %v3240_v19 = vpop.f32.mrb[44].mxu0 }
 0x63e   : > { %v3246_v20 = vmul.f32 0.35355338, %v3240_v19  ;;  %v4451_v21 = vpop.f32.mrb[45].mxu0 }
 0x63f   : > { %v3243_v22 = vpop.f32.mrb[46].mxu0 }
 0x640   : > { %v4452_v23 = vpop.f32.mrb[47].mxu0  ;;  %v3247_v24 = vadd.f32 %v3246_v20, %v3015_v9 }
 0x642   : > { %v3248_v25 = vsel %vm2478_vm2, %v3247_v24, -inf }
 0x643   : > { %3249 = vmax.xlane.f32.xlu1 %v3248_v25 }
 0x645   : > { %v3352_v26 = vpop.f32.mrb[48].mxu0 }
 0x646   : > { %v3358_v27 = vmul.f32 0.35355338, %v3352_v26  ;;  %v4463_v28 = vpop.f32.mrb[49].mxu0 }
 0x647   : > { %v3355_v29 = vpop.f32.mrb[50].mxu0 }
 0x648   : > { %v4464_v30 = vpop.f32.mrb[51].mxu0  ;;  %v6495_v31 = vadd.f32 %v3358_v27, %v3015_v9 }
 0x64a   : > { %v3360_v38 = vsel %vm2478_vm2, %v6495_v31, -inf }
 0x651   : > { %2673 = vrot.lane.b32.xlu0 %v6399_v56, %s5632_s23 }
 0x654   : > { %2559 = vrot.lane.b32.xlu1 %v6399_v56, %s5633_s29 }
 0x66c   : > { %v2549_v32 = vpop.xlane.xlu0 %2548 }
 0x66d   : > { %v2550_v33 = vsub.f32 %v6469_v42, %v2549_v32 }
 0x66f   : > { %v2551_v34 = vmul.f32 1.442695, %v2550_v33 }
 0x670   : > { %3361 = vmax.xlane.f32.xlu0 %v3360_v38 }
 0x671   : > { %4889 = vpow2.f32 %v2551_v34 }
 0x67b   : > { %v6504_v39 = vpop.eup %4889 }
 0x67c   : > { %v2553_v40 = vsel %vm2478_vm2, %v6504_v39, 0.0 }
 0x67d   : > { %2554 = vadd.xlane.f32.xlu1 %v2553_v40 }
 0x6a4   : > { %v2663_v43 = vpop.xlane.xlu0 %2662 }
 0x6a5   : > { %v2664_v45 = vsub.f32 %v6473_v52, %v2663_v43 }
 0x6a7   : > { %v2665_v46 = vmul.f32 1.442695, %v2664_v45 }
 0x6a9   : > { %4891 = vpow2.f32 %v2665_v46 }
 0x6b0   : > { %v2775_v47 = vpop.xlane.xlu1 %2774 }
 0x6b1   : > { %v2776_v42 = vsub.f32 %v6477_v60, %v2775_v47 }
 0x6b3   : > { %v6510_v50 = vpop.eup %4891  ;;  %v2777_v51 = vmul.f32 1.442695, %v2776_v42 }
 0x6b4   : > { %v2667_v53 = vsel %vm2478_vm2, %v6510_v50, 0.0 }
 0x6b5   : > { %4893 = vpow2.f32 %v2777_v51  ;;  %2668 = vadd.xlane.f32.xlu0 %v2667_v53 }
 0x6b8   : > { %v2887_v58 = vpop.xlane.xlu0 %2886 }
 0x6b9   : > { %v2888_v59 = vsub.f32 %v6481_v6, %v2887_v58 }
 0x6bb   : > { %v2889_v62 = vmul.f32 1.442695, %v2888_v59 }
 0x6bd   : > { %4895 = vpow2.f32 %v2889_v62 }
 0x6bf   : > { %v6514_v54 = vpop.eup %4893 }
 0x6c0   : > { %v2779_v55 = vsel %vm2478_vm2, %v6514_v54, 0.0  ;;  %v3026_v52 = vpop.xlane.xlu1 %3025 }
 0x6c1   : > { %2780 = vadd.xlane.f32.xlu1 %v2779_v55  ;;  %v3027_v0 = vsub.f32 %v6486_v35, %v3026_v52 }
 0x6c3   : > { %v3028_v1 = vmul.f32 1.442695, %v3027_v0 }
 0x6c5   : > { %4897 = vpow2.f32 %v3028_v1 }
 0x6c7   : > { %v4896_v6 = vpop.eup %4895 }
 0x6c8   : > { %v3138_v4 = vpop.xlane.xlu0 %3137  ;;  %v2891_v8 = vsel %vm2478_vm2, %v4896_v6, 0.0 }
 0x6c9   : > { %v3139_v5 = vsub.f32 %v6490_v15, %v3138_v4 }
 0x6cb   : > { %2785 = vrot.lane.b32.xlu0 %v6399_v56, %s5634_s25  ;;  %v3140_v7 = vmul.f32 1.442695, %v3139_v5 }
 0x6cc   : > { %v2674_v35 = vpop.permute.xlu0 %2673 }
 0x6cd   : > { %v2679_v20 = vsel %vm2564_vm5, %v2674_v35, 0 }
 0x6cf   : > { %v6528_v9 = vpop.eup %4897 }
 0x6d0   : > { %v3250_v57 = vpop.xlane.xlu1 %3249  ;;  %v3030_v49 = vsel %vm2478_vm2, %v6528_v9, 0.0 }
 0x6d1   : > { %v3251_v2 = vsub.f32 %v3247_v24, %v3250_v57 }
 0x6d2   : > { %2897 = vrot.lane.b32.xlu1 %v6399_v56, %s5635_s5 }
 0x6d3   : > { %v3252_v56 = vmul.f32 1.442695, %v3251_v2 }
 0x6d4   : > { %v2560_v60 = vpop.permute.xlu1 %2559 }
 0x6d5   : > { %v2566_v61 = vsel %vm2564_vm5, %v2560_v60, 0  ;;  %4899 = vpow2.f32 %v3252_v56 }
 0x6d6   : > { %4382 = vmatpush3.bf16.msra.mxu1 %v2566_v61  ;;  %4901 = vpow2.f32 %v3140_v7 }
 0x6d7   : > { %4393 = vmatprep.subr.bf16.mxu1 %v5623_v44 }
 0x6df   : > { %v6532_v14 = vpop.eup %4899 }
 0x6e0   : > { %v3254_v16 = vsel %vm2478_vm2, %v6532_v14, 0.0  ;;  %v6536_v17 = vpop.eup %4901 }
 0x6e1   : > { %v3142_v3 = vsel %vm2478_vm2, %v6536_v17, 0.0 }
 0x6ea   : > { %2892 = vadd.xlane.f32.xlu0 %v2891_v8 }
 0x6ee   : > { %3031 = vadd.xlane.f32.xlu0 %v3030_v49 }
 0x6f2   : > { %3255 = vadd.xlane.f32.xlu0 %v3254_v16 }
 0x6f6   : > { %3143 = vadd.xlane.f32.xlu1 %v3142_v3 }
 0x6fd   : > { %v3362_v36 = vpop.xlane.xlu0 %3361 }
 0x6fe   : > { %v3363_v37 = vsub.f32 %v6495_v31, %v3362_v36 }
 0x700   : > { %v3364_v41 = vmul.f32 1.442695, %v3363_v37 }
 0x702   : > { %4903 = vpow2.f32 %v3364_v41 }
 0x707   : > { %3148 = vrot.lane.b32.xlu1 %v6403_v63, %s5632_s23  ;;  %s5639_s23 = smov [#allocation34]  }
 0x70a   : > { %v2555_v10 = vpop.xlane.xlu1 %2554 }
 0x70b   : > { %4905 = vrcp.f32 %v2555_v10  ;;  %3260 = vrot.lane.b32.xlu1 %v6403_v63, %s5634_s25  ;;  %s5493_s25 = sshll.u32 %s5639_s23, 4  ;;  %s5494_s25 = int_to_ptr.vmem [resolvable:$false] %s5493_s25 }
 0x70c   : > { %v6545_v11 = vpop.eup %4903  ;;  %p5496_p5 = scmp.lt.s32.totalorder %s6617_s2, %s5494_s25 }
 0x70d   : > { %v3366_v13 = vsel %vm2478_vm2, %v6545_v11, 0.0 }
 0x70e   : > { %3367 = vadd.xlane.f32.xlu0 %v3366_v13 }
 0x70f   : > { %3372 = vrot.lane.b32.xlu1 %v6403_v63, %s5635_s5  ;;  %s5495_s5 = scalar_lea.vmem %s5494_s25, 256 }
 0x710   : > { %p5497_p7 = scmp.lt.s32.totalorder %s5495_s5, %s5489_s30 }
 0x712   : > { %p5498_p0 = por %p5497_p7, %p5496_p5 }
 0x714   : > { %p5499_p6 = pnand %p5498_p0, %p5492_p10 }
 0x715   : > { %v4906_v15 = vpop.eup %4905 }
 0x716   : > { %v2557_v18 = vmul.f32 %v4906_v15, %v6504_v39 }
 0x718   : > { %v2558_v19 = vpack.c.bf16 %v2557_v18, %v2557_v18 }
 0x71a   : > { %4384 = vmatmul.mubr.msk.bf16.vlgmr.msra.gmra.mrb[20].mxu1 %vm2478_vm2, %v2558_v19 }
 0x71b   : > { %4394 = vmatpush3.bf16.msra.mxu1 %v2679_v20  ;;  %4395 = vmatprep.mubr.msk.bf16.mxu1 %vm5624_vm0, %v5623_v44 }
 0x71c   : > { %4405 = vmatprep.subr.bf16.mxu1 %v5623_v44 }
 0x724   : > { %3036 = vrot.lane.b32.xlu0 %v6403_v63, %s5633_s29 }
 0x742   : > { %v2669_v21 = vpop.xlane.xlu0 %2668 }
 0x743   : > { %4907 = vrcp.f32 %v2669_v21  ;;  %v4885_v21 = vld [vmem:[#allocation22] sm:$0xff]  }
 0x744   : > { %4472 = vmatpush3.bf16.msra.mxu0 %v4885_v21 }
 0x745   : > { %4473 = vmatprep.subr.bf16.mxu0 %v5623_v44 }
 0x746   : > { %v2786_v25 = vpop.permute.xlu0 %2785 }
 0x747   : > { %v2791_v27 = vsel %vm2564_vm5, %v2786_v25, 0 }
 0x74d   : > { %v4908_v22 = vpop.eup %4907 }
 0x74e   : > { %v2671_v23 = vmul.f32 %v4908_v22, %v6510_v50  ;;  %v2781_v24 = vpop.xlane.xlu1 %2780  ;;  %v4886_v22 = vld [vmem:[#allocation25] sm:$0xff]  }
 0x74f   : > { %4909 = vrcp.f32 %v2781_v24 }
 0x750   : > { %v2672_v26 = vpack.c.bf16 %v2671_v23, %v2671_v23 }
 0x752   : > { %4396 = vmatmul.mubr.msk.bf16.vlgmr.msra.gmra.mrb[24].mxu1 %vm2478_vm2, %v2672_v26  ;;  %v2898_v29 = vpop.permute.xlu1 %2897 }
 0x753   : > { %4406 = vmatpush3.bf16.msra.mxu1 %v2791_v27  ;;  %4407 = vmatprep.mubr.msk.bf16.mxu1 %vm5624_vm0, %v5623_v44  ;;  %v2903_v31 = vsel %vm2564_vm5, %v2898_v29, 0  ;;  %v4887_v27 = vld [vmem:[#allocation22 + $0x8] sm:$0xff]  }
 0x754   : > { %4417 = vmatprep.subr.bf16.mxu1 %v5623_v44  ;;  %4474 = vmatpush3.bf16.msra.mxu0 %v4887_v27 }
 0x759   : > { %v4910_v63 = vpop.eup %4909 }
 0x75a   : > { %v2783_v28 = vmul.f32 %v4910_v63, %v6514_v54  ;;  %v4888_v63 = vld [vmem:[#allocation25 + $0x8] sm:$0xff]  }
 0x75c   : > { %v2784_v30 = vpack.c.bf16 %v2783_v28, %v2783_v28 }
 0x75e   : > { %4408 = vmatmul.mubr.msk.bf16.vlgmr.msra.gmra.mrb[28].mxu1 %vm2478_vm2, %v2784_v30 }
 0x75f   : > { %4418 = vmatpush3.bf16.msra.mxu1 %v2903_v31  ;;  %4419 = vmatprep.mubr.msk.bf16.mxu1 %vm5624_vm0, %v5623_v44 }
 0x760   : > { %4429 = vmatprep.subr.bf16.mxu1 %v5623_v44 }
 0x777   : > { %v2893_v32 = vpop.xlane.xlu0 %2892 }
 0x778   : > { %4911 = vrcp.f32 %v2893_v32 }
 0x77b   : > { %v3032_v39 = vpop.xlane.xlu0 %3031 }
 0x77c   : > { %4913 = vrcp.f32 %v3032_v39 }
 0x77f   : > { %v3256_v43 = vpop.xlane.xlu0 %3255 }
 0x782   : > { %v4912_v33 = vpop.eup %4911 }
 0x783   : > { %v2895_v34 = vmul.f32 %v4912_v33, %v4896_v6  ;;  %v3144_v40 = vpop.xlane.xlu1 %3143 }
 0x784   : > { %4915 = vrcp.f32 %v3144_v40 }
 0x785   : > { %v2896_v38 = vpack.c.bf16 %v2895_v34, %v2895_v34  ;;  %4917 = vrcp.f32 %v3256_v43 }
 0x786   : > { %v4914_v45 = vpop.eup %4913 }
 0x787   : > { %4420 = vmatmul.mubr.msk.bf16.vlgmr.msra.gmra.mrb[32].mxu1 %vm2478_vm2, %v2896_v38  ;;  %v3034_v47 = vmul.f32 %v4914_v45, %v6528_v9  ;;  %v3149_v51 = vpop.permute.xlu1 %3148 }
 0x788   : > { %4431 = vmatprep.mubr.msk.bf16.mxu1 %vm5624_vm0, %v5623_v44  ;;  %v3154_v55 = vsel %vm2564_vm5, %v3149_v51, 0 }
 0x789   : > { %v3035_v53 = vpack.c.bf16 %v3034_v47, %v3034_v47 }
 0x78b   : > { %v3261_v57 = vpop.permute.xlu1 %3260 }
 0x78c   : > { %v3266_v60 = vsel %vm2564_vm5, %v3261_v57, 0 }
 0x78e   : > { %v4916_v54 = vpop.eup %4915 }
 0x78f   : > { %v3146_v52 = vmul.f32 %v4916_v54, %v6536_v17  ;;  %v4918_v59 = vpop.eup %4917  ;;  %v3373_v62 = vpop.permute.xlu1 %3372 }
 0x790   : > { %v3258_v61 = vmul.f32 %v4918_v59, %v6532_v14  ;;  %v3378_v2 = vsel %vm2564_vm5, %v3373_v62, 0  ;;  %v4119_v62 = vld [vmem:[#allocation23] ss:$0 sm:$0xff] }
 0x791   : > { %v3147_v58 = vpack.c.bf16 %v3146_v52, %v3146_v52 }
 0x792   : > { %v3259_v0 = vpack.c.bf16 %v3258_v61, %v3258_v61 }
 0x79b   : > { %v3368_v46 = vpop.xlane.xlu0 %3367 }
 0x79c   : > { %4919 = vrcp.f32 %v3368_v46 }
 0x79f   : > { %v3037_v42 = vpop.permute.xlu0 %3036 }
 0x7a0   : > { %v3042_v50 = vsel %vm2564_vm5, %v3037_v42, 0 }
 0x7a1   : > { %4430 = vmatpush3.bf16.msra.mxu1 %v3042_v50 }
 0x7a2   : > { %4441 = vmatprep.subr.bf16.mxu1 %v5623_v44 }
 0x7a4   : > { %4432 = vmatmul.mubr.msk.bf16.vlgmr.msra.gmra.mrb[36].mxu1 %vm2478_vm2, %v3035_v53 }
 0x7a5   : > { %4442 = vmatpush3.bf16.msra.mxu1 %v3154_v55  ;;  %4443 = vmatprep.mubr.msk.bf16.mxu1 %vm5624_vm0, %v5623_v44 }
 0x7a6   : > { %4453 = vmatprep.subr.bf16.mxu1 %v5623_v44  ;;  %v4920_v1 = vpop.eup %4919 }
 0x7a7   : > { %v3370_v4 = vmul.f32 %v4920_v1, %v6545_v11 }
 0x7a9   : > { %v3371_v5 = vpack.c.bf16 %v3370_v4, %v3370_v4 }
 0x7ac   : > { %4444 = vmatmul.mubr.msk.bf16.vlgmr.msra.gmra.mrb[40].mxu1 %vm2478_vm2, %v3147_v58 }
 0x7ad   : > { %4454 = vmatpush3.bf16.msra.mxu1 %v3266_v60  ;;  %4455 = vmatprep.mubr.msk.bf16.mxu1 %vm5624_vm0, %v5623_v44 }
 0x7ae   : > { %4465 = vmatprep.subr.bf16.mxu1 %v5623_v44 }
 0x7b4   : > { %4456 = vmatmul.mubr.msk.bf16.vlgmr.msra.gmra.mrb[44].mxu1 %vm2478_vm2, %v3259_v0  ;;  %v4125_v0 = vld [vmem:[#allocation26] ss:$0 sm:$0xff] }
 0x7b5   : > { %4466 = vmatpush3.bf16.msra.mxu1 %v3378_v2  ;;  %4467 = vmatprep.mubr.msk.bf16.mxu1 %vm5624_vm0, %v5623_v44 }
 0x7b6   : > { %4479 = vmatprep.subr.bf16.mxu1 %v5623_v44 }
 0x7bc   : > { %4468 = vmatmul.mubr.msk.bf16.vlgmr.msra.gmra.mrb[48].mxu1 %vm2478_vm2, %v3371_v5 }
 0x7bd   : > { %4483 = vmatprep.mubr.msk.bf16.mxu1 %vm5624_vm0, %v5623_v44  ;;  %4480 = vmatpush3.bf16.msra.mxu1 %v4886_v22 }
 0x7be   : > { %4481 = vmatprep.subr.bf16.mxu1 %v5623_v44 }
 0x7c1   : > { %4482 = vmatpush3.bf16.msra.mxu1 %v4888_v63  ;;  %v4123_v63 = vld [vmem:[#allocation28] ss:$0 sm:$0xff] }
 0x7ed   : > { %v2602_v56 = vpop.f32.mrb[20].mxu1 }
 0x7ee   : > { %v4385_v7 = vpop.f32.mrb[21].mxu1 }
 0x7ef   : > { %v2605_v6 = vpop.f32.mrb[22].mxu1 }
 0x7f0   : > { %v4386_v8 = vpop.f32.mrb[23].mxu1 }
 0x825   : > { %v2715_v9 = vpop.f32.mrb[24].mxu1 }
 0x826   : > { %v4397_v49 = vpop.f32.mrb[25].mxu1 }
 0x827   : > { %v2718_v14 = vpop.f32.mrb[26].mxu1 }
 0x828   : > { %v4398_v16 = vpop.f32.mrb[27].mxu1 }
 0x831   : > { %v2827_v17 = vpop.f32.mrb[28].mxu1 }
 0x832   : > { %v4409_v3 = vpop.f32.mrb[29].mxu1 }
 0x833   : > { %v2830_v35 = vpop.f32.mrb[30].mxu1 }
 0x834   : > { %v4410_v36 = vpop.f32.mrb[31].mxu1 }
 0x85a   : > { %v2939_v37 = vpop.f32.mrb[32].mxu1 }
 0x85b   : > { %v4421_v41 = vpop.f32.mrb[33].mxu1 }
 0x85c   : > { %v2942_v10 = vpop.f32.mrb[34].mxu1 }
 0x85d   : > { %v4422_v11 = vpop.f32.mrb[35].mxu1 }
 0x877   : > { %v3078_v13 = vpop.f32.mrb[36].mxu1 }
 0x878   : > { %v4433_v15 = vpop.f32.mrb[37].mxu1 }
 0x879   : > { %v3081_v18 = vpop.f32.mrb[38].mxu1 }
 0x87a   : > { %v4434_v19 = vpop.f32.mrb[39].mxu1 }
 0x87f   : > { %v3190_v20 = vpop.f32.mrb[40].mxu1 }
 0x880   : > { %v4738_v23 = vpack.i.bf16 %v3190_v20, %v2715_v9  ;;  %v4445_v24 = vpop.f32.mrb[41].mxu1 }
 0x881   : > { %v3193_v25 = vpop.f32.mrb[42].mxu1 }
 0x882   : > { %4739 = vrot.lane.b32.xlu1 %v4738_v23, %s5636_s8  ;;  %v4446_v26 = vpop.f32.mrb[43].mxu1  ;;  %v4129_v25 = vld [vmem:[#allocation31] ss:$0 sm:$0xff] }
 0x887   : > { %v3302_v28 = vpop.f32.mrb[44].mxu1 }
 0x888   : > { %v4743_v29 = vpack.i.bf16 %v3302_v28, %v2827_v17  ;;  %v4457_v30 = vpop.f32.mrb[45].mxu1  ;;  %v4130_v28 = vld [vmem:[#allocation32] ss:$0 sm:$0xff] }
 0x889   : > { %v3305_v31 = vpop.f32.mrb[46].mxu1 }
 0x88a   : > { %4744 = vrot.lane.b32.xlu1 %v4743_v29, %s5637_s9  ;;  %v4458_v32 = vpop.f32.mrb[47].mxu1  ;;  %v4124_v31 = vld [vmem:[#allocation29] ss:$0 sm:$0xff] }
 0x88f   : > { %v3414_v33 = vpop.f32.mrb[48].mxu1 }
 0x890   : > { %v4748_v34 = vpack.i.bf16 %v3414_v33, %v2939_v37  ;;  %v4469_v38 = vpop.f32.mrb[49].mxu1 }
 0x891   : > { %v3417_v39 = vpop.f32.mrb[50].mxu1 }
 0x892   : > { %4749 = vrot.lane.b32.xlu0 %v4748_v34, %s5638_s4  ;;  %v4470_v40 = vpop.f32.mrb[51].mxu1 }
 0x8f4   : > { %v4740_v43 = vpop.permute.xlu1 %4739 }
 0x8f5   : > { %v4742_v45 = vunpack.i.h.bf16 %v4740_v43  ;;  %v4741_v46 = vunpack.i.l.bf16 %v4740_v43 }
 0x8f7   : > { %v3432_v51 = vsel %vm2478_vm2, %v3078_v13, %v4742_v45  ;;  %v2957_v53 = vsel %vm2478_vm2, %v2602_v56, %v4741_v46 }
 0x8fc   : > { %v4745_v44 = vpop.permute.xlu1 %4744 }
 0x8fd   : > { %v4747_v47 = vunpack.i.h.bf16 %v4745_v44  ;;  %v4746_v42 = vunpack.i.l.bf16 %v4745_v44 }
 0x8ff   : > { %v3433_v52 = vsel %vm2958_vm6, %v3432_v51, %v4747_v47  ;;  %v2959_v57 = vsel %vm2958_vm6, %v2957_v53, %v4746_v42 }
 0x904   : > { %v4750_v50 = vpop.permute.xlu0 %4749 }
 0x905   : > { %v4752_v54 = vunpack.i.h.bf16 %v4750_v50  ;;  %v4751_v55 = vunpack.i.l.bf16 %v4750_v50 }
 0x907   : > { %v3434_v58 = vsel %vm2960_vm7, %v3433_v52, %v4752_v54  ;;  %v2961_v59 = vsel %vm2960_vm7, %v2959_v57, %v4751_v55 }
 0x908   : > { %v3533_v60 = vpack.c.bf16 %v3434_v58, %v3434_v58  ;;  %v3435_v61 = vpack.c.bf16 %v2961_v59, %v2961_v59 }
 0x90a   : > { %4476 = vmatmul.mubr.msk.bf16.vlgmr.msra.gmra.mrb[52].mxu0 %vm2362_vm1, %v3435_v61  ;;  %4484 = vmatmul.mubr.msk.bf16.vlgmr.msra.gmra.mrb[52].mxu1 %vm2362_vm1, %v3533_v60 }
 0x9dd   : > { %v3496_v1 = vpop.f32.mrb[52].mxu0  ;;  %v3594_v2 = vpop.f32.mrb[52].mxu1 }
 0x9de   : > { %v3497_v4 = vadd.f32 %v4119_v62, %v3496_v1  ;;  %v3595_v5 = vadd.f32 %v4125_v0, %v3594_v2  ;;  %v4477_v7 = vpop.f32.mrb[53].mxu0  ;;  %v4485_v56 = vpop.f32.mrb[53].mxu1 }
 0x9df   : > { %v3499_v6 = vpop.f32.mrb[54].mxu0  ;;  %v3597_v8 = vpop.f32.mrb[54].mxu1 }
 0x9e0   : > { %v4478_v9 = vpop.f32.mrb[55].mxu0  ;;  %v4486_v49 = vpop.f32.mrb[55].mxu1  ;;  %v3502_v14 = vadd.f32 %v3497_v4, %v6392_v48  ;;  %v3600_v16 = vadd.f32 %v3595_v5, %v6385_v12 }
 0x9e2   : > { %v3505_v17 = vsel %vm2362_vm1, %v3502_v14, 0.0  ;;  %v3603_v3 = vsel %vm2362_vm1, %v3600_v16, 0.0 }
 0x9e3   : > { %3506 = vadd.xlane.f32.xlu1 %v3505_v17  ;;  %3604 = vadd.xlane.f32.xlu0 %v3603_v3 }
 0xa70   : > { %v3507_v35 = vpop.xlane.xlu1 %3506  ;;  %v3605_v36 = vpop.xlane.xlu0 %3604 }
 0xa71   : > { %v3509_v37 = vmul.f32 0.03125, %v3507_v35  ;;  %v3606_v41 = vmul.f32 0.03125, %v3605_v36 }
 0xa73   : > { %v3510_v10 = vsub.f32 %v3502_v14, %v3509_v37  ;;  %v3607_v11 = vsub.f32 %v3600_v16, %v3606_v41 }
 0xa75   : > { %v3511_v13 = vmul.f32 %v3510_v10, %v3510_v10  ;;  %v3608_v15 = vmul.f32 %v3607_v11, %v3607_v11 }
 0xa77   : > { %v3512_v18 = vsel %vm2362_vm1, %v3511_v13, 0.0  ;;  %v3609_v48 = vsel %vm2362_vm1, %v3608_v15, 0.0 }
 0xa78   : > { %3513 = vadd.xlane.f32.xlu0 %v3512_v18  ;;  %3610 = vadd.xlane.f32.xlu1 %v3609_v48 }
 0xb05   : > { %v3611_v12 = vpop.xlane.xlu1 %3610  ;;  %v3514_v19 = vpop.xlane.xlu0 %3513 }
 0xb06   : > { %v3612_v20 = vmul.f32 0.03125, %v3611_v12  ;;  %v3515_v21 = vmul.f32 0.03125, %v3514_v19 }
 0xb08   : > { %v3613_v22 = vadd.f32 1e-05, %v3612_v20  ;;  %v3516_v23 = vadd.f32 1e-05, %v3515_v21 }
 0xb0a   : > { %4921 = vrsqrt.f32 %v3613_v22 }
 0xb0b   : > { %4923 = vrsqrt.f32 %v3516_v23 }
 0xb14   : > { %v4922_v24 = vpop.eup %4921 }
 0xb15   : > { %v4924_v26 = vpop.eup %4923  ;;  %v3615_v27 = vmul.f32 %v4922_v24, %v3607_v11 }
 0xb16   : > { %v3518_v29 = vmul.f32 %v4924_v26, %v3510_v10 }
 0xb17   : > { %v3622_v30 = vmul.f32 %v4129_v25, %v3615_v27 }
 0xb18   : > { %v3525_v32 = vmul.f32 %v4123_v63, %v3518_v29 }
 0xb19   : > { %v3629_v33 = vadd.f32 %v4130_v28, %v3622_v30 }
 0xb1a   : > { %v3532_v34 = vadd.f32 %v4124_v31, %v3525_v32 }
 0xb1b   : > { %v3630_v38 = vpack.c.bf16 %v3629_v33, %v3629_v33 }
 0xb1c   : > { %v3633_v39 = vpack.c.bf16 %v3532_v34, %v3532_v34 }
 0xb1d   : > { %3632 = vst.msk [vmem:[%s920_s3] sm:$0xf] %vm3631_vm8, %v3630_v38 }
 0xb1e   : > { %3634 = vst.msk [vmem:[%s920_s3 + $0x4] sm:$0xf] %vm3631_vm8, %v3633_v39 }
 0xb1f   : > { %5502 = shalt.err (!%p5499_p6)
}
 0xb20   : > { %s5503_s8 = scalar_lea.hbm %s6615_s11, 128  ;;  %s5507_s13 = scalar_lea.hbm %s6796_s7, 256 }
 0xb21   : > { %p5504_p11 = scmp.ne.s32.totalorder %s6615_s11, %s5503_s8  ;;  %p5508_p12 = scmp.lt.u32.totalorder %s6615_s11, %s6796_s7 }
 0xb22   : > { %p5509_p13 = scmp.lt.u32.totalorder %s5507_s13, %s5503_s8  ;;  %p5511_p3 = scmp.lt.u32.totalorder %s5503_s8, %s6615_s11 }
 0xb23   : > { %p5505_p8 = pnand %p5504_p11, %p6797_p2 }
 0xb24   : > { %p5510_p1 = por %p5509_p13, %p5508_p12 }
 0xb25   : > { %p5506_p9 = pneg %p5505_p8 }
 0xb26   : > { %p5512_p4 = por %p5511_p3, %p5510_p1 }
 0xb28   : > { %p5513_p10 = pnand %p5512_p4, %p5506_p9 }
 0xb2a   : > { %5516 = shalt.err (!%p5513_p10)
}
 0xb2b   : > { %s5640_s27 = smov 4  }
 0xb2c   : > { %4563 = dma.vmem_to_hbm [thread:$0]  (%p6797_p2), %s6617_s2, 128, %s6615_s11, %s3636_s28, %s5633_s29, %s5633_s29, %s5640_s27  }
 0xb2d PF: > { %s6798_s14 = sld [smem:[#allocation48_spill]]  ;;  %s6799_s30 = sld [smem:[#allocation51_spill]] }
 0xb2e   : > { %p6800_p5 = scmp.ne.s32.totalorder %s6767_s1, 0 }
 0xb33   : > { %s3664_s23 = sand.u32 1, %s6798_s14   ;;  %p6801_p7 = scmp.ge.s32.totalorder %s6799_s30, 2 }
 0xb34   : > { %s3665_s25 = scalar_lea.sflag [#allocation4], %s3664_s23 }
 0xb35   : > { %p4628_p0 = pnand %p6801_p7, %p6800_p5 }
 0xb37   : > { %5582 = dma.done.wait (!%p4628_p0), %s3665_s25, 128  }
 0xb38   : > { %5584 = vsyncadd (!%p4628_p0), %s3665_s25, 4294967168  ;;  %s6802_s1 = sld [smem:[#allocation49_spill]]  ;;  %s6803_s0 = sld [smem:[#allocation50_spill]] }
 0xb39   : > { %s6804_s5 = smov %s6169_s22  ;;  %p45_p6 = scmp.ge.s32.totalorder %s6158_s24, 4  }
 0xb3a   : > { %s6806_s23 = smov %s6804_s5 }
 0xb3b   :  { %47 = sbr.rel (!%p45_p6) target bundleno = 36 (0x24), region = 230 }
 0xb3e   : > { %s6805_s22 = smov %s6803_s0 }
 0xb42   :  { %3670 = vsyncpa [#allocation3], 1 }
 0xb43   :  { %3672 = vsyncpa [#allocation3 + $0x1], 1 }
 0xb44   :  { %3673 = vsyncpa [#allocation6], 1 }
 0xb45   :  { %3675 = vsyncpa [#allocation6 + $0x1], 1 }
 0xb46   :  { %3676 = vsyncpa [#allocation9], 1 }
 0xb47   :  { %3677 = vsyncpa [#allocation12], 1 }
 0xb48   :  { %3678 = vsyncpa [#allocation15], 1 }
 0xb49   :  { %3679 = vsyncpa [#allocation18], 1 }
 0xb4a   :  { %3680 = vsyncpa [#allocation21], 1 }
 0xb4b   :  { %3681 = vsyncpa [#allocation24], 1 }
 0xb4c   :  { %3682 = vsyncpa [#allocation27], 1 }
 0xb4d   :  { %3683 = vsyncpa [#allocation30], 1 }
 0xb4e   :  { %3684 = vsyncpa [#allocation33], 1 }
 0xb4f   :  { %3685 = vsyncpa [#allocation4], 1 }
 0xb50   :  { %3687 = vsyncpa [#allocation4 + $0x1], 1 }

</bundles_post_ra>
